<compile_context>
chip_gen: v7x
topology: tpu7x:2x2x1
jax: 0.10.0
libtpu: 0.0.40
codegen_flags: <defaults>
</compile_context>

<pallas_src>
import functools

import jax
import jax.numpy as jnp
from jax.experimental import pallas as pl
from jax.experimental.pallas import tpu as pltpu

INPUT_CHANNELS = 1
SEQ_LEN = 64
NUM_CLASSES = 1
CHANNELS = [16, 32, 64, 128]
KERNEL_SIZES = [5, 5, 3, 3]
FC_DIMS = [256, 128]
ADAPTIVE_TARGET = 16

# TODO(synk): if batch tiles ever grow large, re-derive this for v7x's 64 MiB VMEM
# (32 MiB scoped default) and set pltpu.CompilerParams(vmem_limit_bytes=...) explicitly.
MAX_BATCH_TILE = 128


# ----------------------------------------------------------------------------
# Fused forward kernel: conv stack + adaptive pool + MLP head, one batch tile
# per grid step.  All weights are resident in VMEM (~2.3 MB total).
# ----------------------------------------------------------------------------
def _fused_forward_kernel(*refs, n_conv, kernel_sizes, pool_sizes, adaptive_target):
    x_ref = refs[0]                                  # (bt, L, C_in)  NLC, C on lanes
    conv_refs = refs[1:1 + 2 * n_conv]               # (w_col, bias) per conv layer
    (w1_ref, b1_ref, w2_ref, b2_ref, w3_ref, b3_ref, o_ref) = refs[1 + 2 * n_conv:]

    act = x_ref[...].astype(jnp.float32)             # (bt, L, C_in)
    bt, L, _ = act.shape

    # --- conv stages: im2col matmul + bias + ReLU + MaxPool1d, lane-dense in C ---
    for li in range(n_conv):
        w_ref = conv_refs[2 * li]                    # (K*C_in, C_out), lane-dense C_out
        b_ref = conv_refs[2 * li + 1]                # (1, C_out)
        K = kernel_sizes[li]
        pool = pool_sizes[li]
        c_in = act.shape[-1]
        c_out = w_ref.shape[-1]
        pad = K // 2                                 # 'same' length (odd K)

        zpad = jnp.zeros((bt, pad, c_in), jnp.float32)
        xpad = jnp.concatenate([zpad, act, zpad], axis=1)          # (bt, L+2*pad, c_in)
        # im2col along the lane axis; feature index = k*C_in + c_in (matches w_col rows)
        xcol = jnp.concatenate([xpad[:, k:k + L, :] for k in range(K)], axis=-1)
        y = jnp.dot(xcol.reshape(bt * L, K * c_in), w_ref[...],
                    preferred_element_type=jnp.float32)            # (bt*L, C_out)
        y = jnp.maximum(y + b_ref[...], 0.0)                       # bias + ReLU

        # MaxPool1d(kernel=pool, stride=pool): reshape + reduce (no strided slices)
        l_pool = L // pool
        if L % pool:                                 # PyTorch floors; unused for defaults
            y = y.reshape(bt, L, c_out)[:, :l_pool * pool, :]
        y = jnp.max(y.reshape(bt * l_pool, pool, c_out), axis=1)   # (bt*l_pool, C_out)
        act = y.reshape(bt, l_pool, c_out)
        L = l_pool
        # Dropout is identity in eval mode.

    # --- AdaptiveMaxPool1d(target) fused with Linear #1 -------------------------
    # PyTorch bin i covers L-positions [floor(i*L/T), ceil((i+1)*L/T)); the flatten
    # order (c*T + i) is absorbed into the host-side permutation of w1's rows, so
    # bin i multiplies the (i*C_last : (i+1)*C_last) row-slab of w1.
    c_last = act.shape[-1]
    h = jnp.zeros((bt, w1_ref.shape[-1]), jnp.float32)
    for i in range(adaptive_target):
        s = (i * L) // adaptive_target
        e = -(-((i + 1) * L) // adaptive_target)
        bin_i = jnp.max(act[:, s:e, :], axis=1)                    # (bt, C_last)
        h = h + jnp.dot(bin_i, w1_ref[i * c_last:(i + 1) * c_last, :],
                        preferred_element_type=jnp.float32)
    h = jnp.maximum(h + b1_ref[...], 0.0)                          # FC1 + ReLU
    h = jnp.maximum(jnp.dot(h, w2_ref[...], preferred_element_type=jnp.float32)
                    + b2_ref[...], 0.0)                            # FC2 + ReLU
    out = jnp.dot(h, w3_ref[...], preferred_element_type=jnp.float32) + b3_ref[...]
    o_ref[...] = out.reshape(bt, 1, out.shape[-1]).astype(o_ref.dtype)


# ----------------------------------------------------------------------------
# Host-side weight re-layout (done once, under jit): lane-dense conv weights and
# FC1 rows permuted to the kernel's (l, c) flatten order.
# ----------------------------------------------------------------------------
def _prepare_params(conv_params, fc_params):
    conv_prepped = []
    for w, b in conv_params:                         # w: (C_out, C_in, K) PyTorch layout
        c_out, c_in, k = w.shape
        w_col = jnp.transpose(w, (2, 1, 0)).reshape(k * c_in, c_out)   # rows = k*C_in + c
        conv_prepped.append((w_col, b.reshape(1, c_out)))

    (w1, b1), (w2, b2), (w3, b3) = fc_params         # stored (in, out)
    c_last = conv_params[-1][0].shape[0]
    n1 = w1.shape[1]
    # PyTorch flatten of (C, T) is feature = c*T + l; kernel consumes (l, c) order.
    w1p = (w1.reshape(c_last, ADAPTIVE_TARGET, n1)
             .transpose(1, 0, 2)
             .reshape(ADAPTIVE_TARGET * c_last, n1))
    fc_prepped = [(w1p, b1.reshape(1, -1)),
                  (w2, b2.reshape(1, -1)),
                  (w3, b3.reshape(1, -1))]
    return conv_prepped, fc_prepped


def conv1d_forward(x, conv_params, fc_params):
    # Mirrors Conv1D.forward (eval mode: dropout identity, batch_norm=False).
    if x.ndim == 2:
        x = x[:, None, :]                            # (B, L) -> (B, 1, L)
    B, c_in, L = x.shape
    x_nlc = jnp.transpose(x, (0, 2, 1)).astype(jnp.float32)        # (B, L, C_in)

    conv_prepped, fc_prepped = _prepare_params(conv_params, fc_params)
    kernel_sizes = tuple(w.shape[2] for w, _ in conv_params)
    pool_sizes = tuple(4 if i == 0 else 2 for i in range(len(conv_params)))
    num_classes = fc_prepped[-1][0].shape[1]

    # Batch tiling: fold the batch into the matmul rows; use >= 2 "parallel" grid
    # steps when possible so both v7x TensorCores get work (no effect on v5e/v6e).
    if B == 1:
        b_tile = 1
    else:
        b_tile = min(MAX_BATCH_TILE, pl.cdiv(B, 2))
    num_tiles = pl.cdiv(B, b_tile)
    b_pad = num_tiles * b_tile
    if b_pad != B:
        x_nlc = jnp.concatenate(
            [x_nlc, jnp.zeros((b_pad - B,) + x_nlc.shape[1:], x_nlc.dtype)], axis=0)

    params_flat = []
    for w, b in conv_prepped:
        params_flat += [w, b]
    for w, b in fc_prepped:
        params_flat += [w, b]

    def _const2d(i):
        return (0, 0)

    in_specs = [pl.BlockSpec((b_tile, L, c_in), lambda i: (i, 0, 0))]
    in_specs += [pl.BlockSpec(p.shape, _const2d) for p in params_flat]
    out_specs = pl.BlockSpec((b_tile, 1, num_classes), lambda i: (i, 0, 0))

    kernel = functools.partial(
        _fused_forward_kernel,
        n_conv=len(conv_prepped),
        kernel_sizes=kernel_sizes,
        pool_sizes=pool_sizes,
        adaptive_target=ADAPTIVE_TARGET,
    )
    out = pl.pallas_call(
        kernel,
        out_shape=jax.ShapeDtypeStruct((b_pad, 1, num_classes), jnp.float32),
        grid=(num_tiles,),
        in_specs=in_specs,
        out_specs=out_specs,
        compiler_params=pltpu.CompilerParams(dimension_semantics=("parallel",)),
    )(x_nlc, *params_flat)
    return out[:B, 0, :]


# ----------------------------------------------------------------------------
# Parameter init (deterministic, Kaiming-normal like the PyTorch module; biases 0).
# ----------------------------------------------------------------------------
def init_params(key):
    conv_params = []
    in_c = INPUT_CHANNELS
    for c_out, k in zip(CHANNELS, KERNEL_SIZES):
        key, wk = jax.random.split(key)
        std = (2.0 / (c_out * k)) ** 0.5             # kaiming_normal_, fan_out
        w = std * jax.random.normal(wk, (c_out, in_c, k), jnp.float32)
        b = jnp.zeros((c_out,), jnp.float32)
        conv_params.append((w, b))
        in_c = c_out

    fc_params = []
    prev = CHANNELS[-1] * ADAPTIVE_TARGET            # 128 * 16 = 2048
    for d in FC_DIMS + [NUM_CLASSES]:
        key, wk = jax.random.split(key)
        std = (2.0 / prev) ** 0.5                    # kaiming_normal_, fan_in
        w = std * jax.random.normal(wk, (prev, d), jnp.float32)   # stored (in, out)
        b = jnp.zeros((1, d), jnp.float32)
        fc_params.append((w, b))
        prev = d
    return conv_params, fc_params


if __name__ == "__main__":
    key = jax.random.PRNGKey(0)
    pkey, xkey = jax.random.split(key)
    conv_params, fc_params = init_params(pkey)

    batch = 2
    x = jax.random.normal(xkey, (batch, SEQ_LEN), jnp.float32)     # 2-D -> unsqueezed

    fwd = jax.jit(conv1d_forward)
    out = jax.block_until_ready(fwd(x, conv_params, fc_params))
    assert out.shape == (batch, NUM_CLASSES), out.shape
    assert out.dtype == jnp.float32
    print("KERNEL_OK")
</pallas_src>

<mosaic_0001>
module attributes {stable_mosaic.version = 11 : i64} {
  func.func @_fused_forward_kernel(%arg0: i32, %arg1: memref<1x64x1xf32, #tpu.memory_space<vmem>>, %arg2: memref<5x16xf32, #tpu.memory_space<vmem>>, %arg3: memref<1x16xf32, #tpu.memory_space<vmem>>, %arg4: memref<80x32xf32, #tpu.memory_space<vmem>>, %arg5: memref<1x32xf32, #tpu.memory_space<vmem>>, %arg6: memref<96x64xf32, #tpu.memory_space<vmem>>, %arg7: memref<1x64xf32, #tpu.memory_space<vmem>>, %arg8: memref<192x128xf32, #tpu.memory_space<vmem>>, %arg9: memref<1x128xf32, #tpu.memory_space<vmem>>, %arg10: memref<2048x256xf32, #tpu.memory_space<vmem>>, %arg11: memref<1x256xf32, #tpu.memory_space<vmem>>, %arg12: memref<256x128xf32, #tpu.memory_space<vmem>>, %arg13: memref<1x128xf32, #tpu.memory_space<vmem>>, %arg14: memref<128x1xf32, #tpu.memory_space<vmem>>, %arg15: memref<1x1xf32, #tpu.memory_space<vmem>>, %arg16: memref<1x1x1xf32, #tpu.memory_space<vmem>>) attributes {dimension_semantics = [#tpu.dimension_semantics<parallel>], iteration_bounds = array<i64: 2>, scalar_prefetch = 0 : i64, scratch_operands = 0 : i64, tpu.core_type = #tpu.core_type<tc>, window_params = [{transform_indices = @transform_0, window_bounds = array<i64: 1, 64, 1>}, {pipeline_mode = #tpu.pipeline_mode<synchronous>, transform_indices = @transform_1, window_bounds = array<i64: 5, 16>}, {pipeline_mode = #tpu.pipeline_mode<synchronous>, transform_indices = @transform_2, window_bounds = array<i64: 1, 16>}, {pipeline_mode = #tpu.pipeline_mode<synchronous>, transform_indices = @transform_3, window_bounds = array<i64: 80, 32>}, {pipeline_mode = #tpu.pipeline_mode<synchronous>, transform_indices = @transform_4, window_bounds = array<i64: 1, 32>}, {pipeline_mode = #tpu.pipeline_mode<synchronous>, transform_indices = @transform_5, window_bounds = array<i64: 96, 64>}, {pipeline_mode = #tpu.pipeline_mode<synchronous>, transform_indices = @transform_6, window_bounds = array<i64: 1, 64>}, {pipeline_mode = #tpu.pipeline_mode<synchronous>, transform_indices = @transform_7, window_bounds = array<i64: 192, 128>}, {pipeline_mode = #tpu.pipeline_mode<synchronous>, transform_indices = @transform_8, window_bounds = array<i64: 1, 128>}, {pipeline_mode = #tpu.pipeline_mode<synchronous>, transform_indices = @transform_9, window_bounds = array<i64: 2048, 256>}, {pipeline_mode = #tpu.pipeline_mode<synchronous>, transform_indices = @transform_10, window_bounds = array<i64: 1, 256>}, {pipeline_mode = #tpu.pipeline_mode<synchronous>, transform_indices = @transform_11, window_bounds = array<i64: 256, 128>}, {pipeline_mode = #tpu.pipeline_mode<synchronous>, transform_indices = @transform_12, window_bounds = array<i64: 1, 128>}, {pipeline_mode = #tpu.pipeline_mode<synchronous>, transform_indices = @transform_13, window_bounds = array<i64: 128, 1>}, {pipeline_mode = #tpu.pipeline_mode<synchronous>, transform_indices = @transform_14, window_bounds = array<i64: 1, 1>}, {transform_indices = @transform_15, window_bounds = array<i64: 1, 1, 1>}]} {
    %c0 = arith.constant 0 : index
    %c0_0 = arith.constant 0 : index
    %c0_1 = arith.constant 0 : index
    %0 = vector.load %arg1[%c0, %c0_0, %c0_1] : memref<1x64x1xf32, #tpu.memory_space<vmem>>, vector<1x64x1xf32>
    %cst = arith.constant 0.000000e+00 : f32
    %1 = vector.broadcast %cst : f32 to vector<1x2x1xf32>
    %2 = tpu.concatenate %1, %0, %1 in 1 : vector<1x2x1xf32>, vector<1x64x1xf32>, vector<1x2x1xf32> -> vector<1x68x1xf32>
    %3 = vector.extract_strided_slice %2 {offsets = [0, 0, 0], sizes = [1, 64, 1], strides = [1, 1, 1]} : vector<1x68x1xf32> to vector<1x64x1xf32>
    %4 = vector.extract_strided_slice %2 {offsets = [0, 1, 0], sizes = [1, 64, 1], strides = [1, 1, 1]} : vector<1x68x1xf32> to vector<1x64x1xf32>
    %5 = vector.extract_strided_slice %2 {offsets = [0, 2, 0], sizes = [1, 64, 1], strides = [1, 1, 1]} : vector<1x68x1xf32> to vector<1x64x1xf32>
    %6 = vector.extract_strided_slice %2 {offsets = [0, 3, 0], sizes = [1, 64, 1], strides = [1, 1, 1]} : vector<1x68x1xf32> to vector<1x64x1xf32>
    %7 = vector.extract_strided_slice %2 {offsets = [0, 4, 0], sizes = [1, 64, 1], strides = [1, 1, 1]} : vector<1x68x1xf32> to vector<1x64x1xf32>
    %8 = tpu.concatenate %3, %4, %5, %6, %7 in 2 : vector<1x64x1xf32>, vector<1x64x1xf32>, vector<1x64x1xf32>, vector<1x64x1xf32>, vector<1x64x1xf32> -> vector<1x64x5xf32>
    %9 = vector.shape_cast %8 : vector<1x64x5xf32> to vector<64x5xf32>
    %c0_2 = arith.constant 0 : index
    %c0_3 = arith.constant 0 : index
    %10 = vector.load %arg2[%c0_2, %c0_3] : memref<5x16xf32, #tpu.memory_space<vmem>>, vector<5x16xf32>
    %cst_4 = arith.constant dense<0.000000e+00> : vector<64x16xf32>
    %11 = tpu.matmul %9, %10, %cst_4 {dimension_numbers = #tpu.dot_dimension_numbers<[1], [0], [0], [1], [0, 0, 1, 1], [], []>} : vector<64x5xf32>, vector<5x16xf32>, vector<64x16xf32> -> vector<64x16xf32>
    %c0_5 = arith.constant 0 : index
    %c0_6 = arith.constant 0 : index
    %12 = vector.load %arg3[%c0_5, %c0_6] : memref<1x16xf32, #tpu.memory_space<vmem>>, vector<1x16xf32>
    %13 = vector.broadcast %12 : vector<1x16xf32> to vector<64x16xf32>
    %14 = arith.addf %11, %13 : vector<64x16xf32>
    %cst_7 = arith.constant 0.000000e+00 : f32
    %15 = vector.broadcast %cst_7 : f32 to vector<64x16xf32>
    %16 = arith.maximumf %14, %15 : vector<64x16xf32>
    %17 = vector.shape_cast %16 : vector<64x16xf32> to vector<16x4x16xf32>
    %cst_8 = arith.constant dense<0xFF800000> : vector<16x16xf32>
    %18 = vector.multi_reduction <maximumf>, %17, %cst_8 [1] : vector<16x4x16xf32> to vector<16x16xf32>
    %19 = vector.shape_cast %18 : vector<16x16xf32> to vector<1x16x16xf32>
    %cst_9 = arith.constant 0.000000e+00 : f32
    %20 = vector.broadcast %cst_9 : f32 to vector<1x2x16xf32>
    %21 = tpu.concatenate %20, %19, %20 in 1 : vector<1x2x16xf32>, vector<1x16x16xf32>, vector<1x2x16xf32> -> vector<1x20x16xf32>
    %22 = vector.extract_strided_slice %21 {offsets = [0, 0, 0], sizes = [1, 16, 16], strides = [1, 1, 1]} : vector<1x20x16xf32> to vector<1x16x16xf32>
    %23 = vector.extract_strided_slice %21 {offsets = [0, 1, 0], sizes = [1, 16, 16], strides = [1, 1, 1]} : vector<1x20x16xf32> to vector<1x16x16xf32>
    %24 = vector.extract_strided_slice %21 {offsets = [0, 2, 0], sizes = [1, 16, 16], strides = [1, 1, 1]} : vector<1x20x16xf32> to vector<1x16x16xf32>
    %25 = vector.extract_strided_slice %21 {offsets = [0, 3, 0], sizes = [1, 16, 16], strides = [1, 1, 1]} : vector<1x20x16xf32> to vector<1x16x16xf32>
    %26 = vector.extract_strided_slice %21 {offsets = [0, 4, 0], sizes = [1, 16, 16], strides = [1, 1, 1]} : vector<1x20x16xf32> to vector<1x16x16xf32>
    %27 = tpu.concatenate %22, %23, %24, %25, %26 in 2 : vector<1x16x16xf32>, vector<1x16x16xf32>, vector<1x16x16xf32>, vector<1x16x16xf32>, vector<1x16x16xf32> -> vector<1x16x80xf32>
    %28 = vector.shape_cast %27 : vector<1x16x80xf32> to vector<16x80xf32>
    %c0_10 = arith.constant 0 : index
    %c0_11 = arith.constant 0 : index
    %29 = vector.load %arg4[%c0_10, %c0_11] : memref<80x32xf32, #tpu.memory_space<vmem>>, vector<80x32xf32>
    %cst_12 = arith.constant dense<0.000000e+00> : vector<16x32xf32>
    %30 = tpu.matmul %28, %29, %cst_12 {dimension_numbers = #tpu.dot_dimension_numbers<[1], [0], [0], [1], [0, 0, 1, 1], [], []>} : vector<16x80xf32>, vector<80x32xf32>, vector<16x32xf32> -> vector<16x32xf32>
    %c0_13 = arith.constant 0 : index
    %c0_14 = arith.constant 0 : index
    %31 = vector.load %arg5[%c0_13, %c0_14] : memref<1x32xf32, #tpu.memory_space<vmem>>, vector<1x32xf32>
    %32 = vector.broadcast %31 : vector<1x32xf32> to vector<16x32xf32>
    %33 = arith.addf %30, %32 : vector<16x32xf32>
    %cst_15 = arith.constant 0.000000e+00 : f32
    %34 = vector.broadcast %cst_15 : f32 to vector<16x32xf32>
    %35 = arith.maximumf %33, %34 : vector<16x32xf32>
    %36 = vector.shape_cast %35 : vector<16x32xf32> to vector<8x2x32xf32>
    %cst_16 = arith.constant dense<0xFF800000> : vector<8x32xf32>
    %37 = vector.multi_reduction <maximumf>, %36, %cst_16 [1] : vector<8x2x32xf32> to vector<8x32xf32>
    %38 = vector.shape_cast %37 : vector<8x32xf32> to vector<1x8x32xf32>
    %cst_17 = arith.constant 0.000000e+00 : f32
    %39 = vector.broadcast %cst_17 : f32 to vector<1x1x32xf32>
    %40 = tpu.concatenate %39, %38, %39 in 1 : vector<1x1x32xf32>, vector<1x8x32xf32>, vector<1x1x32xf32> -> vector<1x10x32xf32>
    %41 = vector.extract_strided_slice %40 {offsets = [0, 0, 0], sizes = [1, 8, 32], strides = [1, 1, 1]} : vector<1x10x32xf32> to vector<1x8x32xf32>
    %42 = vector.extract_strided_slice %40 {offsets = [0, 1, 0], sizes = [1, 8, 32], strides = [1, 1, 1]} : vector<1x10x32xf32> to vector<1x8x32xf32>
    %43 = vector.extract_strided_slice %40 {offsets = [0, 2, 0], sizes = [1, 8, 32], strides = [1, 1, 1]} : vector<1x10x32xf32> to vector<1x8x32xf32>
    %44 = tpu.concatenate %41, %42, %43 in 2 : vector<1x8x32xf32>, vector<1x8x32xf32>, vector<1x8x32xf32> -> vector<1x8x96xf32>
    %45 = vector.shape_cast %44 : vector<1x8x96xf32> to vector<8x96xf32>
    %c0_18 = arith.constant 0 : index
    %c0_19 = arith.constant 0 : index
    %46 = vector.load %arg6[%c0_18, %c0_19] : memref<96x64xf32, #tpu.memory_space<vmem>>, vector<96x64xf32>
    %cst_20 = arith.constant dense<0.000000e+00> : vector<8x64xf32>
    %47 = tpu.matmul %45, %46, %cst_20 {dimension_numbers = #tpu.dot_dimension_numbers<[1], [0], [0], [1], [0, 0, 1, 1], [], []>} : vector<8x96xf32>, vector<96x64xf32>, vector<8x64xf32> -> vector<8x64xf32>
    %c0_21 = arith.constant 0 : index
    %c0_22 = arith.constant 0 : index
    %48 = vector.load %arg7[%c0_21, %c0_22] : memref<1x64xf32, #tpu.memory_space<vmem>>, vector<1x64xf32>
    %49 = vector.broadcast %48 : vector<1x64xf32> to vector<8x64xf32>
    %50 = arith.addf %47, %49 : vector<8x64xf32>
    %cst_23 = arith.constant 0.000000e+00 : f32
    %51 = vector.broadcast %cst_23 : f32 to vector<8x64xf32>
    %52 = arith.maximumf %50, %51 : vector<8x64xf32>
    %53 = vector.shape_cast %52 : vector<8x64xf32> to vector<4x2x64xf32>
    %cst_24 = arith.constant dense<0xFF800000> : vector<4x64xf32>
    %54 = vector.multi_reduction <maximumf>, %53, %cst_24 [1] : vector<4x2x64xf32> to vector<4x64xf32>
    %55 = vector.shape_cast %54 : vector<4x64xf32> to vector<1x4x64xf32>
    %cst_25 = arith.constant 0.000000e+00 : f32
    %56 = vector.broadcast %cst_25 : f32 to vector<1x1x64xf32>
    %57 = tpu.concatenate %56, %55, %56 in 1 : vector<1x1x64xf32>, vector<1x4x64xf32>, vector<1x1x64xf32> -> vector<1x6x64xf32>
    %58 = vector.extract_strided_slice %57 {offsets = [0, 0, 0], sizes = [1, 4, 64], strides = [1, 1, 1]} : vector<1x6x64xf32> to vector<1x4x64xf32>
    %59 = vector.extract_strided_slice %57 {offsets = [0, 1, 0], sizes = [1, 4, 64], strides = [1, 1, 1]} : vector<1x6x64xf32> to vector<1x4x64xf32>
    %60 = vector.extract_strided_slice %57 {offsets = [0, 2, 0], sizes = [1, 4, 64], strides = [1, 1, 1]} : vector<1x6x64xf32> to vector<1x4x64xf32>
    %61 = tpu.concatenate %58, %59, %60 in 2 : vector<1x4x64xf32>, vector<1x4x64xf32>, vector<1x4x64xf32> -> vector<1x4x192xf32>
    %62 = vector.shape_cast %61 : vector<1x4x192xf32> to vector<4x192xf32>
    %c0_26 = arith.constant 0 : index
    %c0_27 = arith.constant 0 : index
    %63 = vector.load %arg8[%c0_26, %c0_27] : memref<192x128xf32, #tpu.memory_space<vmem>>, vector<192x128xf32>
    %cst_28 = arith.constant dense<0.000000e+00> : vector<4x128xf32>
    %64 = tpu.matmul %62, %63, %cst_28 {dimension_numbers = #tpu.dot_dimension_numbers<[1], [0], [0], [1], [0, 0, 1, 1], [], []>} : vector<4x192xf32>, vector<192x128xf32>, vector<4x128xf32> -> vector<4x128xf32>
    %c0_29 = arith.constant 0 : index
    %c0_30 = arith.constant 0 : index
    %65 = vector.load %arg9[%c0_29, %c0_30] : memref<1x128xf32, #tpu.memory_space<vmem>>, vector<1x128xf32>
    %66 = vector.broadcast %65 : vector<1x128xf32> to vector<4x128xf32>
    %67 = arith.addf %64, %66 : vector<4x128xf32>
    %cst_31 = arith.constant 0.000000e+00 : f32
    %68 = vector.broadcast %cst_31 : f32 to vector<4x128xf32>
    %69 = arith.maximumf %67, %68 : vector<4x128xf32>
    %70 = vector.shape_cast %69 : vector<4x128xf32> to vector<2x2x128xf32>
    %cst_32 = arith.constant dense<0xFF800000> : vector<2x128xf32>
    %71 = vector.multi_reduction <maximumf>, %70, %cst_32 [1] : vector<2x2x128xf32> to vector<2x128xf32>
    %72 = vector.shape_cast %71 : vector<2x128xf32> to vector<1x2x128xf32>
    %cst_33 = arith.constant 0.000000e+00 : f32
    %73 = vector.broadcast %cst_33 : f32 to vector<1x256xf32>
    %74 = vector.extract_strided_slice %72 {offsets = [0, 0, 0], sizes = [1, 1, 128], strides = [1, 1, 1]} : vector<1x2x128xf32> to vector<1x1x128xf32>
    %cst_34 = arith.constant dense<0xFF800000> : vector<1x128xf32>
    %75 = vector.multi_reduction <maximumf>, %74, %cst_34 [1] : vector<1x1x128xf32> to vector<1x128xf32>
    %c0_35 = arith.constant 0 : index
    %c0_36 = arith.constant 0 : index
    %76 = vector.load %arg10[%c0_35, %c0_36] : memref<2048x256xf32, #tpu.memory_space<vmem>>, vector<128x256xf32>
    %cst_37 = arith.constant dense<0.000000e+00> : vector<1x256xf32>
    %77 = tpu.matmul %75, %76, %cst_37 {dimension_numbers = #tpu.dot_dimension_numbers<[1], [0], [0], [1], [0, 0, 1, 1], [], []>} : vector<1x128xf32>, vector<128x256xf32>, vector<1x256xf32> -> vector<1x256xf32>
    %78 = arith.addf %73, %77 : vector<1x256xf32>
    %79 = vector.extract_strided_slice %72 {offsets = [0, 0, 0], sizes = [1, 1, 128], strides = [1, 1, 1]} : vector<1x2x128xf32> to vector<1x1x128xf32>
    %cst_38 = arith.constant dense<0xFF800000> : vector<1x128xf32>
    %80 = vector.multi_reduction <maximumf>, %79, %cst_38 [1] : vector<1x1x128xf32> to vector<1x128xf32>
    %c128 = arith.constant 128 : index
    %c0_39 = arith.constant 0 : index
    %81 = vector.load %arg10[%c128, %c0_39] : memref<2048x256xf32, #tpu.memory_space<vmem>>, vector<128x256xf32>
    %cst_40 = arith.constant dense<0.000000e+00> : vector<1x256xf32>
    %82 = tpu.matmul %80, %81, %cst_40 {dimension_numbers = #tpu.dot_dimension_numbers<[1], [0], [0], [1], [0, 0, 1, 1], [], []>} : vector<1x128xf32>, vector<128x256xf32>, vector<1x256xf32> -> vector<1x256xf32>
    %83 = arith.addf %78, %82 : vector<1x256xf32>
    %84 = vector.extract_strided_slice %72 {offsets = [0, 0, 0], sizes = [1, 1, 128], strides = [1, 1, 1]} : vector<1x2x128xf32> to vector<1x1x128xf32>
    %cst_41 = arith.constant dense<0xFF800000> : vector<1x128xf32>
    %85 = vector.multi_reduction <maximumf>, %84, %cst_41 [1] : vector<1x1x128xf32> to vector<1x128xf32>
    %c256 = arith.constant 256 : index
    %c0_42 = arith.constant 0 : index
    %86 = vector.load %arg10[%c256, %c0_42] : memref<2048x256xf32, #tpu.memory_space<vmem>>, vector<128x256xf32>
    %cst_43 = arith.constant dense<0.000000e+00> : vector<1x256xf32>
    %87 = tpu.matmul %85, %86, %cst_43 {dimension_numbers = #tpu.dot_dimension_numbers<[1], [0], [0], [1], [0, 0, 1, 1], [], []>} : vector<1x128xf32>, vector<128x256xf32>, vector<1x256xf32> -> vector<1x256xf32>
    %88 = arith.addf %83, %87 : vector<1x256xf32>
    %89 = vector.extract_strided_slice %72 {offsets = [0, 0, 0], sizes = [1, 1, 128], strides = [1, 1, 1]} : vector<1x2x128xf32> to vector<1x1x128xf32>
    %cst_44 = arith.constant dense<0xFF800000> : vector<1x128xf32>
    %90 = vector.multi_reduction <maximumf>, %89, %cst_44 [1] : vector<1x1x128xf32> to vector<1x128xf32>
    %c384 = arith.constant 384 : index
    %c0_45 = arith.constant 0 : index
    %91 = vector.load %arg10[%c384, %c0_45] : memref<2048x256xf32, #tpu.memory_space<vmem>>, vector<128x256xf32>
    %cst_46 = arith.constant dense<0.000000e+00> : vector<1x256xf32>
    %92 = tpu.matmul %90, %91, %cst_46 {dimension_numbers = #tpu.dot_dimension_numbers<[1], [0], [0], [1], [0, 0, 1, 1], [], []>} : vector<1x128xf32>, vector<128x256xf32>, vector<1x256xf32> -> vector<1x256xf32>
    %93 = arith.addf %88, %92 : vector<1x256xf32>
    %94 = vector.extract_strided_slice %72 {offsets = [0, 0, 0], sizes = [1, 1, 128], strides = [1, 1, 1]} : vector<1x2x128xf32> to vector<1x1x128xf32>
    %cst_47 = arith.constant dense<0xFF800000> : vector<1x128xf32>
    %95 = vector.multi_reduction <maximumf>, %94, %cst_47 [1] : vector<1x1x128xf32> to vector<1x128xf32>
    %c512 = arith.constant 512 : index
    %c0_48 = arith.constant 0 : index
    %96 = vector.load %arg10[%c512, %c0_48] : memref<2048x256xf32, #tpu.memory_space<vmem>>, vector<128x256xf32>
    %cst_49 = arith.constant dense<0.000000e+00> : vector<1x256xf32>
    %97 = tpu.matmul %95, %96, %cst_49 {dimension_numbers = #tpu.dot_dimension_numbers<[1], [0], [0], [1], [0, 0, 1, 1], [], []>} : vector<1x128xf32>, vector<128x256xf32>, vector<1x256xf32> -> vector<1x256xf32>
    %98 = arith.addf %93, %97 : vector<1x256xf32>
    %99 = vector.extract_strided_slice %72 {offsets = [0, 0, 0], sizes = [1, 1, 128], strides = [1, 1, 1]} : vector<1x2x128xf32> to vector<1x1x128xf32>
    %cst_50 = arith.constant dense<0xFF800000> : vector<1x128xf32>
    %100 = vector.multi_reduction <maximumf>, %99, %cst_50 [1] : vector<1x1x128xf32> to vector<1x128xf32>
    %c640 = arith.constant 640 : index
    %c0_51 = arith.constant 0 : index
    %101 = vector.load %arg10[%c640, %c0_51] : memref<2048x256xf32, #tpu.memory_space<vmem>>, vector<128x256xf32>
    %cst_52 = arith.constant dense<0.000000e+00> : vector<1x256xf32>
    %102 = tpu.matmul %100, %101, %cst_52 {dimension_numbers = #tpu.dot_dimension_numbers<[1], [0], [0], [1], [0, 0, 1, 1], [], []>} : vector<1x128xf32>, vector<128x256xf32>, vector<1x256xf32> -> vector<1x256xf32>
    %103 = arith.addf %98, %102 : vector<1x256xf32>
    %104 = vector.extract_strided_slice %72 {offsets = [0, 0, 0], sizes = [1, 1, 128], strides = [1, 1, 1]} : vector<1x2x128xf32> to vector<1x1x128xf32>
    %cst_53 = arith.constant dense<0xFF800000> : vector<1x128xf32>
    %105 = vector.multi_reduction <maximumf>, %104, %cst_53 [1] : vector<1x1x128xf32> to vector<1x128xf32>
    %c768 = arith.constant 768 : index
    %c0_54 = arith.constant 0 : index
    %106 = vector.load %arg10[%c768, %c0_54] : memref<2048x256xf32, #tpu.memory_space<vmem>>, vector<128x256xf32>
    %cst_55 = arith.constant dense<0.000000e+00> : vector<1x256xf32>
    %107 = tpu.matmul %105, %106, %cst_55 {dimension_numbers = #tpu.dot_dimension_numbers<[1], [0], [0], [1], [0, 0, 1, 1], [], []>} : vector<1x128xf32>, vector<128x256xf32>, vector<1x256xf32> -> vector<1x256xf32>
    %108 = arith.addf %103, %107 : vector<1x256xf32>
    %109 = vector.extract_strided_slice %72 {offsets = [0, 0, 0], sizes = [1, 1, 128], strides = [1, 1, 1]} : vector<1x2x128xf32> to vector<1x1x128xf32>
    %cst_56 = arith.constant dense<0xFF800000> : vector<1x128xf32>
    %110 = vector.multi_reduction <maximumf>, %109, %cst_56 [1] : vector<1x1x128xf32> to vector<1x128xf32>
    %c896 = arith.constant 896 : index
    %c0_57 = arith.constant 0 : index
    %111 = vector.load %arg10[%c896, %c0_57] : memref<2048x256xf32, #tpu.memory_space<vmem>>, vector<128x256xf32>
    %cst_58 = arith.constant dense<0.000000e+00> : vector<1x256xf32>
    %112 = tpu.matmul %110, %111, %cst_58 {dimension_numbers = #tpu.dot_dimension_numbers<[1], [0], [0], [1], [0, 0, 1, 1], [], []>} : vector<1x128xf32>, vector<128x256xf32>, vector<1x256xf32> -> vector<1x256xf32>
    %113 = arith.addf %108, %112 : vector<1x256xf32>
    %114 = vector.extract_strided_slice %72 {offsets = [0, 1, 0], sizes = [1, 1, 128], strides = [1, 1, 1]} : vector<1x2x128xf32> to vector<1x1x128xf32>
    %cst_59 = arith.constant dense<0xFF800000> : vector<1x128xf32>
    %115 = vector.multi_reduction <maximumf>, %114, %cst_59 [1] : vector<1x1x128xf32> to vector<1x128xf32>
    %c1024 = arith.constant 1024 : index
    %c0_60 = arith.constant 0 : index
    %116 = vector.load %arg10[%c1024, %c0_60] : memref<2048x256xf32, #tpu.memory_space<vmem>>, vector<128x256xf32>
    %cst_61 = arith.constant dense<0.000000e+00> : vector<1x256xf32>
    %117 = tpu.matmul %115, %116, %cst_61 {dimension_numbers = #tpu.dot_dimension_numbers<[1], [0], [0], [1], [0, 0, 1, 1], [], []>} : vector<1x128xf32>, vector<128x256xf32>, vector<1x256xf32> -> vector<1x256xf32>
    %118 = arith.addf %113, %117 : vector<1x256xf32>
    %119 = vector.extract_strided_slice %72 {offsets = [0, 1, 0], sizes = [1, 1, 128], strides = [1, 1, 1]} : vector<1x2x128xf32> to vector<1x1x128xf32>
    %cst_62 = arith.constant dense<0xFF800000> : vector<1x128xf32>
    %120 = vector.multi_reduction <maximumf>, %119, %cst_62 [1] : vector<1x1x128xf32> to vector<1x128xf32>
    %c1152 = arith.constant 1152 : index
    %c0_63 = arith.constant 0 : index
    %121 = vector.load %arg10[%c1152, %c0_63] : memref<2048x256xf32, #tpu.memory_space<vmem>>, vector<128x256xf32>
    %cst_64 = arith.constant dense<0.000000e+00> : vector<1x256xf32>
    %122 = tpu.matmul %120, %121, %cst_64 {dimension_numbers = #tpu.dot_dimension_numbers<[1], [0], [0], [1], [0, 0, 1, 1], [], []>} : vector<1x128xf32>, vector<128x256xf32>, vector<1x256xf32> -> vector<1x256xf32>
    %123 = arith.addf %118, %122 : vector<1x256xf32>
    %124 = vector.extract_strided_slice %72 {offsets = [0, 1, 0], sizes = [1, 1, 128], strides = [1, 1, 1]} : vector<1x2x128xf32> to vector<1x1x128xf32>
    %cst_65 = arith.constant dense<0xFF800000> : vector<1x128xf32>
    %125 = vector.multi_reduction <maximumf>, %124, %cst_65 [1] : vector<1x1x128xf32> to vector<1x128xf32>
    %c1280 = arith.constant 1280 : index
    %c0_66 = arith.constant 0 : index
    %126 = vector.load %arg10[%c1280, %c0_66] : memref<2048x256xf32, #tpu.memory_space<vmem>>, vector<128x256xf32>
    %cst_67 = arith.constant dense<0.000000e+00> : vector<1x256xf32>
    %127 = tpu.matmul %125, %126, %cst_67 {dimension_numbers = #tpu.dot_dimension_numbers<[1], [0], [0], [1], [0, 0, 1, 1], [], []>} : vector<1x128xf32>, vector<128x256xf32>, vector<1x256xf32> -> vector<1x256xf32>
    %128 = arith.addf %123, %127 : vector<1x256xf32>
    %129 = vector.extract_strided_slice %72 {offsets = [0, 1, 0], sizes = [1, 1, 128], strides = [1, 1, 1]} : vector<1x2x128xf32> to vector<1x1x128xf32>
    %cst_68 = arith.constant dense<0xFF800000> : vector<1x128xf32>
    %130 = vector.multi_reduction <maximumf>, %129, %cst_68 [1] : vector<1x1x128xf32> to vector<1x128xf32>
    %c1408 = arith.constant 1408 : index
    %c0_69 = arith.constant 0 : index
    %131 = vector.load %arg10[%c1408, %c0_69] : memref<2048x256xf32, #tpu.memory_space<vmem>>, vector<128x256xf32>
    %cst_70 = arith.constant dense<0.000000e+00> : vector<1x256xf32>
    %132 = tpu.matmul %130, %131, %cst_70 {dimension_numbers = #tpu.dot_dimension_numbers<[1], [0], [0], [1], [0, 0, 1, 1], [], []>} : vector<1x128xf32>, vector<128x256xf32>, vector<1x256xf32> -> vector<1x256xf32>
    %133 = arith.addf %128, %132 : vector<1x256xf32>
    %134 = vector.extract_strided_slice %72 {offsets = [0, 1, 0], sizes = [1, 1, 128], strides = [1, 1, 1]} : vector<1x2x128xf32> to vector<1x1x128xf32>
    %cst_71 = arith.constant dense<0xFF800000> : vector<1x128xf32>
    %135 = vector.multi_reduction <maximumf>, %134, %cst_71 [1] : vector<1x1x128xf32> to vector<1x128xf32>
    %c1536 = arith.constant 1536 : index
    %c0_72 = arith.constant 0 : index
    %136 = vector.load %arg10[%c1536, %c0_72] : memref<2048x256xf32, #tpu.memory_space<vmem>>, vector<128x256xf32>
    %cst_73 = arith.constant dense<0.000000e+00> : vector<1x256xf32>
    %137 = tpu.matmul %135, %136, %cst_73 {dimension_numbers = #tpu.dot_dimension_numbers<[1], [0], [0], [1], [0, 0, 1, 1], [], []>} : vector<1x128xf32>, vector<128x256xf32>, vector<1x256xf32> -> vector<1x256xf32>
    %138 = arith.addf %133, %137 : vector<1x256xf32>
    %139 = vector.extract_strided_slice %72 {offsets = [0, 1, 0], sizes = [1, 1, 128], strides = [1, 1, 1]} : vector<1x2x128xf32> to vector<1x1x128xf32>
    %cst_74 = arith.constant dense<0xFF800000> : vector<1x128xf32>
    %140 = vector.multi_reduction <maximumf>, %139, %cst_74 [1] : vector<1x1x128xf32> to vector<1x128xf32>
    %c1664 = arith.constant 1664 : index
    %c0_75 = arith.constant 0 : index
    %141 = vector.load %arg10[%c1664, %c0_75] : memref<2048x256xf32, #tpu.memory_space<vmem>>, vector<128x256xf32>
    %cst_76 = arith.constant dense<0.000000e+00> : vector<1x256xf32>
    %142 = tpu.matmul %140, %141, %cst_76 {dimension_numbers = #tpu.dot_dimension_numbers<[1], [0], [0], [1], [0, 0, 1, 1], [], []>} : vector<1x128xf32>, vector<128x256xf32>, vector<1x256xf32> -> vector<1x256xf32>
    %143 = arith.addf %138, %142 : vector<1x256xf32>
    %144 = vector.extract_strided_slice %72 {offsets = [0, 1, 0], sizes = [1, 1, 128], strides = [1, 1, 1]} : vector<1x2x128xf32> to vector<1x1x128xf32>
    %cst_77 = arith.constant dense<0xFF800000> : vector<1x128xf32>
    %145 = vector.multi_reduction <maximumf>, %144, %cst_77 [1] : vector<1x1x128xf32> to vector<1x128xf32>
    %c1792 = arith.constant 1792 : index
    %c0_78 = arith.constant 0 : index
    %146 = vector.load %arg10[%c1792, %c0_78] : memref<2048x256xf32, #tpu.memory_space<vmem>>, vector<128x256xf32>
    %cst_79 = arith.constant dense<0.000000e+00> : vector<1x256xf32>
    %147 = tpu.matmul %145, %146, %cst_79 {dimension_numbers = #tpu.dot_dimension_numbers<[1], [0], [0], [1], [0, 0, 1, 1], [], []>} : vector<1x128xf32>, vector<128x256xf32>, vector<1x256xf32> -> vector<1x256xf32>
    %148 = arith.addf %143, %147 : vector<1x256xf32>
    %149 = vector.extract_strided_slice %72 {offsets = [0, 1, 0], sizes = [1, 1, 128], strides = [1, 1, 1]} : vector<1x2x128xf32> to vector<1x1x128xf32>
    %cst_80 = arith.constant dense<0xFF800000> : vector<1x128xf32>
    %150 = vector.multi_reduction <maximumf>, %149, %cst_80 [1] : vector<1x1x128xf32> to vector<1x128xf32>
    %c1920 = arith.constant 1920 : index
    %c0_81 = arith.constant 0 : index
    %151 = vector.load %arg10[%c1920, %c0_81] : memref<2048x256xf32, #tpu.memory_space<vmem>>, vector<128x256xf32>
    %cst_82 = arith.constant dense<0.000000e+00> : vector<1x256xf32>
    %152 = tpu.matmul %150, %151, %cst_82 {dimension_numbers = #tpu.dot_dimension_numbers<[1], [0], [0], [1], [0, 0, 1, 1], [], []>} : vector<1x128xf32>, vector<128x256xf32>, vector<1x256xf32> -> vector<1x256xf32>
    %153 = arith.addf %148, %152 : vector<1x256xf32>
    %c0_83 = arith.constant 0 : index
    %c0_84 = arith.constant 0 : index
    %154 = vector.load %arg11[%c0_83, %c0_84] : memref<1x256xf32, #tpu.memory_space<vmem>>, vector<1x256xf32>
    %155 = arith.addf %153, %154 : vector<1x256xf32>
    %cst_85 = arith.constant 0.000000e+00 : f32
    %156 = vector.broadcast %cst_85 : f32 to vector<1x256xf32>
    %157 = arith.maximumf %155, %156 : vector<1x256xf32>
    %c0_86 = arith.constant 0 : index
    %c0_87 = arith.constant 0 : index
    %158 = vector.load %arg12[%c0_86, %c0_87] : memref<256x128xf32, #tpu.memory_space<vmem>>, vector<256x128xf32>
    %cst_88 = arith.constant dense<0.000000e+00> : vector<1x128xf32>
    %159 = tpu.matmul %157, %158, %cst_88 {dimension_numbers = #tpu.dot_dimension_numbers<[1], [0], [0], [1], [0, 0, 1, 1], [], []>} : vector<1x256xf32>, vector<256x128xf32>, vector<1x128xf32> -> vector<1x128xf32>
    %c0_89 = arith.constant 0 : index
    %c0_90 = arith.constant 0 : index
    %160 = vector.load %arg13[%c0_89, %c0_90] : memref<1x128xf32, #tpu.memory_space<vmem>>, vector<1x128xf32>
    %161 = arith.addf %159, %160 : vector<1x128xf32>
    %cst_91 = arith.constant 0.000000e+00 : f32
    %162 = vector.broadcast %cst_91 : f32 to vector<1x128xf32>
    %163 = arith.maximumf %161, %162 : vector<1x128xf32>
    %c0_92 = arith.constant 0 : index
    %c0_93 = arith.constant 0 : index
    %164 = vector.load %arg14[%c0_92, %c0_93] : memref<128x1xf32, #tpu.memory_space<vmem>>, vector<128x1xf32>
    %cst_94 = arith.constant dense<0.000000e+00> : vector<1x1xf32>
    %165 = tpu.matmul %163, %164, %cst_94 {dimension_numbers = #tpu.dot_dimension_numbers<[1], [0], [0], [1], [0, 0, 1, 1], [], []>} : vector<1x128xf32>, vector<128x1xf32>, vector<1x1xf32> -> vector<1x1xf32>
    %c0_95 = arith.constant 0 : index
    %c0_96 = arith.constant 0 : index
    %166 = vector.load %arg15[%c0_95, %c0_96] : memref<1x1xf32, #tpu.memory_space<vmem>>, vector<1x1xf32>
    %167 = arith.addf %165, %166 : vector<1x1xf32>
    %168 = vector.shape_cast %167 : vector<1x1xf32> to vector<1x1x1xf32>
    %c0_97 = arith.constant 0 : index
    %c0_98 = arith.constant 0 : index
    %c0_99 = arith.constant 0 : index
    %169 = vector.load %arg16[%c0_97, %c0_98, %c0_99] : memref<1x1x1xf32, #tpu.memory_space<vmem>>, vector<1x1x1xf32>
    tpu.vector_store %arg16[%c0_97, %c0_98, %c0_99], %168 {strides = array<i32>} : memref<1x1x1xf32, #tpu.memory_space<vmem>>, vector<1x1x1xf32>,
    return
  }
  func.func @transform_0(%arg0: i32) -> (i32, i32, i32) {
    %c0_i32 = arith.constant 0 : i32
    %c0_i32_0 = arith.constant 0 : i32
    %c0_i32_1 = arith.constant 0 : i32
    return %arg0, %c0_i32, %c0_i32_0 : i32, i32, i32
  }
  func.func @transform_1(%arg0: i32) -> (i32, i32) {
    %c0_i32 = arith.constant 0 : i32
    %c0_i32_0 = arith.constant 0 : i32
    %c0_i32_1 = arith.constant 0 : i32
    return %c0_i32, %c0_i32_0 : i32, i32
  }
  func.func @transform_2(%arg0: i32) -> (i32, i32) {
    %c0_i32 = arith.constant 0 : i32
    %c0_i32_0 = arith.constant 0 : i32
    %c0_i32_1 = arith.constant 0 : i32
    return %c0_i32, %c0_i32_0 : i32, i32
  }
  func.func @transform_3(%arg0: i32) -> (i32, i32) {
    %c0_i32 = arith.constant 0 : i32
    %c0_i32_0 = arith.constant 0 : i32
    %c0_i32_1 = arith.constant 0 : i32
    return %c0_i32, %c0_i32_0 : i32, i32
  }
  func.func @transform_4(%arg0: i32) -> (i32, i32) {
    %c0_i32 = arith.constant 0 : i32
    %c0_i32_0 = arith.constant 0 : i32
    %c0_i32_1 = arith.constant 0 : i32
    return %c0_i32, %c0_i32_0 : i32, i32
  }
  func.func @transform_5(%arg0: i32) -> (i32, i32) {
    %c0_i32 = arith.constant 0 : i32
    %c0_i32_0 = arith.constant 0 : i32
    %c0_i32_1 = arith.constant 0 : i32
    return %c0_i32, %c0_i32_0 : i32, i32
  }
  func.func @transform_6(%arg0: i32) -> (i32, i32) {
    %c0_i32 = arith.constant 0 : i32
    %c0_i32_0 = arith.constant 0 : i32
    %c0_i32_1 = arith.constant 0 : i32
    return %c0_i32, %c0_i32_0 : i32, i32
  }
  func.func @transform_7(%arg0: i32) -> (i32, i32) {
    %c0_i32 = arith.constant 0 : i32
    %c0_i32_0 = arith.constant 0 : i32
    %c0_i32_1 = arith.constant 0 : i32
    return %c0_i32, %c0_i32_0 : i32, i32
  }
  func.func @transform_8(%arg0: i32) -> (i32, i32) {
    %c0_i32 = arith.constant 0 : i32
    %c0_i32_0 = arith.constant 0 : i32
    %c0_i32_1 = arith.constant 0 : i32
    return %c0_i32, %c0_i32_0 : i32, i32
  }
  func.func @transform_9(%arg0: i32) -> (i32, i32) {
    %c0_i32 = arith.constant 0 : i32
    %c0_i32_0 = arith.constant 0 : i32
    %c0_i32_1 = arith.constant 0 : i32
    return %c0_i32, %c0_i32_0 : i32, i32
  }
  func.func @transform_10(%arg0: i32) -> (i32, i32) {
    %c0_i32 = arith.constant 0 : i32
    %c0_i32_0 = arith.constant 0 : i32
    %c0_i32_1 = arith.constant 0 : i32
    return %c0_i32, %c0_i32_0 : i32, i32
  }
  func.func @transform_11(%arg0: i32) -> (i32, i32) {
    %c0_i32 = arith.constant 0 : i32
    %c0_i32_0 = arith.constant 0 : i32
    %c0_i32_1 = arith.constant 0 : i32
    return %c0_i32, %c0_i32_0 : i32, i32
  }
  func.func @transform_12(%arg0: i32) -> (i32, i32) {
    %c0_i32 = arith.constant 0 : i32
    %c0_i32_0 = arith.constant 0 : i32
    %c0_i32_1 = arith.constant 0 : i32
    return %c0_i32, %c0_i32_0 : i32, i32
  }
  func.func @transform_13(%arg0: i32) -> (i32, i32) {
    %c0_i32 = arith.constant 0 : i32
    %c0_i32_0 = arith.constant 0 : i32
    %c0_i32_1 = arith.constant 0 : i32
    return %c0_i32, %c0_i32_0 : i32, i32
  }
  func.func @transform_14(%arg0: i32) -> (i32, i32) {
    %c0_i32 = arith.constant 0 : i32
    %c0_i32_0 = arith.constant 0 : i32
    %c0_i32_1 = arith.constant 0 : i32
    return %c0_i32, %c0_i32_0 : i32, i32
  }
  func.func @transform_15(%arg0: i32) -> (i32, i32, i32) {
    %c0_i32 = arith.constant 0 : i32
    %c0_i32_0 = arith.constant 0 : i32
    %c0_i32_1 = arith.constant 0 : i32
    return %arg0, %c0_i32, %c0_i32_0 : i32, i32, i32
  }
}

</mosaic_0001>

<bundles_post_ra>
// kernel: conv1d_forward.1
= control target key start
LH: loop header
LB: loop body
LE: loop exit
PB: predicated region body
PF: predicated region fallthrough
CT: control target
= control target key end

     0   :  { %s4594_s20 = smov 0   ;;  %s6812_s0 = inlined_call_operand.vmem [shape: f32[2,64,1], index: 0, kind: input, shape index: {}]   ;;  %s6813_s1 = inlined_call_operand.vmem [shape: f32[5,16], index: 1, kind: input, shape index: {}]   ;;  %s6814_s2 = inlined_call_operand.vmem [shape: f32[1,16], index: 2, kind: input, shape index: {}]   ;;  %s6815_s3 = inlined_call_operand.vmem [shape: f32[80,32], index: 3, kind: input, shape index: {}]   ;;  %s6816_s4 = inlined_call_operand.vmem [shape: f32[1,32], index: 4, kind: input, shape index: {}]   ;;  %s6817_s5 = inlined_call_operand.vmem [shape: f32[96,64], index: 5, kind: input, shape index: {}]   ;;  %s6818_s6 = inlined_call_operand.vmem [shape: f32[1,64], index: 6, kind: input, shape index: {}]   ;;  %s6819_s7 = inlined_call_operand.vmem [shape: f32[192,128], index: 7, kind: input, shape index: {}]   ;;  %s6820_s8 = inlined_call_operand.vmem [shape: f32[1,128], index: 8, kind: input, shape index: {}]   ;;  %s6821_s9 = inlined_call_operand.vmem [shape: f32[2048,256], index: 9, kind: input, shape index: {}]   ;;  %s6822_s10 = inlined_call_operand.vmem [shape: f32[1,256], index: 10, kind: input, shape index: {}]   ;;  %s6823_s11 = inlined_call_operand.vmem [shape: f32[256,128], index: 11, kind: input, shape index: {}]   ;;  %s6824_s12 = inlined_call_operand.vmem [shape: f32[1,128], index: 12, kind: input, shape index: {}]   ;;  %s6825_s13 = inlined_call_operand.vmem [shape: f32[128,1], index: 13, kind: input, shape index: {}]   ;;  %s6826_s14 = inlined_call_operand.<no memory space> [shape: f32[1,1], index: 14, kind: input, shape index: {}]   ;;  %s6827_s15 = inlined_call_operand.vmem [shape: f32[2,1,1], index: 15, kind: output, shape index: {}]  }
   0x1   :  { %v20_v0 = vstv %s6826_s14 }
   0x2   :  { %21 = vst [vmem:[#allocation2] sm:$0x1] %v20_v0 }
   0x3 LB: > { %s3587_s21 = sadd.s32 4294967295, %s4497_s20   ;;  %p3591_p0 = scmp.ge.s32.totalorder %s4497_s20, 1  ;;  %s4497_s20 = sphi %s4594_s20, %s27_s20  }
   0x4   : > { %p439_p1 = scmp.lt.s32.totalorder %s4497_s20, 3 }
   0x6   : > { %p440_p2 = pnand %p3591_p0, %p439_p1 }
   0x7   : > { %p485_p3 = scmp.lt.s32.totalorder (!%p440_p2), %s3587_s21, 1  ;;  %vm509_vm0 = vcmask (!%p440_p2), 1041408   ;;  %vm580_vm1 = vcmask (!%p440_p2), 1045504   ;;  %vm538_vm2 = vcmask (!%p440_p2), 1046528   ;;  %s4499_s25 = smov (!%p440_p2), 2   ;;  %vm622_vm3 = vcmask (!%p440_p2), 1044480  }
   0x8   : > { %443 = sbr.rel (%p440_p2) target bundleno = 2459 (0x99b), region = 80  ;;  %s4500_s26 = smov (!%p440_p2), 1   ;;  %v742_v23 = vld [vmem:[%s6813_s1] sm:$0x1f] (!%p440_p2)  ;;  %vm664_vm4 = vcmask (!%p440_p2), 1043456   ;;  %vm706_vm5 = vcmask (!%p440_p2), 7168  }
   0x9   : > { %3700 = vmatprep.subr.msk.mxu1 (!%p440_p2), %vm622_vm3, %v742_v23  ;;  %s4501_s29 = smov (!%p440_p2), 3   ;;  %s4502_s30 = smov (!%p440_p2), 4   ;;  %vm715_vm6 = vcmask (!%p440_p2), 15360   ;;  %vm724_vm7 = vcmask (!%p440_p2), 23552   ;;  %vm733_vm8 = vcmask (!%p440_p2), 31744   ;;  %vm750_vm9 = vcmask (!%p440_p2), 39936  }
   0xa   : > { %3701 = vmatpush3.msk.msra.mxu1 (!%p440_p2), %vm622_vm3, %v742_v23  ;;  %vm915_vm10 = vcmask (!%p440_p2), 125952   ;;  %vm1044_vm11 = vcmask (!%p440_p2), 1043459   ;;  %vm1046_vm12 = vcmask (!%p440_p2), 1044484   ;;  %vm1048_vm13 = vcmask (!%p440_p2), 1045509   ;;  %s4505_s27 = smov (!%p440_p2), 48   ;;  %s4506_s28 = smov (!%p440_p2), 64  }
   0xb   : > { %vm1050_vm14 = vcmask (!%p440_p2), 1046534   ;;  %vm1052_vm15 = vcmask (!%p440_p2), 1047559  }
   0xf   : > { %s6829_s21 = smov (!%p485_p3, %s3587_s21), 1 }
  0x10   : > { %s3613_s14 = sshll.u32 %s6829_s21, 6 }
  0x11   : > { %s4608_s24 = scalar_lea.vmem %s6812_s0, %s3613_s14 }
  0x12   : > { %v493_v1 = vld [vmem:[%s4608_s24] sm:$0xff]  ;;  %v494_v2 = vld [vmem:[%s4608_s24 + $0x8] sm:$0xff]  ;;  %v495_v3 = vld [vmem:[%s4608_s24 + $0x10] sm:$0xff] }
  0x13   : > { %v510_v4 = vrot.slane %v493_v1, 6  ;;  %v511_v5 = vrot.slane %v494_v2, 6  ;;  %v513_v6 = vrot.slane %v495_v3, 6  ;;  %v496_v7 = vld [vmem:[%s4608_s24 + $0x18] sm:$0xff]  ;;  %v497_v20 = vld [vmem:[%s4608_s24 + $0x20] sm:$0xff]  ;;  %v498_v39 = vld [vmem:[%s4608_s24 + $0x28] sm:$0xff] }
  0x14   : > { %v515_v17 = vrot.slane %v496_v7, 6  ;;  %v517_v28 = vrot.slane %v497_v20, 6  ;;  %v519_v44 = vrot.slane %v498_v39, 6  ;;  %v499_v45 = vld [vmem:[%s4608_s24 + $0x30] sm:$0xff]  ;;  %v500_v61 = vld [vmem:[%s4608_s24 + $0x38] sm:$0xff]  ;;  %s492_s24 = scalar_lea.vmem %s6827_s15, %s6829_s21 }
  0x15   : > { %v4615_v8 = vsel %vm509_vm0, %v510_v4, %v511_v5  ;;  %v4618_v9 = vsel %vm509_vm0, 0.0, %v510_v4  ;;  %v4621_v10 = vsel %vm509_vm0, %v511_v5, %v513_v6  ;;  %v521_v51 = vrot.slane %v499_v45, 6 }
  0x16   : > { %v581_v11 = vrot.slane %v4618_v9, 2  ;;  %v582_v12 = vrot.slane %v4615_v8, 2  ;;  %v539_v13 = vrot.slane %v4618_v9, 1  ;;  %v540_v14 = vrot.slane %v4615_v8, 1 }
  0x17   : > { %v584_v15 = vrot.slane %v4621_v10, 2  ;;  %v542_v16 = vrot.slane %v4621_v10, 1  ;;  %v624_v21 = vrot.slane %v4615_v8, 3  ;;  %v626_v22 = vrot.slane %v4621_v10, 3 }
  0x18   : > { %v583_v18 = vsel %vm580_vm1, %v581_v11, %v582_v12  ;;  %v541_v19 = vsel %vm538_vm2, %v539_v13, %v540_v14  ;;  %v623_v26 = vrot.slane %v4618_v9, 3  ;;  %v4644_v27 = vsel %vm509_vm0, %v513_v6, %v515_v17 }
  0x19   : > { %598 = vrot.lane.b32.xlu1 %v583_v18, %s4499_s25  ;;  %556 = vrot.lane.b32.xlu0 %v541_v19, %s4500_s26  ;;  %v585_v24 = vsel %vm580_vm1, %v582_v12, %v584_v15  ;;  %v543_v25 = vsel %vm538_vm2, %v540_v14, %v542_v16  ;;  %v627_v29 = vsel %vm622_vm3, %v624_v21, %v626_v22  ;;  %v544_v31 = vrot.slane %v4644_v27, 1 }
  0x1a   : > { %v625_v30 = vsel %vm622_vm3, %v623_v26, %v624_v21  ;;  %v665_v32 = vrot.slane %v4618_v9, 4  ;;  %v666_v33 = vrot.slane %v4615_v8, 4  ;;  %v4655_v34 = vsel %vm509_vm0, %v515_v17, %v517_v28 }
  0x1b   : > { %v545_v35 = vsel %vm538_vm2, %v542_v16, %v544_v31  ;;  %v546_v37 = vrot.slane %v4655_v34, 1  ;;  %v668_v38 = vrot.slane %v4621_v10, 4  ;;  %v586_v42 = vrot.slane %v4644_v27, 2 }
  0x1c   : > { %v667_v36 = vsel %vm664_vm4, %v665_v32, %v666_v33  ;;  %v588_v43 = vrot.slane %v4655_v34, 2  ;;  %v628_v48 = vrot.slane %v4644_v27, 3  ;;  %v630_v49 = vrot.slane %v4655_v34, 3 }
  0x1d   : > { %600 = vrot.lane.b32.xlu1 %v585_v24, %s4499_s25  ;;  %558 = vrot.lane.b32.xlu0 %v543_v25, %s4500_s26  ;;  %v547_v40 = vsel %vm538_vm2, %v544_v31, %v546_v37  ;;  %v669_v41 = vsel %vm664_vm4, %v666_v33, %v668_v38  ;;  %v587_v47 = vsel %vm580_vm1, %v584_v15, %v586_v42  ;;  %v670_v55 = vrot.slane %v4644_v27, 4 }
  0x1e   : > { %v589_v46 = vsel %vm580_vm1, %v586_v42, %v588_v43  ;;  %v4678_v50 = vsel %vm509_vm0, %v517_v28, %v519_v44  ;;  %v631_v52 = vsel %vm622_vm3, %v628_v48, %v630_v49  ;;  %v629_v53 = vsel %vm622_vm3, %v626_v22, %v628_v48 }
  0x1f   : > { %v548_v54 = vrot.slane %v4678_v50, 1  ;;  %v4687_v56 = vsel %vm509_vm0, %v519_v44, %v521_v51  ;;  %v671_v58 = vsel %vm664_vm4, %v668_v38, %v670_v55  ;;  %v672_v60 = vrot.slane %v4655_v34, 4 }
  0x20   : > { %v550_v59 = vrot.slane %v4687_v56, 1  ;;  %v590_v0 = vrot.slane %v4678_v50, 2  ;;  %v592_v1 = vrot.slane %v4687_v56, 2  ;;  %v523_v2 = vrot.slane %v500_v61, 6 }
  0x21   : > { %642 = vrot.lane.b32.xlu1 %v627_v29, %s4501_s29  ;;  %640 = vrot.lane.b32.xlu0 %v625_v30, %s4501_s29  ;;  %v549_v57 = vsel %vm538_vm2, %v546_v37, %v548_v54  ;;  %v673_v63 = vsel %vm664_vm4, %v670_v55, %v672_v60  ;;  %v632_v5 = vrot.slane %v4678_v50, 3  ;;  %v634_v6 = vrot.slane %v4687_v56, 3 }
  0x22   : > { %v551_v62 = vsel %vm538_vm2, %v548_v54, %v550_v59  ;;  %v593_v3 = vsel %vm580_vm1, %v590_v0, %v592_v1  ;;  %v591_v4 = vsel %vm580_vm1, %v588_v43, %v590_v0  ;;  %v4709_v7 = vsel %vm509_vm0, %v521_v51, %v523_v2 }
  0x23   : > { %v635_v11 = vsel %vm622_vm3, %v632_v5, %v634_v6  ;;  %v633_v12 = vsel %vm622_vm3, %v630_v49, %v632_v5  ;;  %v552_v13 = vrot.slane %v4709_v7, 1  ;;  %v674_v14 = vrot.slane %v4678_v50, 4 }
  0x24   : > { %v535_v15 = vsel %vm509_vm0, %v523_v2, 0.0  ;;  %v676_v19 = vrot.slane %v4687_v56, 4  ;;  %v594_v22 = vrot.slane %v4709_v7, 2  ;;  %v636_v26 = vrot.slane %v4709_v7, 3 }
  0x25   : > { %560 = vrot.lane.b32.xlu1 %v545_v35, %s4500_s26  ;;  %682 = vrot.lane.b32.xlu0 %v667_v36, %s4502_s30  ;;  %v553_v16 = vsel %vm538_vm2, %v550_v59, %v552_v13  ;;  %v675_v17 = vsel %vm664_vm4, %v672_v60, %v674_v14  ;;  %v554_v18 = vrot.slane %v535_v15, 1  ;;  %v596_v23 = vrot.slane %v535_v15, 2 }
  0x26   : > { %v677_v21 = vsel %vm664_vm4, %v674_v14, %v676_v19  ;;  %v595_v25 = vsel %vm580_vm1, %v592_v1, %v594_v22  ;;  %v638_v28 = vrot.slane %v535_v15, 3  ;;  %v637_v30 = vsel %vm622_vm3, %v634_v6, %v636_v26 }
  0x27   : > { %v555_v20 = vsel %vm538_vm2, %v552_v13, %v554_v18  ;;  %v597_v24 = vsel %vm580_vm1, %v594_v22, %v596_v23  ;;  %v678_v31 = vrot.slane %v4709_v7, 4  ;;  %v680_v32 = vrot.slane %v535_v15, 4 }
  0x28   : > { %v639_v29 = vsel %vm622_vm3, %v636_v26, %v638_v28 }
  0x29   : > { %562 = vrot.lane.b32.xlu1 %v547_v40, %s4500_s26  ;;  %684 = vrot.lane.b32.xlu0 %v669_v41, %s4502_s30  ;;  %v681_v33 = vsel %vm664_vm4, %v678_v31, %v680_v32  ;;  %v679_v35 = vsel %vm664_vm4, %v676_v19, %v678_v31 }
  0x2d   : > { %604 = vrot.lane.b32.xlu1 %v589_v46, %s4499_s25  ;;  %602 = vrot.lane.b32.xlu0 %v587_v47, %s4499_s25 }
  0x31   : > { %646 = vrot.lane.b32.xlu1 %v631_v52, %s4501_s29  ;;  %644 = vrot.lane.b32.xlu0 %v629_v53, %s4501_s29 }
  0x35   : > { %564 = vrot.lane.b32.xlu1 %v549_v57, %s4500_s26  ;;  %686 = vrot.lane.b32.xlu0 %v671_v58, %s4502_s30 }
  0x39   : > { %566 = vrot.lane.b32.xlu1 %v551_v62, %s4500_s26  ;;  %688 = vrot.lane.b32.xlu0 %v673_v63, %s4502_s30 }
  0x3d   : > { %608 = vrot.lane.b32.xlu1 %v593_v3, %s4499_s25  ;;  %606 = vrot.lane.b32.xlu0 %v591_v4, %s4499_s25 }
  0x41   : > { %650 = vrot.lane.b32.xlu1 %v635_v11, %s4501_s29  ;;  %648 = vrot.lane.b32.xlu0 %v633_v12, %s4501_s29 }
  0x45   : > { %568 = vrot.lane.b32.xlu1 %v553_v16, %s4500_s26  ;;  %690 = vrot.lane.b32.xlu0 %v675_v17, %s4502_s30 }
  0x49   : > { %570 = vrot.lane.b32.xlu1 %v555_v20, %s4500_s26  ;;  %692 = vrot.lane.b32.xlu0 %v677_v21, %s4502_s30  ;;  %s4504_s26 = smov 32  }
  0x4d   : > { %612 = vrot.lane.b32.xlu1 %v597_v24, %s4499_s25  ;;  %610 = vrot.lane.b32.xlu0 %v595_v25, %s4499_s25  ;;  %s4503_s25 = smov 16  }
  0x51   : > { %654 = vrot.lane.b32.xlu1 %v639_v29, %s4501_s29  ;;  %652 = vrot.lane.b32.xlu0 %v637_v30, %s4501_s29 }
  0x55   : > { %696 = vrot.lane.b32.xlu1 %v681_v33, %s4502_s30  ;;  %694 = vrot.lane.b32.xlu0 %v679_v35, %s4502_s30 }
  0x8b   : > { %v599_v36 = vpop.permute.xlu1 %598  ;;  %v557_v37 = vpop.permute.xlu0 %556 }
  0x8c   : > { %v707_v40 = vsel %vm706_vm5, %v4618_v9, %v557_v37 }
  0x8d   : > { %v716_v43 = vsel %vm715_vm6, %v707_v40, %v599_v36  ;;  %v1130_v40 = vld [vmem:[%s6815_s3 + $0x18] sm:$0xff] }
  0x8f   : > { %v601_v38 = vpop.permute.xlu1 %600  ;;  %v559_v39 = vpop.permute.xlu0 %558 }
  0x90   : > { %v708_v44 = vsel %vm706_vm5, %v4615_v8, %v559_v39 }
  0x91   : > { %v717_v9 = vsel %vm715_vm6, %v708_v44, %v601_v38  ;;  %v1129_v38 = vld [vmem:[%s6815_s3 + $0x10] sm:$0xff] }
  0x93   : > { %v643_v41 = vpop.permute.xlu1 %642  ;;  %v641_v42 = vpop.permute.xlu0 %640 }
  0x94   : > { %v725_v45 = vsel %vm724_vm7, %v716_v43, %v641_v42  ;;  %v726_v49 = vsel %vm724_vm7, %v717_v9, %v643_v41  ;;  %v3803_v41 = vpack.c.bf16 %v1130_v40, %v1129_v38  ;;  %v4807_v42 = vld [vmem:[%s6814_s2] ss:$0 sm:$0xff] }
  0x97   : > { %v561_v46 = vpop.permute.xlu1 %560  ;;  %v683_v47 = vpop.permute.xlu0 %682 }
  0x98   : > { %v734_v48 = vsel %vm733_vm8, %v725_v45, %v683_v47  ;;  %v709_v58 = vsel %vm706_vm5, %v4621_v10, %v561_v46 }
  0x99   : > { %3702 = vmatprep.mubr.msk.f32.mxu1 %vm750_vm9, %v734_v48 }
  0x9b   : > { %v563_v51 = vpop.permute.xlu1 %562  ;;  %v685_v52 = vpop.permute.xlu0 %684 }
  0x9c   : > { %v735_v53 = vsel %vm733_vm8, %v726_v49, %v685_v52  ;;  %v710_v0 = vsel %vm706_vm5, %v4644_v27, %v563_v51 }
  0x9d   : > { %3703 = vmatmul.mubr.msk.f32.vlgmr.msra.gmra.mrb[0].mxu1 %vm750_vm9, %v735_v53 }
  0x9f   : > { %v605_v54 = vpop.permute.xlu1 %604  ;;  %v603_v8 = vpop.permute.xlu0 %602 }
  0xa0   : > { %v718_v59 = vsel %vm715_vm6, %v709_v58, %v603_v8  ;;  %v719_v1 = vsel %vm715_vm6, %v710_v0, %v605_v54 }
  0xa3   : > { %v647_v55 = vpop.permute.xlu1 %646  ;;  %v645_v57 = vpop.permute.xlu0 %644 }
  0xa4   : > { %v727_v60 = vsel %vm724_vm7, %v718_v59, %v645_v57  ;;  %v728_v2 = vsel %vm724_vm7, %v719_v1, %v647_v55 }
  0xa7   : > { %v565_v61 = vpop.permute.xlu1 %564  ;;  %v687_v62 = vpop.permute.xlu0 %686 }
  0xa8   : > { %v736_v63 = vsel %vm733_vm8, %v727_v60, %v687_v62  ;;  %v711_v13 = vsel %vm706_vm5, %v4655_v34, %v565_v61 }
  0xa9   : > { %3705 = vmatprep.mubr.msk.f32.mxu1 %vm750_vm9, %v736_v63 }
  0xab   : > { %v567_v3 = vpop.permute.xlu1 %566  ;;  %v689_v4 = vpop.permute.xlu0 %688 }
  0xac   : > { %v737_v10 = vsel %vm733_vm8, %v728_v2, %v689_v4  ;;  %v712_v18 = vsel %vm706_vm5, %v4678_v50, %v567_v3 }
  0xad   : > { %3706 = vmatmul.mubr.msk.f32.gmra.mrb[2].mxu1 %vm750_vm9, %v737_v10 }
  0xaf   : > { %v609_v5 = vpop.permute.xlu1 %608  ;;  %v607_v6 = vpop.permute.xlu0 %606 }
  0xb0   : > { %v720_v27 = vsel %vm715_vm6, %v711_v13, %v607_v6  ;;  %v721_v19 = vsel %vm715_vm6, %v712_v18, %v609_v5 }
  0xb3   : > { %v651_v11 = vpop.permute.xlu1 %650  ;;  %v649_v12 = vpop.permute.xlu0 %648 }
  0xb4   : > { %v729_v14 = vsel %vm724_vm7, %v720_v27, %v649_v12  ;;  %v730_v20 = vsel %vm724_vm7, %v721_v19, %v651_v11 }
  0xb7   : > { %v569_v15 = vpop.permute.xlu1 %568  ;;  %v691_v16 = vpop.permute.xlu0 %690 }
  0xb8   : > { %v738_v17 = vsel %vm733_vm8, %v729_v14, %v691_v16  ;;  %v713_v28 = vsel %vm706_vm5, %v4687_v56, %v569_v15  ;;  %v1127_v56 = vld [vmem:[%s6815_s3] sm:$0xff] }
  0xb9   : > { %3708 = vmatprep.mubr.msk.f32.mxu1 %vm750_vm9, %v738_v17 }
  0xbb   : > { %v571_v21 = vpop.permute.xlu1 %570  ;;  %v693_v22 = vpop.permute.xlu0 %692 }
  0xbc   : > { %v739_v34 = vsel %vm733_vm8, %v730_v20, %v693_v22  ;;  %v714_v50 = vsel %vm706_vm5, %v4709_v7, %v571_v21  ;;  %v1128_v7 = vld [vmem:[%s6815_s3 + $0x8] sm:$0xff]  ;;  %vm1054_vm5 = vcmask 1041409  }
  0xbd   : > { %3709 = vmatmul.mubr.msk.f32.gmra.mrb[4].mxu1 %vm750_vm9, %v739_v34  ;;  %v3799_v39 = vpack.c.bf16 %v1128_v7, %v1127_v56 }
  0xbf   : > { %v613_v23 = vpop.permute.xlu1 %612  ;;  %v611_v24 = vpop.permute.xlu0 %610  ;;  %3800 = vmatprep.subr.bf16.mxu1 %v3799_v39 }
  0xc0   : > { %v723_v29 = vsel %vm715_vm6, %v714_v50, %v613_v23  ;;  %v722_v30 = vsel %vm715_vm6, %v713_v28, %v611_v24  ;;  %3802 = vmatpush3.bf16.msra.mxu1 %v3799_v39  ;;  %vm1056_vm6 = vcmask 1042434  }
  0xc1   : > { %3804 = vmatprep.subr.bf16.mxu1 %v3803_v41 }
  0xc3   : > { %v655_v25 = vpop.permute.xlu1 %654  ;;  %v653_v26 = vpop.permute.xlu0 %652 }
  0xc4   : > { %v732_v31 = vsel %vm724_vm7, %v723_v29, %v655_v25  ;;  %v731_v32 = vsel %vm724_vm7, %v722_v30, %v653_v26  ;;  %3806 = vmatpush3.bf16.msra.mxu1 %v3803_v41  ;;  %vm1115_vm7 = vcmask 130048  }
  0xc7   : > { %v697_v33 = vpop.permute.xlu1 %696  ;;  %v695_v35 = vpop.permute.xlu0 %694 }
  0xc8   : > { %v741_v36 = vsel %vm733_vm8, %v732_v31, %v697_v33  ;;  %v740_v37 = vsel %vm733_vm8, %v731_v32, %v695_v35  ;;  %vm1118_vm8 = vcmask 261120  }
  0xc9   : > { %3711 = vmatprep.mubr.msk.f32.mxu1 %vm750_vm9, %v740_v37 }
  0xca   : > { %3712 = vmatmul.mubr.msk.f32.gmra.mrb[6].mxu1 %vm750_vm9, %v741_v36  ;;  %vm1121_vm9 = vcmask 392192  }
 0x170   : > { %v3704_v43 = vpop.f32.mrb[0].mxu1 }
 0x171   : > { %v850_v44 = vadd.f32 %v3704_v43, %v4807_v42  ;;  %v844_v45 = vpop.f32.mrb[1].mxu1 }
 0x172   : > { %v845_v46 = vadd.f32 %v4807_v42, %v844_v45 }
 0x173   : > { %v884_v47 = vmax.f32 %v850_v44, 0.0 }
 0x174   : > { %v883_v48 = vmax.f32 %v845_v46, 0.0 }
 0x175   : > { %v900_v9 = vcombine.high %v884_v47, %v884_v47  ;;  %v930_v49 = vsel %vm915_vm10, %v884_v47, -inf }
 0x176   : > { %v931_v51 = vrot.slane %v930_v49, 4  ;;  %v899_v52 = vcombine.high %v883_v48, %v883_v48  ;;  %v916_v53 = vsel %vm915_vm10, %v883_v48, -inf }
 0x177   : > { %v937_v54 = vsel %vm915_vm10, %v900_v9, -inf  ;;  %v917_v8 = vrot.slane %v916_v53, 4 }
 0x178   : > { %v932_v55 = vmax.f32 %v930_v49, %v931_v51  ;;  %v938_v57 = vrot.slane %v937_v54, 4  ;;  %v923_v58 = vsel %vm915_vm10, %v899_v52, -inf }
 0x179   : > { %v918_v59 = vmax.f32 %v916_v53, %v917_v8  ;;  %v924_v60 = vrot.slane %v923_v58, 4 }
 0x17a   : > { %v933_v61 = vrot.slane %v932_v55, 2  ;;  %v939_v62 = vmax.f32 %v937_v54, %v938_v57 }
 0x17b   : > { %v919_v63 = vrot.slane %v918_v59, 2  ;;  %v925_v0 = vmax.f32 %v923_v58, %v924_v60 }
 0x17c   : > { %v934_v1 = vmax.f32 %v932_v55, %v933_v61  ;;  %v940_v2 = vrot.slane %v939_v62, 2 }
 0x17d   : > { %v920_v3 = vmax.f32 %v918_v59, %v919_v63  ;;  %v926_v4 = vrot.slane %v925_v0, 2 }
 0x17e   : > { %v941_v10 = vmax.f32 %v939_v62, %v940_v2  ;;  %v935_v11 = vrot.slane %v934_v1, 1 }
 0x17f   : > { %v921_v5 = vrot.slane %v920_v3, 1  ;;  %v927_v6 = vmax.f32 %v925_v0, %v926_v4 }
 0x180   : > { %v3707_v12 = vpop.f32.mrb[2].mxu1  ;;  %v942_v13 = vrot.slane %v941_v10, 1  ;;  %v936_v20 = vmax.f32 %v934_v1, %v935_v11 }
 0x181   : > { %v928_v27 = vrot.slane %v927_v6, 1  ;;  %v860_v14 = vadd.f32 %v3707_v12, %v4807_v42  ;;  %v854_v15 = vpop.f32.mrb[3].mxu1  ;;  %v922_v17 = vmax.f32 %v920_v3, %v921_v5 }
 0x182   : > { %v855_v16 = vadd.f32 %v4807_v42, %v854_v15  ;;  %v943_v22 = vmax.f32 %v941_v10, %v942_v13 }
 0x183   : > { %v929_v18 = vmax.f32 %v927_v6, %v928_v27  ;;  %v886_v19 = vmax.f32 %v860_v14, 0.0 }
 0x184   : > { %v885_v21 = vmax.f32 %v855_v16, 0.0 }
 0x185   : > { %v1045_v34 = vsel %vm1044_vm11, %v929_v18, %v922_v17  ;;  %v902_v23 = vcombine.high %v886_v19, %v886_v19  ;;  %v958_v31 = vsel %vm915_vm10, %v886_v19, -inf }
 0x186   : > { %v1047_v24 = vsel %vm1046_vm12, %v936_v20, %v1045_v34  ;;  %v901_v25 = vcombine.high %v885_v21, %v885_v21  ;;  %v944_v26 = vsel %vm915_vm10, %v885_v21, -inf  ;;  %v959_v56 = vrot.slane %v958_v31, 4 }
 0x187   : > { %v965_v28 = vsel %vm915_vm10, %v902_v23, -inf  ;;  %v945_v50 = vrot.slane %v944_v26, 4  ;;  %v1049_v29 = vsel %vm1048_vm13, %v943_v22, %v1047_v24 }
 0x188   : > { %v951_v30 = vsel %vm915_vm10, %v901_v25, -inf  ;;  %v966_v35 = vrot.slane %v965_v28, 4  ;;  %v960_v43 = vmax.f32 %v958_v31, %v959_v56 }
 0x189   : > { %v946_v32 = vmax.f32 %v944_v26, %v945_v50  ;;  %v952_v33 = vrot.slane %v951_v30, 4 }
 0x18a   : > { %v967_v39 = vmax.f32 %v965_v28, %v966_v35  ;;  %v961_v54 = vrot.slane %v960_v43, 2 }
 0x18b   : > { %v947_v36 = vrot.slane %v946_v32, 2  ;;  %v953_v37 = vmax.f32 %v951_v30, %v952_v33 }
 0x18c   : > { %v968_v9 = vrot.slane %v967_v39, 2  ;;  %v962_v1 = vmax.f32 %v960_v43, %v961_v54 }
 0x18d   : > { %v948_v7 = vmax.f32 %v946_v32, %v947_v36  ;;  %v954_v38 = vrot.slane %v953_v37, 2 }
 0x18e   : > { %v969_v59 = vmax.f32 %v967_v39, %v968_v9  ;;  %v963_v14 = vrot.slane %v962_v1, 1 }
 0x18f   : > { %v949_v40 = vrot.slane %v948_v7, 1  ;;  %v955_v41 = vmax.f32 %v953_v37, %v954_v38 }
 0x190   : > { %v3710_v44 = vpop.f32.mrb[4].mxu1  ;;  %v970_v6 = vrot.slane %v969_v59, 1  ;;  %v964_v26 = vmax.f32 %v962_v1, %v963_v14 }
 0x191   : > { %v950_v45 = vmax.f32 %v948_v7, %v949_v40  ;;  %v956_v46 = vrot.slane %v955_v41, 1  ;;  %v870_v47 = vadd.f32 %v3710_v44, %v4807_v42  ;;  %v864_v48 = vpop.f32.mrb[5].mxu1 }
 0x192   : > { %v865_v49 = vadd.f32 %v4807_v42, %v864_v48  ;;  %v971_v20 = vmax.f32 %v969_v59, %v970_v6  ;;  %v1131_v59 = vld [vmem:[%s6815_s3 + $0x20] sm:$0xff]  ;;  %v1134_v6 = vld [vmem:[%s6815_s3 + $0x38] sm:$0xff] }
 0x193   : > { %v957_v51 = vmax.f32 %v955_v41, %v956_v46  ;;  %v1051_v52 = vsel %vm1050_vm14, %v950_v45, %v1049_v29  ;;  %v888_v53 = vmax.f32 %v870_v47, 0.0 }
 0x194   : > { %v887_v8 = vmax.f32 %v865_v49, 0.0  ;;  %v1055_v32 = vsel %vm1054_vm5, %v971_v20, %v964_v26  ;;  %v1136_v20 = vld [vmem:[%s6815_s3 + $0x48] sm:$0xff] }
 0x195   : > { %v904_v55 = vcombine.high %v888_v53, %v888_v53  ;;  %v986_v57 = vsel %vm915_vm10, %v888_v53, -inf  ;;  %v4829_v58 = vsel %vm1052_vm15, %v957_v51, %v1051_v52 }
 0x196   : > { %v987_v60 = vrot.slane %v986_v57, 4  ;;  %v903_v61 = vcombine.high %v887_v8, %v887_v8  ;;  %v972_v62 = vsel %vm915_vm10, %v887_v8, -inf }
 0x197   : > { %v993_v63 = vsel %vm915_vm10, %v904_v55, -inf  ;;  %v973_v0 = vrot.slane %v972_v62, 4 }
 0x198   : > { %v988_v2 = vmax.f32 %v986_v57, %v987_v60  ;;  %v994_v3 = vrot.slane %v993_v63, 4  ;;  %v979_v4 = vsel %vm915_vm10, %v903_v61, -inf  ;;  %v1132_v60 = vld [vmem:[%s6815_s3 + $0x28] sm:$0xff] }
 0x199   : > { %v974_v10 = vmax.f32 %v972_v62, %v973_v0  ;;  %v980_v5 = vrot.slane %v979_v4, 4  ;;  %v3807_v1 = vpack.c.bf16 %v1132_v60, %v1131_v59  ;;  %v1366_v59 = vld [vmem:[%s6817_s5 + $0x10] sm:$0xff]  ;;  %v4507_v60 = vmov 0.0|0.0  }
 0x19a   : > { %v989_v11 = vrot.slane %v988_v2, 2  ;;  %v995_v12 = vmax.f32 %v993_v63, %v994_v3  ;;  %3819 = vmatprep.subr.bf16.mxu0 %v4507_v60 }
 0x19b   : > { %v975_v13 = vrot.slane %v974_v10, 2  ;;  %v981_v27 = vmax.f32 %v979_v4, %v980_v5  ;;  %3808 = vmatprep.subr.bf16.mxu1 %v3807_v1  ;;  %v1133_v5 = vld [vmem:[%s6815_s3 + $0x30] sm:$0xff] }
 0x19c   : > { %v990_v15 = vmax.f32 %v988_v2, %v989_v11  ;;  %v996_v16 = vrot.slane %v995_v12, 2  ;;  %3810 = vmatpush3.bf16.msra.mxu1 %v3807_v1  ;;  %v1369_v1 = vld [vmem:[%s6817_s5 + $0x28] sm:$0xff] }
 0x19d   : > { %v976_v17 = vmax.f32 %v974_v10, %v975_v13  ;;  %v982_v18 = vrot.slane %v981_v27, 2  ;;  %v3713_v19 = vpop.f32.mrb[6].mxu1 }
 0x19e   : > { %v997_v21 = vmax.f32 %v995_v12, %v996_v16  ;;  %v880_v22 = vadd.f32 %v3713_v19, %v4807_v42  ;;  %v874_v34 = vpop.f32.mrb[7].mxu1  ;;  %v991_v28 = vrot.slane %v990_v15, 1  ;;  %v1135_v19 = vld [vmem:[%s6815_s3 + $0x40] sm:$0xff] }
 0x19f   : > { %v977_v23 = vrot.slane %v976_v17, 1  ;;  %v983_v24 = vmax.f32 %v981_v27, %v982_v18  ;;  %v875_v25 = vadd.f32 %v4807_v42, %v874_v34  ;;  %v3811_v27 = vpack.c.bf16 %v1134_v6, %v1133_v5  ;;  %v1372_v5 = vld [vmem:[%s6817_s5 + $0x40] sm:$0xff]  ;;  %v1373_v6 = vld [vmem:[%s6817_s5 + $0x48] sm:$0xff] }
 0x1a0   : > { %v890_v50 = vmax.f32 %v880_v22, 0.0  ;;  %v998_v33 = vrot.slane %v997_v21, 1  ;;  %v992_v39 = vmax.f32 %v990_v15, %v991_v28 }
 0x1a1   : > { %v978_v29 = vmax.f32 %v976_v17, %v977_v23  ;;  %v984_v30 = vrot.slane %v983_v24, 1  ;;  %v889_v31 = vmax.f32 %v875_v25, 0.0  ;;  %v1067_v17 = vsel %vm509_vm0, 0.0, %v4829_v58  ;;  %3812 = vmatprep.subr.bf16.mxu1 %v3811_v27 }
 0x1a2   : > { %v906_v35 = vcombine.high %v890_v50, %v890_v50  ;;  %v1014_v36 = vsel %vm915_vm10, %v890_v50, -inf  ;;  %v999_v46 = vmax.f32 %v997_v21, %v998_v33  ;;  %3814 = vmatpush3.bf16.msra.mxu1 %v3811_v27  ;;  %v1071_v23 = vrot.slane %v1067_v17, 1 }
 0x1a3   : > { %v985_v37 = vmax.f32 %v983_v24, %v984_v30  ;;  %v1057_v56 = vsel %vm1056_vm6, %v978_v29, %v1055_v32  ;;  %v1015_v7 = vrot.slane %v1014_v36, 4  ;;  %v905_v38 = vcombine.high %v889_v31, %v889_v31 }
 0x1a4   : > { %v1021_v42 = vsel %vm915_vm10, %v906_v35, -inf  ;;  %v1000_v40 = vsel %vm915_vm10, %v889_v31, -inf  ;;  %v3815_v24 = vpack.c.bf16 %v1136_v20, %v1135_v19  ;;  %v1082_v50 = vrot.slane %v1067_v17, 2  ;;  %v3604_v19 = vld [vmem:[%s6816_s4] ss:$0 sm:$0xff] }
 0x1a5   : > { %v1058_v41 = vsel %vm1044_vm11, %v985_v37, %v1057_v56  ;;  %v1016_v43 = vmax.f32 %v1014_v36, %v1015_v7  ;;  %v1022_v44 = vrot.slane %v1021_v42, 4  ;;  %v1001_v45 = vrot.slane %v1000_v40, 4 }
 0x1a6   : > { %v1059_v47 = vsel %vm1046_vm12, %v992_v39, %v1058_v41  ;;  %v1007_v48 = vsel %vm915_vm10, %v905_v38, -inf  ;;  %3816 = vmatprep.subr.bf16.mxu1 %v3815_v24  ;;  %v1093_v33 = vrot.slane %v1067_v17, 3  ;;  %v1104_v7 = vrot.slane %v1067_v17, 4 }
 0x1a7   : > { %v1017_v9 = vrot.slane %v1016_v43, 2  ;;  %v1023_v49 = vmax.f32 %v1021_v42, %v1022_v44  ;;  %v1002_v51 = vmax.f32 %v1000_v40, %v1001_v45  ;;  %v1008_v52 = vrot.slane %v1007_v48, 4  ;;  %3818 = vmatpush3.bf16.msra.mxu1 %v3815_v24 }
 0x1a8   : > { %v1060_v53 = vsel %vm1048_vm13, %v999_v46, %v1059_v47  ;;  %vm1124_vm10 = vcmask 523264   ;;  %3837 = vmatprep.subr.bf16.mxu1 %v4507_v60 }
 0x1a9   : > { %v1018_v54 = vmax.f32 %v1016_v43, %v1017_v9  ;;  %v1024_v8 = vrot.slane %v1023_v49, 2  ;;  %v1003_v55 = vrot.slane %v1002_v51, 2  ;;  %v1009_v57 = vmax.f32 %v1007_v48, %v1008_v52 }
 0x1ab   : > { %v1019_v61 = vrot.slane %v1018_v54, 1  ;;  %v1025_v62 = vmax.f32 %v1023_v49, %v1024_v8  ;;  %v1004_v63 = vmax.f32 %v1002_v51, %v1003_v55  ;;  %v1010_v0 = vrot.slane %v1009_v57, 2  ;;  %v1364_v55 = vld [vmem:[%s6817_s5] sm:$0xff] }
 0x1ad   : > { %v1026_v2 = vrot.slane %v1025_v62, 1  ;;  %v1005_v3 = vrot.slane %v1004_v63, 1  ;;  %v1011_v4 = vmax.f32 %v1009_v57, %v1010_v0  ;;  %v1020_v10 = vmax.f32 %v1018_v54, %v1019_v61  ;;  %v1365_v57 = vld [vmem:[%s6817_s5 + $0x8] sm:$0xff]  ;;  %v1368_v0 = vld [vmem:[%s6817_s5 + $0x20] sm:$0xff] }
 0x1ae   : > { %v3820_v61 = vpack.c.bf16 %v1365_v57, %v1364_v55 }
 0x1af   : > { %v1027_v11 = vmax.f32 %v1025_v62, %v1026_v2  ;;  %v1006_v12 = vmax.f32 %v1004_v63, %v1005_v3  ;;  %v1012_v13 = vrot.slane %v1011_v4, 1  ;;  %v1367_v62 = vld [vmem:[%s6817_s5 + $0x18] sm:$0xff]  ;;  %v3826_v2 = vpack.c.bf16 %v1369_v1, %v1368_v0  ;;  %v1370_v3 = vld [vmem:[%s6817_s5 + $0x30] sm:$0xff] }
 0x1b0   : > { %3821 = vmatpush3.bf16.msra.mxu0 %v3820_v61  ;;  %v3823_v63 = vpack.c.bf16 %v1367_v62, %v1366_v59 }
 0x1b1   : > { %v1013_v14 = vmax.f32 %v1011_v4, %v1012_v13  ;;  %v1061_v15 = vsel %vm1050_vm14, %v1006_v12, %v1060_v53  ;;  %v1063_v16 = vsel %vm1054_vm5, %v1027_v11, %v1020_v10  ;;  %3822 = vmatprep.subr.bf16.mxu0 %v4507_v60  ;;  %v1371_v4 = vld [vmem:[%s6817_s5 + $0x38] sm:$0xff]  ;;  %v3832_v11 = vpack.c.bf16 %v1373_v6, %v1372_v5  ;;  %v1374_v12 = vld [vmem:[%s6817_s5 + $0x50] sm:$0xff] }
 0x1b2   : > { %v1068_v18 = vsel %vm509_vm0, %v1063_v16, 0.0  ;;  %v3829_v10 = vpack.c.bf16 %v1371_v4, %v1370_v3  ;;  %v1375_v13 = vld [vmem:[%s6817_s5 + $0x58] sm:$0xff]  ;;  %v1234_v16 = vlaneseq  ;;  %vm1272_vm5 = vcmask 254976  }
 0x1b3   : > { %v1062_v21 = vsel %vm1052_vm15, %v1013_v14, %v1061_v15  ;;  %v1074_v22 = vrot.slane %v1068_v18, 1  ;;  %v1085_v28 = vrot.slane %v1068_v18, 2  ;;  %v1096_v32 = vrot.slane %v1068_v18, 3 }
 0x1b4   : > { %v1072_v34 = vrot.slane %v1062_v21, 1  ;;  %v1083_v26 = vrot.slane %v1062_v21, 2  ;;  %v1094_v31 = vrot.slane %v1062_v21, 3  ;;  %v1105_v37 = vrot.slane %v1062_v21, 4  ;;  %3824 = vmatpush3.bf16.msra.mxu0 %v3823_v63 }
 0x1b5   : > { %v1107_v56 = vrot.slane %v1068_v18, 4  ;;  %3825 = vmatprep.subr.bf16.mxu0 %v4507_v60  ;;  %v3835_v27 = vpack.c.bf16 %v1375_v13, %v1374_v12  ;;  %v4508_v14 = vmov 1983009808   ;;  %v4928_v18 = vshrl.u32 %v1234_v16, 7 }
 0x1b6   : > { %v1075_v58 = vsel %vm538_vm2, %v1072_v34, %v1074_v22  ;;  %v1073_v25 = vsel %vm538_vm2, %v1071_v23, %v1072_v34  ;;  %v1086_v29 = vsel %vm580_vm1, %v1083_v26, %v1085_v28  ;;  %v1084_v30 = vsel %vm580_vm1, %v1082_v50, %v1083_v26 }
 0x1b7   : > { %1078 = vrot.lane.b32.xlu1 %v1075_v58, %s4503_s25  ;;  %1076 = vrot.lane.b32.xlu0 %v1073_v25, %s4503_s25  ;;  %v1097_v35 = vsel %vm622_vm3, %v1094_v31, %v1096_v32  ;;  %v1095_v36 = vsel %vm622_vm3, %v1093_v33, %v1094_v31  ;;  %v1108_v38 = vsel %vm664_vm4, %v1105_v37, %v1107_v56  ;;  %v1232_v15 = vunpack.c.l.s4 %v4508_v14 }
 0x1b8   : > { %v1106_v39 = vsel %vm664_vm4, %v1104_v7, %v1105_v37  ;;  %vm1144_vm4 = vcmask 654336   ;;  %3827 = vmatpush3.bf16.msra.mxu0 %v3826_v2 }
 0x1b9   : > { %3828 = vmatprep.subr.bf16.mxu0 %v4507_v60 }
 0x1bb   : > { %1089 = vrot.lane.b32.xlu1 %v1086_v29, %s4504_s26  ;;  %1087 = vrot.lane.b32.xlu0 %v1084_v30, %s4504_s26 }
 0x1bc   : > { %3830 = vmatpush3.bf16.msra.mxu0 %v3829_v10 }
 0x1bd   : > { %3831 = vmatprep.subr.bf16.mxu0 %v4507_v60 }
 0x1bf   : > { %1100 = vrot.lane.b32.xlu1 %v1097_v35, %s4505_s27  ;;  %1098 = vrot.lane.b32.xlu0 %v1095_v36, %s4505_s27 }
 0x1c0   : > { %3833 = vmatpush3.bf16.msra.mxu0 %v3832_v11 }
 0x1c1   : > { %3834 = vmatprep.subr.bf16.mxu0 %v4507_v60 }
 0x1c3   : > { %1111 = vrot.lane.b32.xlu1 %v1108_v38, %s4506_s28  ;;  %1109 = vrot.lane.b32.xlu0 %v1106_v39, %s4506_s28 }
 0x1c4   : > { %3836 = vmatpush3.bf16.msra.mxu0 %v3835_v27 }
 0x229   : > { %v1079_v42 = vpop.permute.xlu1 %1078  ;;  %v1077_v40 = vpop.permute.xlu0 %1076 }
 0x22a   : > { %v1117_v46 = vsel %vm1115_vm7, %v1062_v21, %v1079_v42  ;;  %v1116_v47 = vsel %vm1115_vm7, %v1067_v17, %v1077_v40  ;;  %v1233_v17 = vunpack.c.0.s8 %v1232_v15  ;;  %vm4509_vm7 = vmmov 0  }
 0x22c   : > { %v4934_v22 = vsub.s32 %v1233_v17, %v4928_v18 }
 0x22d   : > { %v1090_v41 = vpop.permute.xlu1 %1089  ;;  %v1088_v43 = vpop.permute.xlu0 %1087 }
 0x22e   : > { %v1120_v48 = vsel %vm1118_vm8, %v1117_v46, %v1090_v41  ;;  %v1119_v9 = vsel %vm1118_vm8, %v1116_v47, %v1088_v43 }
 0x231   : > { %v1101_v44 = vpop.permute.xlu1 %1100  ;;  %v1099_v45 = vpop.permute.xlu0 %1098 }
 0x232   : > { %v1123_v49 = vsel %vm1121_vm9, %v1120_v48, %v1101_v44  ;;  %v1122_v51 = vsel %vm1121_vm9, %v1119_v9, %v1099_v45  ;;  %vm1345_vm9 = vcmask 1040384  }
 0x235   : > { %v1112_v52 = vpop.permute.xlu1 %1111  ;;  %v1110_v53 = vpop.permute.xlu0 %1109 }
 0x236   : > { %v1126_v54 = vsel %vm1124_vm10, %v1123_v49, %v1112_v52  ;;  %v1125_v8 = vsel %vm1124_vm10, %v1122_v51, %v1110_v53 }
 0x237   : > { %3734 = vmatprep.mubr.msk.f32.mxu1 %vm1144_vm4, %v1125_v8 }
 0x238   : > { %3735 = vmatmul.mubr.msk.f32.vlgmr.msra.gmra.mrb[8].mxu1 %vm1144_vm4, %v1126_v54 }
 0x30b   : > { %v3736_v20 = vpop.f32.mrb[8].mxu1 }
 0x30c   : > { %v1223_v21 = vadd.f32 %v3736_v20, %v3604_v19  ;;  %v1217_v34 = vpop.f32.mrb[9].mxu1 }
 0x30d   : > { %v1218_v23 = vadd.f32 %v3604_v19, %v1217_v34 }
 0x30e   : > { %v1227_v24 = vmax.f32 %v1223_v21, 0.0 }
 0x30f   : > { %v1226_v58 = vmax.f32 %v1218_v23, 0.0 }
 0x310   : > { %v1247_v25 = vcombine.high %v1227_v24, %v1227_v24  ;;  %v1254_v26 = vrot.slane %v1227_v24, %v4934_v22 }
 0x311   : > { %v1230_v28 = vcombine.high %v1226_v58, %v1226_v58  ;;  %v1237_v50 = vrot.slane %v1226_v58, %v4934_v22  ;;  %v4510_v58 = vmov 0.0  }
 0x312   : > { %v1261_v29 = vrot.slane %v1247_v25, %v4934_v22  ;;  %v1262_v30 = vcombine.high %v1254_v26, %v1254_v26  ;;  %v1301_v31 = vsel %vm1272_vm5, %v1254_v26, -inf  ;;  %3761 = vmatprep.mubr.msk.f32.mxu0 %vm4509_vm7, %v4510_v58 }
 0x313   : > { %v1302_v32 = vrot.slane %v1301_v31, 4  ;;  %v1244_v33 = vrot.slane %v1230_v28, %v4934_v22  ;;  %v1245_v35 = vcombine.high %v1237_v50, %v1237_v50  ;;  %v1273_v36 = vsel %vm1272_vm5, %v1237_v50, -inf }
 0x314   : > { %v1263_v37 = vcombine.high %v1261_v29, %v1261_v29  ;;  %v1308_v56 = vsel %vm1272_vm5, %v1262_v30, -inf  ;;  %v1315_v7 = vsel %vm1272_vm5, %v1261_v29, -inf  ;;  %v1274_v38 = vrot.slane %v1273_v36, 4 }
 0x315   : > { %v1303_v39 = vmax.f32 %v1301_v31, %v1302_v32  ;;  %v1309_v42 = vrot.slane %v1308_v56, 4  ;;  %v1316_v40 = vrot.slane %v1315_v7, 4  ;;  %v1246_v41 = vcombine.high %v1244_v33, %v1244_v33 }
 0x316   : > { %v1322_v43 = vsel %vm1272_vm5, %v1263_v37, -inf  ;;  %v1275_v44 = vmax.f32 %v1273_v36, %v1274_v38  ;;  %v1280_v45 = vsel %vm1272_vm5, %v1245_v35, -inf  ;;  %v1287_v46 = vsel %vm1272_vm5, %v1244_v33, -inf }
 0x317   : > { %v1310_v47 = vmax.f32 %v1308_v56, %v1309_v42  ;;  %v1317_v48 = vmax.f32 %v1315_v7, %v1316_v40  ;;  %v1323_v9 = vrot.slane %v1322_v43, 4  ;;  %v1281_v51 = vrot.slane %v1280_v45, 4 }
 0x318   : > { %v1276_v49 = vrot.slane %v1275_v44, 2  ;;  %v1288_v52 = vrot.slane %v1287_v46, 4  ;;  %v1294_v53 = vsel %vm1272_vm5, %v1246_v41, -inf  ;;  %v1304_v54 = vrot.slane %v1303_v39, 2 }
 0x319   : > { %v1311_v8 = vrot.slane %v1310_v47, 2  ;;  %v1324_v55 = vmax.f32 %v1322_v43, %v1323_v9  ;;  %v1282_v59 = vmax.f32 %v1280_v45, %v1281_v51  ;;  %v1295_v62 = vrot.slane %v1294_v53, 4  ;;  %v1527_v9 = vld [vmem:[%s6819_s7 + $0x8] sm:$0xff] }
 0x31a   : > { %v1277_v57 = vmax.f32 %v1275_v44, %v1276_v49  ;;  %v1289_v61 = vmax.f32 %v1287_v46, %v1288_v52  ;;  %v1318_v63 = vrot.slane %v1317_v48, 2  ;;  %v1305_v4 = vmax.f32 %v1303_v39, %v1304_v54  ;;  %v1528_v49 = vld [vmem:[%s6819_s7 + $0x10] sm:$0xff]  ;;  %v1529_v52 = vld [vmem:[%s6819_s7 + $0x18] sm:$0xff]  ;;  %v1530_v54 = vld [vmem:[%s6819_s7 + $0x20] sm:$0xff] }
 0x31b   : > { %v1325_v0 = vrot.slane %v1324_v55, 2  ;;  %v1283_v1 = vrot.slane %v1282_v59, 2  ;;  %v1296_v3 = vmax.f32 %v1294_v53, %v1295_v62  ;;  %v1312_v10 = vmax.f32 %v1310_v47, %v1311_v8  ;;  %v1531_v8 = vld [vmem:[%s6819_s7 + $0x28] sm:$0xff]  ;;  %v1534_v62 = vld [vmem:[%s6819_s7 + $0x40] sm:$0xff] }
 0x31c   : > { %v1290_v2 = vrot.slane %v1289_v61, 2  ;;  %v1278_v6 = vrot.slane %v1277_v57, 1  ;;  %v1319_v27 = vmax.f32 %v1317_v48, %v1318_v63  ;;  %v1306_v19 = vrot.slane %v1305_v4, 1  ;;  %v1526_v48 = vld [vmem:[%s6819_s7] sm:$0xff]  ;;  %v1535_v63 = vld [vmem:[%s6819_s7 + $0x48] sm:$0xff] }
 0x31d   : > { %v1326_v5 = vmax.f32 %v1324_v55, %v1325_v0  ;;  %v1284_v11 = vmax.f32 %v1282_v59, %v1283_v1  ;;  %v1297_v13 = vrot.slane %v1296_v3, 2  ;;  %v1313_v20 = vrot.slane %v1312_v10, 1  ;;  %v1533_v59 = vld [vmem:[%s6819_s7 + $0x38] sm:$0xff]  ;;  %v1536_v1 = vld [vmem:[%s6819_s7 + $0x50] sm:$0xff] }
 0x31e   : > { %v1291_v12 = vmax.f32 %v1289_v61, %v1290_v2  ;;  %v1279_v21 = vmax.f32 %v1277_v57, %v1278_v6  ;;  %v1320_v25 = vrot.slane %v1319_v27, 1  ;;  %v1307_v29 = vmax.f32 %v1305_v4, %v1306_v19  ;;  %v1532_v57 = vld [vmem:[%s6819_s7 + $0x30] sm:$0xff]  ;;  %v1537_v2 = vld [vmem:[%s6819_s7 + $0x58] sm:$0xff]  ;;  %v1538_v4 = vld [vmem:[%s6819_s7 + $0x60] sm:$0xff] }
 0x31f   : > { %v1285_v14 = vrot.slane %v1284_v11, 1  ;;  %v1298_v16 = vmax.f32 %v1296_v3, %v1297_v13  ;;  %v1327_v17 = vrot.slane %v1326_v5, 1  ;;  %v1314_v31 = vmax.f32 %v1312_v10, %v1313_v20  ;;  %v1539_v10 = vld [vmem:[%s6819_s7 + $0x68] sm:$0xff]  ;;  %v1540_v6 = vld [vmem:[%s6819_s7 + $0x70] sm:$0xff]  ;;  %v1542_v13 = vld [vmem:[%s6819_s7 + $0x80] sm:$0xff] }
 0x320   : > { %v1292_v15 = vrot.slane %v1291_v12, 1  ;;  %v1321_v33 = vmax.f32 %v1319_v27, %v1320_v25  ;;  %v3838_v51 = vpack.c.bf16 %v1527_v9, %v1526_v48  ;;  %v3841_v53 = vpack.c.bf16 %v1529_v52, %v1528_v49  ;;  %v1543_v27 = vld [vmem:[%s6819_s7 + $0x88] sm:$0xff]  ;;  %v1546_v19 = vld [vmem:[%s6819_s7 + $0xa0] sm:$0xff] }
 0x321   : > { %v1286_v34 = vmax.f32 %v1284_v11, %v1285_v14  ;;  %v1299_v24 = vrot.slane %v1298_v16, 1  ;;  %v1328_v50 = vmax.f32 %v1326_v5, %v1327_v17  ;;  %v3844_v55 = vpack.c.bf16 %v1531_v8, %v1530_v54  ;;  %v1541_v11 = vld [vmem:[%s6819_s7 + $0x78] sm:$0xff]  ;;  %v1547_v20 = vld [vmem:[%s6819_s7 + $0xa8] sm:$0xff]  ;;  %v3607_v25 = vld [vmem:[%s6818_s6] ss:$0 sm:$0xff] }
 0x322   : > { %v1293_v23 = vmax.f32 %v1291_v12, %v1292_v15  ;;  %3839 = vmatpush1.bf16.msra.mxu1 %v3838_v51  ;;  %v3847_v61 = vpack.c.bf16 %v1533_v59, %v1532_v57  ;;  %v3850_v0 = vpack.c.bf16 %v1535_v63, %v1534_v62  ;;  %v3853_v3 = vpack.c.bf16 %v1537_v2, %v1536_v1  ;;  %v1544_v15 = vld [vmem:[%s6819_s7 + $0x90] sm:$0xff]  ;;  %v1688_v54 = vld [vmem:[%s6821_s9 + $0x108] sm:$0xff]  ;;  %v1690_v8 = vld [vmem:[%s6821_s9 + $0x118] sm:$0xff] }
 0x323   : > { %v1300_v26 = vmax.f32 %v1298_v16, %v1299_v24  ;;  %v1337_v28 = vsel %vm1056_vm6, %v1286_v34, %v1279_v21  ;;  %v1347_v37 = vsel %vm1345_vm9, %v1328_v50, 0.0  ;;  %3840 = vmatprep.subr.bf16.mxu1 %v4507_v60  ;;  %v3856_v5 = vpack.c.bf16 %v1539_v10, %v1538_v4  ;;  %v1545_v16 = vld [vmem:[%s6819_s7 + $0x98] sm:$0xff]  ;;  %v1548_v34 = vld [vmem:[%s6819_s7 + $0xb0] sm:$0xff]  ;;  %v2281_v2 = vld [vmem:[%s6821_s9 + $0x600] sm:$0xff] }
 0x324   : > { %v1338_v30 = vsel %vm1044_vm11, %v1293_v23, %v1337_v28  ;;  %v1357_v39 = vrot.slane %v1347_v37, 2  ;;  %v1351_v40 = vrot.slane %v1347_v37, 1  ;;  %v3859_v12 = vpack.c.bf16 %v1541_v11, %v1540_v6  ;;  %v1549_v23 = vld [vmem:[%s6819_s7 + $0xb8] sm:$0xff]  ;;  %v2286_v11 = vld [vmem:[%s6821_s9 + $0x628] sm:$0xff] }
 0x325   : > { %v1339_v32 = vsel %vm1046_vm12, %v1300_v26, %v1338_v30  ;;  %v3862_v14 = vpack.c.bf16 %v1543_v27, %v1542_v13  ;;  %v3865_v17 = vpack.c.bf16 %v1545_v16, %v1544_v15  ;;  %v3868_v21 = vpack.c.bf16 %v1547_v20, %v1546_v19  ;;  %v2284_v62 = vld [vmem:[%s6821_s9 + $0x618] sm:$0xff]  ;;  %v2285_v15 = vld [vmem:[%s6821_s9 + $0x620] sm:$0xff]  ;;  %v2287_v16 = vld [vmem:[%s6821_s9 + $0x630] sm:$0xff] }
 0x326   : > { %v1340_v35 = vsel %vm1048_vm13, %v1307_v29, %v1339_v32  ;;  %vm1383_vm13 = vcmask 785408   ;;  %3842 = vmatpush1.bf16.msra.mxu1 %v3841_v53  ;;  %v3871_v24 = vpack.c.bf16 %v1549_v23, %v1548_v34  ;;  %v4071_v19 = vpack.c.bf16 %v2287_v16, %v2285_v15  ;;  %v2290_v20 = vld [vmem:[%s6821_s9 + $0x648] sm:$0xff]  ;;  %v2304_v15 = vld [vmem:[%s6821_s9 + $0x6b8] sm:$0xff]  ;;  %v1707_v16 = vld [vmem:[%s6821_s9 + $0x1a0] sm:$0xff] }
 0x327   : > { %v1341_v36 = vsel %vm1050_vm14, %v1314_v31, %v1340_v35  ;;  %3843 = vmatprep.subr.bf16.mxu1 %v4507_v60 }
 0x328   : > { %v1342_v56 = vsel %vm1052_vm15, %v1321_v33, %v1341_v36 }
 0x329   : > { %v1346_v7 = vsel %vm1345_vm9, 0.0, %v1342_v56 }
 0x32a   : > { %v1356_v38 = vrot.slane %v1346_v7, 2  ;;  %v1350_v42 = vrot.slane %v1346_v7, 1  ;;  %3845 = vmatpush1.bf16.msra.mxu1 %v3844_v55  ;;  %v2282_v55 = vld [vmem:[%s6821_s9 + $0x608] sm:$0xff] }
 0x32b   : > { %3846 = vmatprep.subr.bf16.mxu1 %v4507_v60  ;;  %v4065_v1 = vpack.c.bf16 %v2284_v62, %v2282_v55  ;;  %v1706_v62 = vld [vmem:[%s6821_s9 + $0x198] sm:$0xff] }
 0x32c   : > { %v1358_v41 = vsel %vm580_vm1, %v1356_v38, %v1357_v39  ;;  %v1352_v43 = vsel %vm538_vm2, %v1350_v42, %v1351_v40  ;;  %vm1480_vm1 = vcmask 517120  }
 0x32d   : > { %1359 = vrot.lane.b32.xlu1 %v1358_v41, %s4506_s28  ;;  %1353 = vrot.lane.b32.xlu0 %v1352_v43, %s4504_s26 }
 0x32e   : > { %3848 = vmatpush1.bf16.msra.mxu1 %v3847_v61  ;;  %4066 = vmatprep.subr.bf16.mxu0 %v4065_v1  ;;  %v2300_v1 = vld [vmem:[%s6821_s9 + $0x698] sm:$0xff] }
 0x32f   : > { %3849 = vmatprep.subr.bf16.mxu1 %v4507_v60 }
 0x332   : > { %3851 = vmatpush1.bf16.msra.mxu1 %v3850_v0  ;;  %v3873_v0 = vpack.c.bf16 %v1690_v8, %v1688_v54  ;;  %v1701_v54 = vld [vmem:[%s6821_s9 + $0x170] sm:$0xff]  ;;  %v2293_v8 = vld [vmem:[%s6821_s9 + $0x660] sm:$0xff] }
 0x333   : > { %3852 = vmatprep.subr.bf16.mxu1 %v4507_v60 }
 0x336   : > { %3854 = vmatpush1.bf16.msra.mxu1 %v3853_v3  ;;  %v2283_v3 = vld [vmem:[%s6821_s9 + $0x610] sm:$0xff] }
 0x337   : > { %3855 = vmatprep.subr.bf16.mxu1 %v4507_v60  ;;  %v4067_v6 = vpack.c.bf16 %v2283_v3, %v2281_v2  ;;  %v1703_v2 = vld [vmem:[%s6821_s9 + $0x180] sm:$0xff]  ;;  %v1705_v3 = vld [vmem:[%s6821_s9 + $0x190] sm:$0xff] }
 0x33a   : > { %3857 = vmatpush1.bf16.msra.mxu1 %v3856_v5 }
 0x33b   : > { %3858 = vmatprep.subr.bf16.mxu1 %v4507_v60 }
 0x33e   : > { %3860 = vmatpush1.bf16.msra.mxu1 %v3859_v12  ;;  %v2288_v12 = vld [vmem:[%s6821_s9 + $0x638] sm:$0xff] }
 0x33f   : > { %3861 = vmatprep.subr.bf16.mxu1 %v4507_v60  ;;  %v4069_v13 = vpack.c.bf16 %v2288_v12, %v2286_v11  ;;  %v1708_v12 = vld [vmem:[%s6821_s9 + $0x1a8] sm:$0xff] }
 0x342   : > { %3863 = vmatpush1.bf16.msra.mxu1 %v3862_v14 }
 0x343   : > { %3864 = vmatprep.subr.bf16.mxu1 %v4507_v60 }
 0x346   : > { %3866 = vmatpush1.bf16.msra.mxu1 %v3865_v17 }
 0x347   : > { %3867 = vmatprep.subr.bf16.mxu1 %v4507_v60 }
 0x34a   : > { %3869 = vmatpush1.bf16.msra.mxu1 %v3868_v21  ;;  %v2292_v21 = vld [vmem:[%s6821_s9 + $0x658] sm:$0xff] }
 0x34b   : > { %3870 = vmatprep.subr.bf16.mxu1 %v4507_v60  ;;  %v4073_v23 = vpack.c.bf16 %v2292_v21, %v2290_v20  ;;  %v2301_v21 = vld [vmem:[%s6821_s9 + $0x6a0] sm:$0xff] }
 0x34e   : > { %3872 = vmatpush1.bf16.msra.mxu1 %v3871_v24 }
 0x34f   : > { %3874 = vmatprep.subr.bf16.mxu1 %v3873_v0 }
 0x39f   : > { %v1360_v44 = vpop.permute.xlu1 %1359  ;;  %v1354_v45 = vpop.permute.xlu0 %1353 }
 0x3a0   : > { %v1362_v46 = vsel %vm1118_vm8, %v1346_v7, %v1354_v45 }
 0x3a1   : > { %v1363_v47 = vsel %vm1124_vm10, %v1362_v46, %v1360_v44 }
 0x3a2   : > { %3762 = vmatmul.mubr.msk.f32.vlgmr.msra.gmra.mrb[0].mxu0 %vm1383_vm13, %v1363_v47 }
 0x3a3   : > { %2377 = vmatprep.mubr.f32.mxu0 %v4510_v58  ;;  %4068 = vmatpush1.bf16.msra.mxu0 %v4067_v6  ;;  %v2299_v6 = vld [vmem:[%s6821_s9 + $0x690] sm:$0xff] }
 0x3a4   : > { %4070 = vmatprep.subr.bf16.mxu0 %v4069_v13  ;;  %v1710_v13 = vld [vmem:[%s6821_s9 + $0x1b8] sm:$0xff] }
 0x3a7   : > { %4072 = vmatpush1.bf16.msra.mxu0 %v4071_v19 }
 0x3a8   : > { %4074 = vmatprep.subr.bf16.mxu0 %v4073_v23 }
 0x475   : > { %v1453_v26 = vpop.f32.mrb[0].mxu0 }
 0x476   : > { %v1454_v28 = vadd.f32 %v3607_v25, %v1453_v26  ;;  %v3763_v50 = vpop.f32.mrb[1].mxu0  ;;  %v2289_v26 = vld [vmem:[%s6821_s9 + $0x640] sm:$0xff] }
 0x478   : > { %v1457_v29 = vmax.f32 %v1454_v28, 0.0  ;;  %v2291_v28 = vld [vmem:[%s6821_s9 + $0x650] sm:$0xff] }
 0x47a   : > { %v1459_v30 = vcombine.high %v1457_v29, %v1457_v29  ;;  %v1466_v31 = vrot.slane %v1457_v29, %v4934_v22 }
 0x47c   : > { %v1473_v32 = vrot.slane %v1459_v30, %v4934_v22  ;;  %v1474_v33 = vcombine.high %v1466_v31, %v1466_v31  ;;  %v1481_v35 = vsel %vm1480_vm1, %v1466_v31, -inf  ;;  %v4075_v30 = vpack.c.bf16 %v2291_v28, %v2289_v26  ;;  %v2294_v31 = vld [vmem:[%s6821_s9 + $0x668] sm:$0xff] }
 0x47d   : > { %v1482_v36 = vrot.slane %v1481_v35, 4  ;;  %v2306_v26 = vld [vmem:[%s6821_s9 + $0x6c8] sm:$0xff] }
 0x47e   : > { %v1475_v37 = vcombine.high %v1473_v32, %v1473_v32  ;;  %v1488_v56 = vsel %vm1480_vm1, %v1474_v33, -inf  ;;  %v1495_v7 = vsel %vm1480_vm1, %v1473_v32, -inf  ;;  %v2296_v32 = vld [vmem:[%s6821_s9 + $0x678] sm:$0xff]  ;;  %4076 = vmatpush1.bf16.msra.mxu0 %v4075_v30  ;;  %v1713_v30 = vld [vmem:[%s6821_s9 + $0x1d0] sm:$0xff] }
 0x47f   : > { %v1483_v38 = vmax.f32 %v1481_v35, %v1482_v36  ;;  %v1489_v39 = vrot.slane %v1488_v56, 4  ;;  %v1496_v42 = vrot.slane %v1495_v7, 4  ;;  %v4077_v33 = vpack.c.bf16 %v2296_v32, %v2294_v31  ;;  %v1687_v35 = vld [vmem:[%s6821_s9 + $0x100] sm:$0xff]  ;;  %v1689_v36 = vld [vmem:[%s6821_s9 + $0x110] sm:$0xff] }
 0x480   : > { %v1502_v40 = vsel %vm1480_vm1, %v1475_v37, -inf  ;;  %v1692_v37 = vld [vmem:[%s6821_s9 + $0x128] sm:$0xff] }
 0x481   : > { %v1484_v41 = vrot.slane %v1483_v38, 2  ;;  %v1490_v43 = vmax.f32 %v1488_v56, %v1489_v39  ;;  %v1497_v44 = vmax.f32 %v1495_v7, %v1496_v42  ;;  %v1503_v45 = vrot.slane %v1502_v40, 4  ;;  %4078 = vmatprep.subr.bf16.mxu0 %v4077_v33  ;;  %v1694_v56 = vld [vmem:[%s6821_s9 + $0x138] sm:$0xff]  ;;  %v1691_v42 = vld [vmem:[%s6821_s9 + $0x120] sm:$0xff] }
 0x482   : > { %v3875_v7 = vpack.c.bf16 %v1689_v36, %v1687_v35  ;;  %v3877_v39 = vpack.c.bf16 %v1694_v56, %v1692_v37  ;;  %v2305_v33 = vld [vmem:[%s6821_s9 + $0x6c0] sm:$0xff]  ;;  %v2307_v35 = vld [vmem:[%s6821_s9 + $0x6d0] sm:$0xff]  ;;  %v1716_v37 = vld [vmem:[%s6821_s9 + $0x1e8] sm:$0xff] }
 0x483   : > { %v1485_v46 = vmax.f32 %v1483_v38, %v1484_v41  ;;  %v1491_v47 = vrot.slane %v1490_v43, 2  ;;  %v1498_v48 = vrot.slane %v1497_v44, 2  ;;  %v1504_v9 = vmax.f32 %v1502_v40, %v1503_v45  ;;  %v1693_v40 = vld [vmem:[%s6821_s9 + $0x130] sm:$0xff]  ;;  %v1718_v56 = vld [vmem:[%s6821_s9 + $0x1f8] sm:$0xff] }
 0x484   : > { %v3879_v45 = vpack.c.bf16 %v1693_v40, %v1691_v42  ;;  %v4091_v36 = vpack.c.bf16 %v2307_v35, %v2305_v33  ;;  %v1715_v42 = vld [vmem:[%s6821_s9 + $0x1e0] sm:$0xff]  ;;  %v1717_v40 = vld [vmem:[%s6821_s9 + $0x1f0] sm:$0xff]  ;;  %v1668_v35 = vld [vmem:[%s6821_s9 + $0x68] sm:$0xff] }
 0x485   : > { %v1486_v49 = vrot.slane %v1485_v46, 1  ;;  %v1492_v51 = vmax.f32 %v1490_v43, %v1491_v47  ;;  %v1499_v52 = vmax.f32 %v1497_v44, %v1498_v48  ;;  %v1505_v53 = vrot.slane %v1504_v9, 2  ;;  %v1696_v43 = vld [vmem:[%s6821_s9 + $0x148] sm:$0xff]  ;;  %v1698_v44 = vld [vmem:[%s6821_s9 + $0x158] sm:$0xff]  ;;  %v1695_v47 = vld [vmem:[%s6821_s9 + $0x140] sm:$0xff] }
 0x486   : > { %v1697_v48 = vld [vmem:[%s6821_s9 + $0x150] sm:$0xff] }
 0x487   : > { %v1493_v57 = vrot.slane %v1492_v51, 1  ;;  %v1500_v59 = vrot.slane %v1499_v52, 1  ;;  %v1506_v61 = vmax.f32 %v1504_v9, %v1505_v53  ;;  %v1487_v63 = vmax.f32 %v1485_v46, %v1486_v49  ;;  %v1700_v9 = vld [vmem:[%s6821_s9 + $0x168] sm:$0xff]  ;;  %v1702_v49 = vld [vmem:[%s6821_s9 + $0x178] sm:$0xff]  ;;  %v1699_v53 = vld [vmem:[%s6821_s9 + $0x160] sm:$0xff] }
 0x488   : > { %v3881_v46 = vpack.c.bf16 %v1698_v44, %v1696_v43  ;;  %v3887_v55 = vpack.c.bf16 %v1701_v54, %v1699_v53  ;;  %v3903_v43 = vpack.c.bf16 %v1717_v40, %v1715_v42  ;;  %v2309_v44 = vld [vmem:[%s6821_s9 + $0x6e0] sm:$0xff]  ;;  %v2396_v33 = vld [vmem:[%s6821_s9 + $0x750] sm:$0xff] }
 0x489   : > { %v1494_v4 = vmax.f32 %v1492_v51, %v1493_v57  ;;  %v1501_v10 = vmax.f32 %v1499_v52, %v1500_v59  ;;  %v1507_v5 = vrot.slane %v1506_v61, 1  ;;  %v3883_v51 = vpack.c.bf16 %v1697_v48, %v1695_v47  ;;  %v2295_v57 = vld [vmem:[%s6821_s9 + $0x670] sm:$0xff]  ;;  %v1656_v47 = vld [vmem:[%s6821_s9 + $0x8] sm:$0xff]  ;;  %v1658_v48 = vld [vmem:[%s6821_s9 + $0x18] sm:$0xff] }
 0x48a   : > { %v3885_v52 = vpack.c.bf16 %v1702_v49, %v1700_v9  ;;  %v4079_v59 = vpack.c.bf16 %v2295_v57, %v2293_v8  ;;  %v2387_v9 = vld [vmem:[%s6821_s9 + $0x708] sm:$0xff]  ;;  %v3905_v49 = vpack.c.bf16 %v1658_v48, %v1656_v47  ;;  %v3609_v53 = vld [vmem:[%s6820_s8] ss:$0 sm:$0xff]  ;;  %v1669_v42 = vld [vmem:[%s6821_s9 + $0x70] sm:$0xff] }
 0x48b   : > { %v1508_v27 = vmax.f32 %v1506_v61, %v1507_v5  ;;  %v1513_v14 = vsel %vm1056_vm6, %v1494_v4, %v1487_v63  ;;  %v1704_v61 = vld [vmem:[%s6821_s9 + $0x188] sm:$0xff]  ;;  %v2297_v5 = vld [vmem:[%s6821_s9 + $0x680] sm:$0xff]  ;;  %v2405_v48 = vld [vmem:[%s6821_s9 + $0x798] sm:$0xff] }
 0x48c   : > { %v1514_v17 = vsel %vm1044_vm11, %v1501_v10, %v1513_v14  ;;  %v2298_v63 = vld [vmem:[%s6821_s9 + $0x688] sm:$0xff]  ;;  %4080 = vmatpush1.bf16.msra.mxu0 %v4079_v59  ;;  %v3889_v0 = vpack.c.bf16 %v1706_v62, %v1704_v61  ;;  %v3891_v10 = vpack.c.bf16 %v1705_v3, %v1703_v2  ;;  %v4083_v11 = vpack.c.bf16 %v2299_v6, %v2297_v5  ;;  %v1657_v2 = vld [vmem:[%s6821_s9 + $0x10] sm:$0xff]  ;;  %v1662_v5 = vld [vmem:[%s6821_s9 + $0x38] sm:$0xff] }
 0x48d   : > { %v1515_v34 = vsel %vm1046_vm12, %v1508_v27, %v1514_v17  ;;  %v4081_v4 = vpack.c.bf16 %v2300_v1, %v2298_v63  ;;  %v2302_v27 = vld [vmem:[%s6821_s9 + $0x6a8] sm:$0xff]  ;;  %v3893_v14 = vpack.c.bf16 %v1710_v13, %v1708_v12  ;;  %v1709_v17 = vld [vmem:[%s6821_s9 + $0x1b0] sm:$0xff]  ;;  %v1655_v1 = vld [vmem:[%s6821_s9] sm:$0xff] }
 0x48e   : > { %v1517_v24 = vsel %vm1345_vm9, 0.0, %v1515_v34  ;;  %v4085_v19 = vpack.c.bf16 %v2304_v15, %v2302_v27  ;;  %v3895_v20 = vpack.c.bf16 %v1709_v17, %v1707_v16  ;;  %v2303_v34 = vld [vmem:[%s6821_s9 + $0x6b0] sm:$0xff]  ;;  %v2391_v6 = vld [vmem:[%s6821_s9 + $0x728] sm:$0xff]  ;;  %v3907_v13 = vpack.c.bf16 %v1657_v2, %v1655_v1  ;;  %v1675_v2 = vld [vmem:[%s6821_s9 + $0xa0] sm:$0xff] }
 0x48f   : > { %v1518_v25 = vsel %vm622_vm3, %v1517_v24, 0.0  ;;  %4082 = vmatprep.subr.bf16.mxu0 %v4081_v4  ;;  %v4087_v23 = vpack.c.bf16 %v2303_v34, %v2301_v21  ;;  %v1712_v24 = vld [vmem:[%s6821_s9 + $0x1c8] sm:$0xff]  ;;  %v2388_v4 = vld [vmem:[%s6821_s9 + $0x710] sm:$0xff] }
 0x490   : > { %v1524_v50 = vrot.slane %v1518_v25, 2  ;;  %v1520_v29 = vrot.slane %v1518_v25, 1  ;;  %4084 = vmatpush1.bf16.msra.mxu0 %v4083_v11  ;;  %v2393_v11 = vld [vmem:[%s6821_s9 + $0x738] sm:$0xff]  ;;  %v1661_v15 = vld [vmem:[%s6821_s9 + $0x30] sm:$0xff]  ;;  %v1664_v34 = vld [vmem:[%s6821_s9 + $0x48] sm:$0xff] }
 0x491   : > { %4086 = vmatprep.subr.bf16.mxu0 %v4085_v19  ;;  %v4101_v19 = vpack.c.bf16 %v2393_v11, %v2391_v6  ;;  %v2392_v21 = vld [vmem:[%s6821_s9 + $0x730] sm:$0xff]  ;;  %v2403_v47 = vld [vmem:[%s6821_s9 + $0x788] sm:$0xff]  ;;  %v1682_v11 = vld [vmem:[%s6821_s9 + $0xd8] sm:$0xff] }
 0x492   : > { %3610 = vmatprep.mubr.msk.f32.mxu1 %vm1124_vm10, %v1524_v50  ;;  %1521 = vrot.lane.b32.xlu0 %v1520_v29, %s4506_s28  ;;  %v2308_v50 = vld [vmem:[%s6821_s9 + $0x6d8] sm:$0xff]  ;;  %v1711_v29 = vld [vmem:[%s6821_s9 + $0x1c0] sm:$0xff]  ;;  %v1680_v6 = vld [vmem:[%s6821_s9 + $0xc8] sm:$0xff] }
 0x493   : > { %v4089_v31 = vpack.c.bf16 %v2308_v50, %v2306_v26  ;;  %v3899_v32 = vpack.c.bf16 %v1713_v30, %v1711_v29  ;;  %v1663_v50 = vld [vmem:[%s6821_s9 + $0x40] sm:$0xff]  ;;  %v1665_v29 = vld [vmem:[%s6821_s9 + $0x50] sm:$0xff] }
 0x494   : > { %4088 = vmatpush1.bf16.msra.mxu0 %v4087_v23  ;;  %v1666_v23 = vld [vmem:[%s6821_s9 + $0x58] sm:$0xff] }
 0x495   : > { %4090 = vmatprep.subr.bf16.mxu0 %v4089_v31  ;;  %v3913_v30 = vpack.c.bf16 %v1666_v23, %v1664_v34  ;;  %v2412_v34 = vld [vmem:[%s6821_s9 + $0x7d0] sm:$0xff]  ;;  %v1684_v23 = vld [vmem:[%s6821_s9 + $0xe8] sm:$0xff] }
 0x498   : > { %4092 = vmatpush1.bf16.msra.mxu0 %v4091_v36  ;;  %v1670_v36 = vld [vmem:[%s6821_s9 + $0x78] sm:$0xff] }
 0x499   : > { %v3917_v40 = vpack.c.bf16 %v1670_v36, %v1668_v35  ;;  %v2416_v35 = vld [vmem:[%s6821_s9 + $0x7f0] sm:$0xff]  ;;  %v1862_v36 = vld [vmem:[%s6821_s9 + $0x208] sm:$0xff] }
 0x504   : > { %v1522_v38 = vpop.permute.xlu0 %1521 }
 0x505   : > { %v1525_v41 = vsel %vm1124_vm10, %v1518_v25, %v1522_v38  ;;  %v1714_v25 = vld [vmem:[%s6821_s9 + $0x1d8] sm:$0xff]  ;;  %v3901_v38 = vpack.c.bf16 %v1718_v56, %v1716_v37  ;;  %v2399_v37 = vld [vmem:[%s6821_s9 + $0x768] sm:$0xff] }
 0x506   : > { %1624 = vmatmul.mubr.f32.vlgmr.msra.gmra.mrb[10].mxu1 %v1525_v41  ;;  %v3897_v28 = vpack.c.bf16 %v1714_v25, %v1712_v24  ;;  %v2395_v24 = vld [vmem:[%s6821_s9 + $0x748] sm:$0xff]  ;;  %v2397_v25 = vld [vmem:[%s6821_s9 + $0x758] sm:$0xff] }
 0x507   : > { %3876 = vmatpush1.bf16.msra.mxu1 %v3875_v7  ;;  %1783 = vmatprep.mubr.f32.mxu1 %v4510_v58  ;;  %v2310_v7 = vld [vmem:[%s6821_s9 + $0x6e8] sm:$0xff]  ;;  %v4105_v31 = vpack.c.bf16 %v2397_v25, %v2395_v24  ;;  %v2401_v56 = vld [vmem:[%s6821_s9 + $0x778] sm:$0xff] }
 0x508   : > { %3878 = vmatprep.subr.bf16.mxu1 %v3877_v39  ;;  %v2312_v39 = vld [vmem:[%s6821_s9 + $0x6f8] sm:$0xff]  ;;  %v2415_v25 = vld [vmem:[%s6821_s9 + $0x7e8] sm:$0xff] }
 0x509   : > { %v4093_v41 = vpack.c.bf16 %v2312_v39, %v2310_v7  ;;  %v3915_v7 = vpack.c.bf16 %v1665_v29, %v1663_v50  ;;  %v1667_v39 = vld [vmem:[%s6821_s9 + $0x60] sm:$0xff]  ;;  %v1686_v24 = vld [vmem:[%s6821_s9 + $0xf8] sm:$0xff] }
 0x50a   : > { %v1683_v29 = vld [vmem:[%s6821_s9 + $0xe0] sm:$0xff] }
 0x50b   : > { %3880 = vmatpush1.bf16.msra.mxu1 %v3879_v45  ;;  %v2311_v45 = vld [vmem:[%s6821_s9 + $0x6f0] sm:$0xff]  ;;  %4094 = vmatprep.subr.bf16.mxu0 %v4093_v41  ;;  %v4109_v41 = vpack.c.bf16 %v2401_v56, %v2399_v37  ;;  %v1864_v37 = vld [vmem:[%s6821_s9 + $0x218] sm:$0xff]  ;;  %v2492_v56 = vld [vmem:[%s6821_s9 + $0x808] sm:$0xff] }
 0x50c   : > { %3882 = vmatprep.subr.bf16.mxu1 %v3881_v46  ;;  %v4095_v46 = vpack.c.bf16 %v2311_v45, %v2309_v44  ;;  %v2400_v44 = vld [vmem:[%s6821_s9 + $0x770] sm:$0xff]  ;;  %v1672_v45 = vld [vmem:[%s6821_s9 + $0x88] sm:$0xff] }
 0x50e   : > { %4096 = vmatpush1.bf16.msra.mxu0 %v4095_v46  ;;  %v1674_v46 = vld [vmem:[%s6821_s9 + $0x98] sm:$0xff] }
 0x50f   : > { %3884 = vmatpush1.bf16.msra.mxu1 %v3883_v51  ;;  %v2389_v51 = vld [vmem:[%s6821_s9 + $0x718] sm:$0xff] }
 0x510   : > { %3886 = vmatprep.subr.bf16.mxu1 %v3885_v52  ;;  %v4097_v52 = vpack.c.bf16 %v2389_v51, %v2387_v9  ;;  %v3919_v9 = vpack.c.bf16 %v1669_v42, %v1667_v39  ;;  %v1671_v51 = vld [vmem:[%s6821_s9 + $0x80] sm:$0xff] }
 0x511   : > { %v1861_v42 = vld [vmem:[%s6821_s9 + $0x200] sm:$0xff] }
 0x512   : > { %4098 = vmatprep.subr.bf16.mxu0 %v4097_v52  ;;  %v1673_v52 = vld [vmem:[%s6821_s9 + $0x90] sm:$0xff] }
 0x513   : > { %3888 = vmatpush1.bf16.msra.mxu1 %v3887_v55 }
 0x514   : > { %3890 = vmatprep.subr.bf16.mxu1 %v3889_v0 }
 0x517   : > { %3892 = vmatpush1.bf16.msra.mxu1 %v3891_v10  ;;  %v1660_v10 = vld [vmem:[%s6821_s9 + $0x28] sm:$0xff] }
 0x518   : > { %3894 = vmatprep.subr.bf16.mxu1 %v3893_v14  ;;  %v1659_v14 = vld [vmem:[%s6821_s9 + $0x20] sm:$0xff]  ;;  %v3909_v17 = vpack.c.bf16 %v1662_v5, %v1660_v10  ;;  %v2408_v5 = vld [vmem:[%s6821_s9 + $0x7b0] sm:$0xff] }
 0x519   : > { %v3911_v26 = vpack.c.bf16 %v1661_v15, %v1659_v14  ;;  %v2406_v10 = vld [vmem:[%s6821_s9 + $0x7a0] sm:$0xff] }
 0x51a   : > { %v4119_v14 = vpack.c.bf16 %v2408_v5, %v2406_v10  ;;  %v1679_v15 = vld [vmem:[%s6821_s9 + $0xc0] sm:$0xff] }
 0x51b   : > { %3896 = vmatpush1.bf16.msra.mxu1 %v3895_v20  ;;  %v2390_v20 = vld [vmem:[%s6821_s9 + $0x720] sm:$0xff] }
 0x51c   : > { %3898 = vmatprep.subr.bf16.mxu1 %v3897_v28  ;;  %v4103_v28 = vpack.c.bf16 %v2392_v21, %v2390_v20  ;;  %v2410_v21 = vld [vmem:[%s6821_s9 + $0x7c0] sm:$0xff] }
 0x51d   : > { %v4123_v50 = vpack.c.bf16 %v2412_v34, %v2410_v21  ;;  %v2499_v5 = vld [vmem:[%s6821_s9 + $0x840] sm:$0xff] }
 0x51e   : > { %v2503_v34 = vld [vmem:[%s6821_s9 + $0x860] sm:$0xff] }
 0x51f   : > { %3900 = vmatpush1.bf16.msra.mxu1 %v3899_v32  ;;  %v2394_v32 = vld [vmem:[%s6821_s9 + $0x740] sm:$0xff] }
 0x520   : > { %3902 = vmatprep.subr.bf16.mxu1 %v3901_v38  ;;  %v4107_v38 = vpack.c.bf16 %v2396_v33, %v2394_v32  ;;  %v2414_v33 = vld [vmem:[%s6821_s9 + $0x7e0] sm:$0xff] }
 0x521   : > { %v4127_v39 = vpack.c.bf16 %v2416_v35, %v2414_v33 }
 0x523   : > { %3904 = vmatpush1.bf16.msra.mxu1 %v3903_v43  ;;  %v2398_v43 = vld [vmem:[%s6821_s9 + $0x760] sm:$0xff] }
 0x524   : > { %3906 = vmatprep.subr.bf16.mxu1 %v3905_v49  ;;  %v4111_v49 = vpack.c.bf16 %v2400_v44, %v2398_v43  ;;  %v2491_v44 = vld [vmem:[%s6821_s9 + $0x800] sm:$0xff] }
 0x5d9   : > { %v1625_v54 = vpop.f32.mrb[10].mxu1 }
 0x5da   : > { %v1626_v8 = vadd.f32 %v3609_v53, %v1625_v54  ;;  %v1627_v55 = vpop.f32.mrb[11].mxu1  ;;  %v3921_v53 = vpack.c.bf16 %v1674_v46, %v1672_v45  ;;  %v4113_v54 = vpack.c.bf16 %v2405_v48, %v2403_v47  ;;  %v2493_v45 = vld [vmem:[%s6821_s9 + $0x810] sm:$0xff]  ;;  %v1866_v46 = vld [vmem:[%s6821_s9 + $0x228] sm:$0xff]  ;;  %v1868_v47 = vld [vmem:[%s6821_s9 + $0x238] sm:$0xff] }
 0x5db   : > { %v2404_v55 = vld [vmem:[%s6821_s9 + $0x790] sm:$0xff]  ;;  %v2496_v48 = vld [vmem:[%s6821_s9 + $0x828] sm:$0xff] }
 0x5dc   : > { %v1629_v57 = vmax.f32 %v1626_v8, 0.0  ;;  %v2402_v8 = vld [vmem:[%s6821_s9 + $0x780] sm:$0xff] }
 0x5dd   : > { %v4115_v1 = vpack.c.bf16 %v2404_v55, %v2402_v8  ;;  %v2495_v55 = vld [vmem:[%s6821_s9 + $0x820] sm:$0xff] }
 0x5de   : > { %v5270_v59 = vrot.slane %v1629_v57, %v4934_v22  ;;  %v2386_v22 = vld [vmem:[%s6821_s9 + $0x700] sm:$0xff]  ;;  %v1676_v57 = vld [vmem:[%s6821_s9 + $0xa8] sm:$0xff] }
 0x5df   : > { %v4099_v27 = vpack.c.bf16 %v2388_v4, %v2386_v22 }
 0x5e0   : > { %v1641_v61 = vsel %vm509_vm0, %v5270_v59, -inf }
 0x5e1   : > { %v1642_v62 = vrot.slane %v1641_v61, 4 }
 0x5e3   : > { %v1643_v63 = vmax.f32 %v1641_v61, %v1642_v62  ;;  %v1678_v61 = vld [vmem:[%s6821_s9 + $0xb8] sm:$0xff]  ;;  %v2407_v62 = vld [vmem:[%s6821_s9 + $0x7a8] sm:$0xff] }
 0x5e4   : > { %v3925_v22 = vpack.c.bf16 %v1678_v61, %v1676_v57  ;;  %v2497_v57 = vld [vmem:[%s6821_s9 + $0x830] sm:$0xff]  ;;  %v1870_v61 = vld [vmem:[%s6821_s9 + $0x248] sm:$0xff] }
 0x5e5   : > { %v1644_v0 = vrot.slane %v1643_v63, 2 }
 0x5e7   : > { %v1645_v3 = vmax.f32 %v1643_v63, %v1644_v0  ;;  %v2409_v63 = vld [vmem:[%s6821_s9 + $0x7b8] sm:$0xff]  ;;  %v3923_v0 = vpack.c.bf16 %v1673_v52, %v1671_v51  ;;  %v4131_v51 = vpack.c.bf16 %v2493_v45, %v2491_v44  ;;  %v1865_v52 = vld [vmem:[%s6821_s9 + $0x220] sm:$0xff]  ;;  %v1883_v44 = vld [vmem:[%s6821_s9 + $0x2b0] sm:$0xff] }
 0x5e8   : > { %v4117_v4 = vpack.c.bf16 %v2409_v63, %v2407_v62  ;;  %v1872_v62 = vld [vmem:[%s6821_s9 + $0x258] sm:$0xff]  ;;  %v2500_v63 = vld [vmem:[%s6821_s9 + $0x848] sm:$0xff] }
 0x5e9   : > { %v1646_v12 = vrot.slane %v1645_v3, 1 }
 0x5eb   : > { %v5304_v16 = vmax.f32 %v1645_v3, %v1646_v12  ;;  %v1677_v3 = vld [vmem:[%s6821_s9 + $0xb0] sm:$0xff]  ;;  %v2411_v12 = vld [vmem:[%s6821_s9 + $0x7c8] sm:$0xff] }
 0x5ed   : > { %1784 = vmatmul.mubr.f32.vlgmr.msra.gmra.mrb[12].mxu1 %v5304_v16  ;;  %2378 = vmatmul.mubr.f32.vlgmr.msra.gmra.mrb[2].mxu0 %v5304_v16 }
 0x5ee   : > { %3908 = vmatpush1.bf16.msra.mxu1 %v3907_v13  ;;  %4100 = vmatpush1.bf16.msra.mxu0 %v4099_v27  ;;  %v2413_v13 = vld [vmem:[%s6821_s9 + $0x7d8] sm:$0xff]  ;;  %v3927_v27 = vpack.c.bf16 %v1677_v3, %v1675_v2  ;;  %v4135_v2 = vpack.c.bf16 %v2497_v57, %v2495_v55  ;;  %v1869_v3 = vld [vmem:[%s6821_s9 + $0x240] sm:$0xff]  ;;  %v1887_v57 = vld [vmem:[%s6821_s9 + $0x2d0] sm:$0xff] }
 0x5ef   : > { %3910 = vmatprep.subr.bf16.mxu1 %v3909_v17  ;;  %4102 = vmatprep.subr.bf16.mxu0 %v4101_v19  ;;  %v1681_v17 = vld [vmem:[%s6821_s9 + $0xd0] sm:$0xff]  ;;  %v3929_v19 = vpack.c.bf16 %v1682_v11, %v1680_v6  ;;  %v4121_v20 = vpack.c.bf16 %v2413_v13, %v2411_v12  ;;  %v1874_v11 = vld [vmem:[%s6821_s9 + $0x268] sm:$0xff]  ;;  %v1638_v12 = vcombine.high %v5270_v59, %v5270_v59  ;;  %v1876_v13 = vld [vmem:[%s6821_s9 + $0x278] sm:$0xff] }
 0x5f0   : > { %1854 = vmatprep.mubr.f32.mxu1 %v4510_v58  ;;  %2482 = vmatprep.mubr.f32.mxu0 %v4510_v58  ;;  %v2501_v6 = vld [vmem:[%s6821_s9 + $0x850] sm:$0xff]  ;;  %v1885_v55 = vld [vmem:[%s6821_s9 + $0x2c0] sm:$0xff] }
 0x5f1   : > { %v4139_v59 = vpack.c.bf16 %v2501_v6, %v2499_v5  ;;  %v1889_v6 = vld [vmem:[%s6821_s9 + $0x2e0] sm:$0xff] }
 0x5f2   : > { %3912 = vmatpush1.bf16.msra.mxu1 %v3911_v26  ;;  %4104 = vmatpush1.bf16.msra.mxu0 %v4103_v28  ;;  %v2417_v26 = vld [vmem:[%s6821_s9 + $0x7f8] sm:$0xff]  ;;  %v3931_v28 = vpack.c.bf16 %v1681_v17, %v1679_v15  ;;  %v1873_v17 = vld [vmem:[%s6821_s9 + $0x260] sm:$0xff] }
 0x5f3   : > { %3914 = vmatprep.subr.bf16.mxu1 %v3913_v30  ;;  %4106 = vmatprep.subr.bf16.mxu0 %v4105_v31  ;;  %v1685_v30 = vld [vmem:[%s6821_s9 + $0xf0] sm:$0xff]  ;;  %v3933_v31 = vpack.c.bf16 %v1686_v24, %v1684_v23  ;;  %v4125_v32 = vpack.c.bf16 %v2417_v26, %v2415_v25  ;;  %v1878_v24 = vld [vmem:[%s6821_s9 + $0x288] sm:$0xff]  ;;  %v1648_v25 = vsel %vm509_vm0, %v1638_v12, -inf  ;;  %v1880_v26 = vld [vmem:[%s6821_s9 + $0x298] sm:$0xff]  ;;  %vm3538_vm0 = vcmask 0  }
 0x5f4   : > { %v2505_v23 = vld [vmem:[%s6821_s9 + $0x870] sm:$0xff]  ;;  %v1649_v33 = vrot.slane %v1648_v25, 4  ;;  %v3953_v35 = vpack.c.bf16 %v1880_v26, %v1878_v24 }
 0x5f5   : > { %v1968_v24 = vld [vmem:[%s6821_s9 + $0x310] sm:$0xff] }
 0x5f6   : > { %3916 = vmatpush1.bf16.msra.mxu1 %v3915_v7  ;;  %4108 = vmatpush1.bf16.msra.mxu0 %v4107_v38  ;;  %v2494_v7 = vld [vmem:[%s6821_s9 + $0x818] sm:$0xff]  ;;  %v3935_v38 = vpack.c.bf16 %v1685_v30, %v1683_v29  ;;  %v4143_v30 = vpack.c.bf16 %v2505_v23, %v2503_v34  ;;  %v1650_v45 = vmax.f32 %v1648_v25, %v1649_v33  ;;  %v1966_v23 = vld [vmem:[%s6821_s9 + $0x300] sm:$0xff] }
 0x5f7   : > { %3918 = vmatprep.subr.bf16.mxu1 %v3917_v40  ;;  %4110 = vmatprep.subr.bf16.mxu0 %v4109_v41  ;;  %v1863_v40 = vld [vmem:[%s6821_s9 + $0x210] sm:$0xff]  ;;  %v3937_v41 = vpack.c.bf16 %v1864_v37, %v1862_v36  ;;  %v4129_v43 = vpack.c.bf16 %v2494_v7, %v2492_v56  ;;  %v2507_v37 = vld [vmem:[%s6821_s9 + $0x880] sm:$0xff]  ;;  %v1882_v7 = vld [vmem:[%s6821_s9 + $0x2a8] sm:$0xff] }
 0x5f8   : > { %v2509_v56 = vld [vmem:[%s6821_s9 + $0x890] sm:$0xff]  ;;  %v2603_v33 = vld [vmem:[%s6821_s9 + $0x938] sm:$0xff] }
 0x5fa   : > { %3920 = vmatpush1.bf16.msra.mxu1 %v3919_v9  ;;  %4112 = vmatpush1.bf16.msra.mxu0 %v4111_v49  ;;  %v2498_v9 = vld [vmem:[%s6821_s9 + $0x838] sm:$0xff]  ;;  %v3939_v49 = vpack.c.bf16 %v1863_v40, %v1861_v42 }
 0x5fb   : > { %3922 = vmatprep.subr.bf16.mxu1 %v3921_v53  ;;  %4114 = vmatprep.subr.bf16.mxu0 %v4113_v54  ;;  %v1867_v53 = vld [vmem:[%s6821_s9 + $0x230] sm:$0xff]  ;;  %v3941_v54 = vpack.c.bf16 %v1868_v47, %v1866_v46  ;;  %v4133_v8 = vpack.c.bf16 %v2498_v9, %v2496_v48  ;;  %v2514_v42 = vld [vmem:[%s6821_s9 + $0x8b8] sm:$0xff]  ;;  %v2511_v48 = vld [vmem:[%s6821_s9 + $0x8a0] sm:$0xff] }
 0x5fc   : > { %v2513_v9 = vld [vmem:[%s6821_s9 + $0x8b0] sm:$0xff] }
 0x5fe   : > { %3924 = vmatpush1.bf16.msra.mxu1 %v3923_v0  ;;  %4116 = vmatpush1.bf16.msra.mxu0 %v4115_v1  ;;  %v2502_v0 = vld [vmem:[%s6821_s9 + $0x858] sm:$0xff]  ;;  %v3943_v1 = vpack.c.bf16 %v1867_v53, %v1865_v52  ;;  %v2516_v52 = vld [vmem:[%s6821_s9 + $0x8c8] sm:$0xff] }
 0x5ff   : > { %3926 = vmatprep.subr.bf16.mxu1 %v3925_v22  ;;  %4118 = vmatprep.subr.bf16.mxu0 %v4117_v4  ;;  %v1871_v22 = vld [vmem:[%s6821_s9 + $0x250] sm:$0xff]  ;;  %v3945_v4 = vpack.c.bf16 %v1872_v62, %v1870_v61  ;;  %v4137_v10 = vpack.c.bf16 %v2502_v0, %v2500_v63  ;;  %v2518_v53 = vld [vmem:[%s6821_s9 + $0x8d8] sm:$0xff]  ;;  %v1651_v61 = vrot.slane %v1650_v45, 2  ;;  %v2515_v0 = vld [vmem:[%s6821_s9 + $0x8c0] sm:$0xff] }
 0x600   : > { %v3947_v15 = vpack.c.bf16 %v1871_v22, %v1869_v3  ;;  %v4153_v63 = vpack.c.bf16 %v2518_v53, %v2516_v52  ;;  %v1892_v3 = vld [vmem:[%s6821_s9 + $0x2f8] sm:$0xff]  ;;  %v2520_v22 = vld [vmem:[%s6821_s9 + $0x8e8] sm:$0xff]  ;;  %v2604_v52 = vld [vmem:[%s6821_s9 + $0x940] sm:$0xff] }
 0x601   : > { %v1652_v12 = vmax.f32 %v1650_v45, %v1651_v61  ;;  %v2607_v45 = vld [vmem:[%s6821_s9 + $0x958] sm:$0xff]  ;;  %v2606_v53 = vld [vmem:[%s6821_s9 + $0x950] sm:$0xff] }
 0x602   : > { %3928 = vmatpush1.bf16.msra.mxu1 %v3927_v27  ;;  %4120 = vmatpush1.bf16.msra.mxu0 %v4119_v14  ;;  %v2504_v27 = vld [vmem:[%s6821_s9 + $0x868] sm:$0xff]  ;;  %v2506_v14 = vld [vmem:[%s6821_s9 + $0x878] sm:$0xff] }
 0x603   : > { %3930 = vmatprep.subr.bf16.mxu1 %v3929_v19  ;;  %4122 = vmatprep.subr.bf16.mxu0 %v4121_v20  ;;  %v1875_v19 = vld [vmem:[%s6821_s9 + $0x270] sm:$0xff]  ;;  %v3949_v20 = vpack.c.bf16 %v1876_v13, %v1874_v11  ;;  %v4141_v21 = vpack.c.bf16 %v2506_v14, %v2504_v27  ;;  %v2519_v14 = vld [vmem:[%s6821_s9 + $0x8e0] sm:$0xff]  ;;  %v1653_v25 = vrot.slane %v1652_v12, 1 }
 0x604   : > { %v3951_v29 = vpack.c.bf16 %v1875_v19, %v1873_v17  ;;  %v1891_v11 = vld [vmem:[%s6821_s9 + $0x2f0] sm:$0xff]  ;;  %v1969_v17 = vld [vmem:[%s6821_s9 + $0x318] sm:$0xff]  ;;  %v2597_v19 = vld [vmem:[%s6821_s9 + $0x908] sm:$0xff] }
 0x606   : > { %3932 = vmatpush1.bf16.msra.mxu1 %v3931_v28  ;;  %4124 = vmatpush1.bf16.msra.mxu0 %v4123_v50  ;;  %v2508_v28 = vld [vmem:[%s6821_s9 + $0x888] sm:$0xff]  ;;  %v2510_v50 = vld [vmem:[%s6821_s9 + $0x898] sm:$0xff] }
 0x607   : > { %3934 = vmatprep.subr.bf16.mxu1 %v3933_v31  ;;  %4126 = vmatprep.subr.bf16.mxu0 %v4125_v32  ;;  %v1877_v31 = vld [vmem:[%s6821_s9 + $0x280] sm:$0xff]  ;;  %v1879_v32 = vld [vmem:[%s6821_s9 + $0x290] sm:$0xff]  ;;  %v4145_v36 = vpack.c.bf16 %v2510_v50, %v2508_v28 }
 0x608   : > { %v3955_v40 = vpack.c.bf16 %v1879_v32, %v1877_v31  ;;  %v2596_v50 = vld [vmem:[%s6821_s9 + $0x900] sm:$0xff]  ;;  %v1973_v31 = vld [vmem:[%s6821_s9 + $0x338] sm:$0xff]  ;;  %v2601_v32 = vld [vmem:[%s6821_s9 + $0x928] sm:$0xff] }
 0x60a   : > { %3936 = vmatpush1.bf16.msra.mxu1 %v3935_v38  ;;  %4128 = vmatpush1.bf16.msra.mxu0 %v4127_v39  ;;  %v1884_v38 = vld [vmem:[%s6821_s9 + $0x2b8] sm:$0xff]  ;;  %v2512_v39 = vld [vmem:[%s6821_s9 + $0x8a8] sm:$0xff] }
 0x60b   : > { %3938 = vmatprep.subr.bf16.mxu1 %v3937_v41  ;;  %4130 = vmatprep.subr.bf16.mxu0 %v4129_v43  ;;  %v4147_v41 = vpack.c.bf16 %v2509_v56, %v2507_v37  ;;  %v1881_v43 = vld [vmem:[%s6821_s9 + $0x2a0] sm:$0xff]  ;;  %v3957_v46 = vpack.c.bf16 %v1884_v38, %v1882_v7  ;;  %v4149_v47 = vpack.c.bf16 %v2514_v42, %v2512_v39  ;;  %v1972_v56 = vld [vmem:[%s6821_s9 + $0x330] sm:$0xff] }
 0x60c   : > { %v1970_v37 = vld [vmem:[%s6821_s9 + $0x320] sm:$0xff]  ;;  %v5701_v7 = vmax.f32 %v1652_v12, %v1653_v25  ;;  %v4165_v39 = vpack.c.bf16 %v2603_v33, %v2601_v32  ;;  %v1993_v32 = vld [vmem:[%s6821_s9 + $0x3d8] sm:$0xff]  ;;  %v2621_v33 = vld [vmem:[%s6821_s9 + $0x9c8] sm:$0xff] }
 0x60d   : > { %1855 = vmatmul.mubr.f32.vlgmr.msra.gmra.mrb[12].mxu1 %v5304_v16  ;;  %2483 = vmatmul.mubr.f32.vlgmr.msra.gmra.mrb[2].mxu0 %v5304_v16  ;;  %v2600_v42 = vld [vmem:[%s6821_s9 + $0x920] sm:$0xff] }
 0x60e   : > { %3940 = vmatpush1.bf16.msra.mxu1 %v3939_v49  ;;  %4132 = vmatpush1.bf16.msra.mxu0 %v4131_v51  ;;  %v1886_v49 = vld [vmem:[%s6821_s9 + $0x2c8] sm:$0xff]  ;;  %v1888_v51 = vld [vmem:[%s6821_s9 + $0x2d8] sm:$0xff]  ;;  %v1986_v25 = vld [vmem:[%s6821_s9 + $0x3a0] sm:$0xff] }
 0x60f   : > { %3942 = vmatprep.subr.bf16.mxu1 %v3941_v54  ;;  %4134 = vmatprep.subr.bf16.mxu0 %v4133_v8  ;;  %v3959_v54 = vpack.c.bf16 %v1883_v44, %v1881_v43  ;;  %v4151_v8 = vpack.c.bf16 %v2513_v9, %v2511_v48  ;;  %v3961_v62 = vpack.c.bf16 %v1888_v51, %v1886_v49  ;;  %v1977_v43 = vld [vmem:[%s6821_s9 + $0x358] sm:$0xff]  ;;  %v2605_v44 = vld [vmem:[%s6821_s9 + $0x948] sm:$0xff]  ;;  %v1974_v48 = vld [vmem:[%s6821_s9 + $0x340] sm:$0xff] }
 0x610   : > { %1957 = vmatprep.mubr.f32.mxu1 %v4510_v58  ;;  %2587 = vmatprep.mubr.f32.mxu0 %v4510_v58  ;;  %v1976_v9 = vld [vmem:[%s6821_s9 + $0x350] sm:$0xff]  ;;  %v4169_v51 = vpack.c.bf16 %v2607_v45, %v2605_v44  ;;  %v1997_v44 = vld [vmem:[%s6821_s9 + $0x3f8] sm:$0xff]  ;;  %v2625_v45 = vld [vmem:[%s6821_s9 + $0x9e8] sm:$0xff] }
 0x611   : > { %v3979_v61 = vpack.c.bf16 %v1976_v9, %v1974_v48  ;;  %v1994_v9 = vld [vmem:[%s6821_s9 + $0x3e0] sm:$0xff] }
 0x612   : > { %3944 = vmatpush1.bf16.msra.mxu1 %v3943_v1  ;;  %4136 = vmatpush1.bf16.msra.mxu0 %v4135_v2  ;;  %v2517_v1 = vld [vmem:[%s6821_s9 + $0x8d0] sm:$0xff]  ;;  %v1890_v2 = vld [vmem:[%s6821_s9 + $0x2e8] sm:$0xff] }
 0x613   : > { %3946 = vmatprep.subr.bf16.mxu1 %v3945_v4  ;;  %4138 = vmatprep.subr.bf16.mxu0 %v4137_v10  ;;  %v2522_v4 = vld [vmem:[%s6821_s9 + $0x8f8] sm:$0xff]  ;;  %v3963_v10 = vpack.c.bf16 %v1887_v57, %v1885_v55  ;;  %v4155_v5 = vpack.c.bf16 %v2517_v1, %v2515_v0  ;;  %v3965_v13 = vpack.c.bf16 %v1892_v3, %v1890_v2  ;;  %v2609_v55 = vld [vmem:[%s6821_s9 + $0x968] sm:$0xff]  ;;  %v1980_v0 = vld [vmem:[%s6821_s9 + $0x370] sm:$0xff] }
 0x614   : > { %v4157_v27 = vpack.c.bf16 %v2522_v4, %v2520_v22  ;;  %v2611_v57 = vld [vmem:[%s6821_s9 + $0x978] sm:$0xff]  ;;  %v2608_v3 = vld [vmem:[%s6821_s9 + $0x960] sm:$0xff]  ;;  %v2610_v22 = vld [vmem:[%s6821_s9 + $0x970] sm:$0xff] }
 0x615   : > { %v4173_v2 = vpack.c.bf16 %v2611_v57, %v2609_v55  ;;  %v1983_v4 = vld [vmem:[%s6821_s9 + $0x388] sm:$0xff]  ;;  %v4175_v12 = vpack.c.bf16 %v2610_v22, %v2608_v3  ;;  %v2074_v55 = vld [vmem:[%s6821_s9 + $0x418] sm:$0xff]  ;;  %v2701_v22 = vld [vmem:[%s6821_s9 + $0xa00] sm:$0xff] }
 0x616   : > { %3948 = vmatpush1.bf16.msra.mxu1 %v3947_v15  ;;  %4140 = vmatpush1.bf16.msra.mxu0 %v4139_v59  ;;  %v2521_v15 = vld [vmem:[%s6821_s9 + $0x8f0] sm:$0xff]  ;;  %v1967_v59 = vld [vmem:[%s6821_s9 + $0x308] sm:$0xff] }
 0x617   : > { %3950 = vmatprep.subr.bf16.mxu1 %v3949_v20  ;;  %4142 = vmatprep.subr.bf16.mxu0 %v4141_v21  ;;  %v2599_v20 = vld [vmem:[%s6821_s9 + $0x918] sm:$0xff]  ;;  %v3967_v21 = vpack.c.bf16 %v1891_v11, %v1889_v6  ;;  %v4159_v34 = vpack.c.bf16 %v2521_v15, %v2519_v14  ;;  %v3969_v26 = vpack.c.bf16 %v1969_v17, %v1967_v59  ;;  %v2612_v59 = vld [vmem:[%s6821_s9 + $0x980] sm:$0xff]  ;;  %v2614_v17 = vld [vmem:[%s6821_s9 + $0x990] sm:$0xff] }
 0x618   : > { %v4161_v28 = vpack.c.bf16 %v2599_v20, %v2597_v19  ;;  %v2615_v6 = vld [vmem:[%s6821_s9 + $0x998] sm:$0xff]  ;;  %v1987_v19 = vld [vmem:[%s6821_s9 + $0x3a8] sm:$0xff] }
 0x619   : > { %v1989_v20 = vld [vmem:[%s6821_s9 + $0x3b8] sm:$0xff]  ;;  %v2702_v57 = vld [vmem:[%s6821_s9 + $0xa08] sm:$0xff] }
 0x61a   : > { %3952 = vmatpush1.bf16.msra.mxu1 %v3951_v29  ;;  %4144 = vmatpush1.bf16.msra.mxu0 %v4143_v30  ;;  %v2598_v29 = vld [vmem:[%s6821_s9 + $0x910] sm:$0xff]  ;;  %v1971_v30 = vld [vmem:[%s6821_s9 + $0x328] sm:$0xff] }
 0x61b   : > { %3954 = vmatprep.subr.bf16.mxu1 %v3953_v35  ;;  %4146 = vmatprep.subr.bf16.mxu0 %v4145_v36  ;;  %v3971_v35 = vpack.c.bf16 %v1968_v24, %v1966_v23  ;;  %v4163_v36 = vpack.c.bf16 %v2598_v29, %v2596_v50  ;;  %v3973_v38 = vpack.c.bf16 %v1973_v31, %v1971_v30  ;;  %v2616_v29 = vld [vmem:[%s6821_s9 + $0x9a0] sm:$0xff]  ;;  %v2618_v30 = vld [vmem:[%s6821_s9 + $0x9b0] sm:$0xff]  ;;  %v1991_v31 = vld [vmem:[%s6821_s9 + $0x3c8] sm:$0xff] }
 0x61c   : > { %v4179_v24 = vpack.c.bf16 %v2614_v17, %v2612_v59  ;;  %v2705_v17 = vld [vmem:[%s6821_s9 + $0xa20] sm:$0xff] }
 0x61e   : > { %3956 = vmatpush1.bf16.msra.mxu1 %v3955_v40  ;;  %4148 = vmatpush1.bf16.msra.mxu0 %v4147_v41  ;;  %v2602_v40 = vld [vmem:[%s6821_s9 + $0x930] sm:$0xff]  ;;  %v1975_v41 = vld [vmem:[%s6821_s9 + $0x348] sm:$0xff] }
 0x61f   : > { %3958 = vmatprep.subr.bf16.mxu1 %v3957_v46  ;;  %4150 = vmatprep.subr.bf16.mxu0 %v4149_v47  ;;  %v3975_v46 = vpack.c.bf16 %v1972_v56, %v1970_v37  ;;  %v4167_v47 = vpack.c.bf16 %v2602_v40, %v2600_v42  ;;  %v3977_v49 = vpack.c.bf16 %v1977_v43, %v1975_v41  ;;  %v1990_v56 = vld [vmem:[%s6821_s9 + $0x3c0] sm:$0xff]  ;;  %v2622_v41 = vld [vmem:[%s6821_s9 + $0x9d0] sm:$0xff]  ;;  %v1995_v43 = vld [vmem:[%s6821_s9 + $0x3e8] sm:$0xff] }
 0x620   : > { %v4183_v37 = vpack.c.bf16 %v2618_v30, %v2616_v29  ;;  %v2620_v40 = vld [vmem:[%s6821_s9 + $0x9c0] sm:$0xff] }
 0x621   : > { %v4187_v48 = vpack.c.bf16 %v2622_v41, %v2620_v40  ;;  %v2709_v30 = vld [vmem:[%s6821_s9 + $0xa40] sm:$0xff] }
 0x622   : > { %3960 = vmatpush1.bf16.msra.mxu1 %v3959_v54  ;;  %4152 = vmatpush1.bf16.msra.mxu0 %v4151_v8  ;;  %v1979_v54 = vld [vmem:[%s6821_s9 + $0x368] sm:$0xff]  ;;  %v1981_v8 = vld [vmem:[%s6821_s9 + $0x378] sm:$0xff]  ;;  %v2713_v41 = vld [vmem:[%s6821_s9 + $0xa60] sm:$0xff] }
 0x623   : > { %3962 = vmatprep.subr.bf16.mxu1 %v3961_v62  ;;  %4154 = vmatprep.subr.bf16.mxu0 %v4153_v63  ;;  %v4171_v62 = vpack.c.bf16 %v2606_v53, %v2604_v52  ;;  %v1978_v63 = vld [vmem:[%s6821_s9 + $0x360] sm:$0xff]  ;;  %v3981_v1 = vpack.c.bf16 %v1981_v8, %v1979_v54  ;;  %v2626_v54 = vld [vmem:[%s6821_s9 + $0x9f0] sm:$0xff]  ;;  %v2072_v8 = vld [vmem:[%s6821_s9 + $0x408] sm:$0xff] }
 0x624   : > { %v3983_v11 = vpack.c.bf16 %v1980_v0, %v1978_v63  ;;  %v2624_v53 = vld [vmem:[%s6821_s9 + $0x9e0] sm:$0xff] }
 0x625   : > { %v4191_v63 = vpack.c.bf16 %v2626_v54, %v2624_v53  ;;  %v2071_v0 = vld [vmem:[%s6821_s9 + $0x400] sm:$0xff] }
 0x626   : > { %3964 = vmatpush1.bf16.msra.mxu1 %v3963_v10  ;;  %4156 = vmatpush1.bf16.msra.mxu0 %v4155_v5  ;;  %v1985_v10 = vld [vmem:[%s6821_s9 + $0x398] sm:$0xff]  ;;  %v2613_v5 = vld [vmem:[%s6821_s9 + $0x988] sm:$0xff]  ;;  %v2717_v54 = vld [vmem:[%s6821_s9 + $0xa80] sm:$0xff] }
 0x627   : > { %3966 = vmatprep.subr.bf16.mxu1 %v3965_v13  ;;  %4158 = vmatprep.subr.bf16.mxu0 %v4157_v27  ;;  %v1982_v13 = vld [vmem:[%s6821_s9 + $0x380] sm:$0xff]  ;;  %v1984_v27 = vld [vmem:[%s6821_s9 + $0x390] sm:$0xff]  ;;  %v3985_v14 = vpack.c.bf16 %v1985_v10, %v1983_v4  ;;  %v4177_v15 = vpack.c.bf16 %v2615_v6, %v2613_v5  ;;  %v2076_v10 = vld [vmem:[%s6821_s9 + $0x428] sm:$0xff] }
 0x628   : > { %v3987_v23 = vpack.c.bf16 %v1984_v27, %v1982_v13  ;;  %v2703_v4 = vld [vmem:[%s6821_s9 + $0xa10] sm:$0xff]  ;;  %v2078_v5 = vld [vmem:[%s6821_s9 + $0x438] sm:$0xff]  ;;  %v2706_v6 = vld [vmem:[%s6821_s9 + $0xa28] sm:$0xff] }
 0x629   : > { %v4195_v13 = vpack.c.bf16 %v2703_v4, %v2701_v22  ;;  %v2075_v27 = vld [vmem:[%s6821_s9 + $0x420] sm:$0xff] }
 0x62a   : > { %3968 = vmatpush1.bf16.msra.mxu1 %v3967_v21  ;;  %4160 = vmatpush1.bf16.msra.mxu0 %v4159_v34  ;;  %v2617_v21 = vld [vmem:[%s6821_s9 + $0x9a8] sm:$0xff]  ;;  %v2619_v34 = vld [vmem:[%s6821_s9 + $0x9b8] sm:$0xff]  ;;  %v2721_v4 = vld [vmem:[%s6821_s9 + $0xaa0] sm:$0xff] }
 0x62b   : > { %3970 = vmatprep.subr.bf16.mxu1 %v3969_v26  ;;  %4162 = vmatprep.subr.bf16.mxu0 %v4161_v28  ;;  %v1988_v26 = vld [vmem:[%s6821_s9 + $0x3b0] sm:$0xff]  ;;  %v3989_v28 = vpack.c.bf16 %v1989_v20, %v1987_v19  ;;  %v4181_v50 = vpack.c.bf16 %v2619_v34, %v2617_v21  ;;  %v2080_v20 = vld [vmem:[%s6821_s9 + $0x448] sm:$0xff]  ;;  %v2082_v21 = vld [vmem:[%s6821_s9 + $0x458] sm:$0xff] }
 0x62c   : > { %v2707_v19 = vld [vmem:[%s6821_s9 + $0xa30] sm:$0xff]  ;;  %v2710_v34 = vld [vmem:[%s6821_s9 + $0xa48] sm:$0xff] }
 0x62d   : > { %1958 = vmatmul.mubr.f32.vlgmr.msra.gmra.mrb[12].mxu1 %v5304_v16  ;;  %2588 = vmatmul.mubr.f32.vlgmr.msra.gmra.mrb[2].mxu0 %v5701_v7 }
 0x62e   : > { %3972 = vmatpush1.bf16.msra.mxu1 %v3971_v35  ;;  %4164 = vmatpush1.bf16.msra.mxu0 %v4163_v36  ;;  %v2623_v35 = vld [vmem:[%s6821_s9 + $0x9d8] sm:$0xff]  ;;  %v3991_v36 = vpack.c.bf16 %v1988_v26, %v1986_v25  ;;  %v4199_v25 = vpack.c.bf16 %v2707_v19, %v2705_v17  ;;  %v2079_v26 = vld [vmem:[%s6821_s9 + $0x440] sm:$0xff] }
 0x62f   : > { %3974 = vmatprep.subr.bf16.mxu1 %v3973_v38  ;;  %4166 = vmatprep.subr.bf16.mxu0 %v4165_v39  ;;  %v1992_v38 = vld [vmem:[%s6821_s9 + $0x3d0] sm:$0xff]  ;;  %v3993_v39 = vpack.c.bf16 %v1993_v32, %v1991_v31  ;;  %v4185_v42 = vpack.c.bf16 %v2623_v35, %v2621_v33  ;;  %v2084_v32 = vld [vmem:[%s6821_s9 + $0x468] sm:$0xff]  ;;  %v2086_v33 = vld [vmem:[%s6821_s9 + $0x478] sm:$0xff] }
 0x630   : > { %2062 = vmatprep.mubr.f32.mxu1 %v4510_v58  ;;  %2692 = vmatprep.mubr.f32.mxu0 %v4510_v58  ;;  %v2711_v31 = vld [vmem:[%s6821_s9 + $0xa50] sm:$0xff]  ;;  %v2714_v35 = vld [vmem:[%s6821_s9 + $0xa68] sm:$0xff]  ;;  %v2725_v19 = vld [vmem:[%s6821_s9 + $0xac0] sm:$0xff] }
 0x632   : > { %3976 = vmatpush1.bf16.msra.mxu1 %v3975_v46  ;;  %4168 = vmatpush1.bf16.msra.mxu0 %v4167_v47  ;;  %v2627_v46 = vld [vmem:[%s6821_s9 + $0x9f8] sm:$0xff]  ;;  %v3995_v47 = vpack.c.bf16 %v1992_v38, %v1990_v56  ;;  %v4203_v56 = vpack.c.bf16 %v2711_v31, %v2709_v30  ;;  %v2083_v38 = vld [vmem:[%s6821_s9 + $0x460] sm:$0xff] }
 0x633   : > { %3978 = vmatprep.subr.bf16.mxu1 %v3977_v49  ;;  %4170 = vmatprep.subr.bf16.mxu0 %v4169_v51  ;;  %v1996_v49 = vld [vmem:[%s6821_s9 + $0x3f0] sm:$0xff]  ;;  %v3997_v51 = vpack.c.bf16 %v1997_v44, %v1995_v43  ;;  %v4189_v52 = vpack.c.bf16 %v2627_v46, %v2625_v45  ;;  %v2088_v44 = vld [vmem:[%s6821_s9 + $0x488] sm:$0xff]  ;;  %v2090_v45 = vld [vmem:[%s6821_s9 + $0x498] sm:$0xff] }
 0x634   : > { %v2715_v43 = vld [vmem:[%s6821_s9 + $0xa70] sm:$0xff]  ;;  %v2718_v46 = vld [vmem:[%s6821_s9 + $0xa88] sm:$0xff]  ;;  %v2729_v31 = vld [vmem:[%s6821_s9 + $0xae0] sm:$0xff] }
 0x636   : > { %3980 = vmatpush1.bf16.msra.mxu1 %v3979_v61  ;;  %4172 = vmatpush1.bf16.msra.mxu0 %v4171_v62  ;;  %v2704_v61 = vld [vmem:[%s6821_s9 + $0xa18] sm:$0xff]  ;;  %v3999_v62 = vpack.c.bf16 %v1996_v49, %v1994_v9  ;;  %v4207_v9 = vpack.c.bf16 %v2715_v43, %v2713_v41  ;;  %v2087_v49 = vld [vmem:[%s6821_s9 + $0x480] sm:$0xff] }
 0x637   : > { %3982 = vmatprep.subr.bf16.mxu1 %v3981_v1  ;;  %4174 = vmatprep.subr.bf16.mxu0 %v4173_v2  ;;  %v2073_v1 = vld [vmem:[%s6821_s9 + $0x410] sm:$0xff]  ;;  %v4001_v2 = vpack.c.bf16 %v2074_v55, %v2072_v8  ;;  %v4193_v3 = vpack.c.bf16 %v2704_v61, %v2702_v57  ;;  %v2092_v55 = vld [vmem:[%s6821_s9 + $0x4a8] sm:$0xff]  ;;  %v2094_v57 = vld [vmem:[%s6821_s9 + $0x4b8] sm:$0xff] }
 0x638   : > { %v2719_v8 = vld [vmem:[%s6821_s9 + $0xa90] sm:$0xff]  ;;  %v2722_v61 = vld [vmem:[%s6821_s9 + $0xaa8] sm:$0xff]  ;;  %v2806_v43 = vld [vmem:[%s6821_s9 + $0xb00] sm:$0xff] }
 0x63a   : > { %3984 = vmatpush1.bf16.msra.mxu1 %v3983_v11  ;;  %4176 = vmatpush1.bf16.msra.mxu0 %v4175_v12  ;;  %v2708_v11 = vld [vmem:[%s6821_s9 + $0xa38] sm:$0xff]  ;;  %v4003_v12 = vpack.c.bf16 %v2073_v1, %v2071_v0  ;;  %v4211_v0 = vpack.c.bf16 %v2719_v8, %v2717_v54  ;;  %v2091_v1 = vld [vmem:[%s6821_s9 + $0x4a0] sm:$0xff] }
 0x63b   : > { %3986 = vmatprep.subr.bf16.mxu1 %v3985_v14  ;;  %4178 = vmatprep.subr.bf16.mxu0 %v4177_v15  ;;  %v2077_v14 = vld [vmem:[%s6821_s9 + $0x430] sm:$0xff]  ;;  %v4005_v15 = vpack.c.bf16 %v2078_v5, %v2076_v10  ;;  %v4197_v59 = vpack.c.bf16 %v2708_v11, %v2706_v6  ;;  %v2096_v5 = vld [vmem:[%s6821_s9 + $0x4c8] sm:$0xff]  ;;  %v2098_v6 = vld [vmem:[%s6821_s9 + $0x4d8] sm:$0xff] }
 0x63c   : > { %v2723_v10 = vld [vmem:[%s6821_s9 + $0xab0] sm:$0xff]  ;;  %v2726_v11 = vld [vmem:[%s6821_s9 + $0xac8] sm:$0xff]  ;;  %v2810_v8 = vld [vmem:[%s6821_s9 + $0xb20] sm:$0xff] }
 0x63e   : > { %3988 = vmatpush1.bf16.msra.mxu1 %v3987_v23  ;;  %4180 = vmatpush1.bf16.msra.mxu0 %v4179_v24  ;;  %v2712_v23 = vld [vmem:[%s6821_s9 + $0xa58] sm:$0xff]  ;;  %v4007_v24 = vpack.c.bf16 %v2077_v14, %v2075_v27  ;;  %v4215_v27 = vpack.c.bf16 %v2723_v10, %v2721_v4  ;;  %v2095_v14 = vld [vmem:[%s6821_s9 + $0x4c0] sm:$0xff] }
 0x63f   : > { %3990 = vmatprep.subr.bf16.mxu1 %v3989_v28  ;;  %4182 = vmatprep.subr.bf16.mxu0 %v4181_v50  ;;  %v2081_v28 = vld [vmem:[%s6821_s9 + $0x450] sm:$0xff]  ;;  %v4009_v50 = vpack.c.bf16 %v2082_v21, %v2080_v20  ;;  %v4201_v29 = vpack.c.bf16 %v2712_v23, %v2710_v34  ;;  %v2100_v21 = vld [vmem:[%s6821_s9 + $0x4e8] sm:$0xff]  ;;  %v2102_v34 = vld [vmem:[%s6821_s9 + $0x4f8] sm:$0xff] }
 0x640   : > { %v2727_v20 = vld [vmem:[%s6821_s9 + $0xad0] sm:$0xff]  ;;  %v2730_v23 = vld [vmem:[%s6821_s9 + $0xae8] sm:$0xff]  ;;  %v2814_v10 = vld [vmem:[%s6821_s9 + $0xb40] sm:$0xff] }
 0x642   : > { %3992 = vmatpush1.bf16.msra.mxu1 %v3991_v36  ;;  %4184 = vmatpush1.bf16.msra.mxu0 %v4183_v37  ;;  %v2716_v36 = vld [vmem:[%s6821_s9 + $0xa78] sm:$0xff]  ;;  %v4011_v37 = vpack.c.bf16 %v2081_v28, %v2079_v26  ;;  %v4219_v26 = vpack.c.bf16 %v2727_v20, %v2725_v19  ;;  %v2099_v28 = vld [vmem:[%s6821_s9 + $0x4e0] sm:$0xff] }
 0x643   : > { %3994 = vmatprep.subr.bf16.mxu1 %v3993_v39  ;;  %4186 = vmatprep.subr.bf16.mxu0 %v4185_v42  ;;  %v2085_v39 = vld [vmem:[%s6821_s9 + $0x470] sm:$0xff]  ;;  %v4013_v42 = vpack.c.bf16 %v2086_v33, %v2084_v32  ;;  %v4205_v40 = vpack.c.bf16 %v2716_v36, %v2714_v35  ;;  %v2177_v33 = vld [vmem:[%s6821_s9 + $0x508] sm:$0xff]  ;;  %v2179_v35 = vld [vmem:[%s6821_s9 + $0x518] sm:$0xff] }
 0x644   : > { %v2731_v32 = vld [vmem:[%s6821_s9 + $0xaf0] sm:$0xff]  ;;  %v2807_v36 = vld [vmem:[%s6821_s9 + $0xb08] sm:$0xff]  ;;  %v2818_v20 = vld [vmem:[%s6821_s9 + $0xb60] sm:$0xff] }
 0x646   : > { %3996 = vmatpush1.bf16.msra.mxu1 %v3995_v47  ;;  %4188 = vmatpush1.bf16.msra.mxu0 %v4187_v48  ;;  %v2720_v47 = vld [vmem:[%s6821_s9 + $0xa98] sm:$0xff]  ;;  %v4015_v48 = vpack.c.bf16 %v2085_v39, %v2083_v38  ;;  %v4223_v38 = vpack.c.bf16 %v2731_v32, %v2729_v31  ;;  %v2176_v39 = vld [vmem:[%s6821_s9 + $0x500] sm:$0xff] }
 0x647   : > { %3998 = vmatprep.subr.bf16.mxu1 %v3997_v51  ;;  %4190 = vmatprep.subr.bf16.mxu0 %v4189_v52  ;;  %v2089_v51 = vld [vmem:[%s6821_s9 + $0x490] sm:$0xff]  ;;  %v4017_v52 = vpack.c.bf16 %v2090_v45, %v2088_v44  ;;  %v4209_v53 = vpack.c.bf16 %v2720_v47, %v2718_v46  ;;  %v2181_v45 = vld [vmem:[%s6821_s9 + $0x528] sm:$0xff]  ;;  %v2183_v46 = vld [vmem:[%s6821_s9 + $0x538] sm:$0xff] }
 0x648   : > { %v2808_v44 = vld [vmem:[%s6821_s9 + $0xb10] sm:$0xff]  ;;  %v2811_v47 = vld [vmem:[%s6821_s9 + $0xb28] sm:$0xff]  ;;  %v2822_v32 = vld [vmem:[%s6821_s9 + $0xb80] sm:$0xff] }
 0x64a   : > { %4000 = vmatpush1.bf16.msra.mxu1 %v3999_v62  ;;  %4192 = vmatpush1.bf16.msra.mxu0 %v4191_v63  ;;  %v2724_v62 = vld [vmem:[%s6821_s9 + $0xab8] sm:$0xff]  ;;  %v4019_v63 = vpack.c.bf16 %v2089_v51, %v2087_v49  ;;  %v4227_v49 = vpack.c.bf16 %v2808_v44, %v2806_v43  ;;  %v2180_v51 = vld [vmem:[%s6821_s9 + $0x520] sm:$0xff] }
 0x64b   : > { %4002 = vmatprep.subr.bf16.mxu1 %v4001_v2  ;;  %4194 = vmatprep.subr.bf16.mxu0 %v4193_v3  ;;  %v2093_v2 = vld [vmem:[%s6821_s9 + $0x4b0] sm:$0xff]  ;;  %v4021_v3 = vpack.c.bf16 %v2094_v57, %v2092_v55  ;;  %v4213_v22 = vpack.c.bf16 %v2724_v62, %v2722_v61  ;;  %v2185_v57 = vld [vmem:[%s6821_s9 + $0x548] sm:$0xff]  ;;  %v2187_v61 = vld [vmem:[%s6821_s9 + $0x558] sm:$0xff] }
 0x64c   : > { %v2812_v55 = vld [vmem:[%s6821_s9 + $0xb30] sm:$0xff]  ;;  %v2815_v62 = vld [vmem:[%s6821_s9 + $0xb48] sm:$0xff]  ;;  %v2826_v44 = vld [vmem:[%s6821_s9 + $0xba0] sm:$0xff] }
 0x64d   : > { %2063 = vmatmul.mubr.f32.vlgmr.msra.gmra.mrb[12].mxu1 %v5304_v16  ;;  %2693 = vmatmul.mubr.f32.vlgmr.msra.gmra.mrb[2].mxu0 %v5701_v7 }
 0x64e   : > { %4004 = vmatpush1.bf16.msra.mxu1 %v4003_v12  ;;  %4196 = vmatpush1.bf16.msra.mxu0 %v4195_v13  ;;  %v2728_v12 = vld [vmem:[%s6821_s9 + $0xad8] sm:$0xff]  ;;  %v4023_v13 = vpack.c.bf16 %v2093_v2, %v2091_v1  ;;  %v4231_v1 = vpack.c.bf16 %v2812_v55, %v2810_v8  ;;  %v2184_v2 = vld [vmem:[%s6821_s9 + $0x540] sm:$0xff] }
 0x64f   : > { %4006 = vmatprep.subr.bf16.mxu1 %v4005_v15  ;;  %4198 = vmatprep.subr.bf16.mxu0 %v4197_v59  ;;  %v2097_v15 = vld [vmem:[%s6821_s9 + $0x4d0] sm:$0xff]  ;;  %v4025_v59 = vpack.c.bf16 %v2098_v6, %v2096_v5  ;;  %v4217_v17 = vpack.c.bf16 %v2728_v12, %v2726_v11  ;;  %v2189_v6 = vld [vmem:[%s6821_s9 + $0x568] sm:$0xff]  ;;  %v2191_v11 = vld [vmem:[%s6821_s9 + $0x578] sm:$0xff] }
 0x650   : > { %2167 = vmatprep.mubr.f32.mxu1 %v4510_v58  ;;  %2797 = vmatprep.mubr.f32.mxu0 %v4510_v58  ;;  %v2816_v5 = vld [vmem:[%s6821_s9 + $0xb50] sm:$0xff]  ;;  %v2819_v12 = vld [vmem:[%s6821_s9 + $0xb68] sm:$0xff]  ;;  %v2830_v55 = vld [vmem:[%s6821_s9 + $0xbc0] sm:$0xff] }
 0x652   : > { %4008 = vmatpush1.bf16.msra.mxu1 %v4007_v24  ;;  %4200 = vmatpush1.bf16.msra.mxu0 %v4199_v25  ;;  %v2732_v24 = vld [vmem:[%s6821_s9 + $0xaf8] sm:$0xff]  ;;  %v4027_v25 = vpack.c.bf16 %v2097_v15, %v2095_v14  ;;  %v4235_v14 = vpack.c.bf16 %v2816_v5, %v2814_v10  ;;  %v2188_v15 = vld [vmem:[%s6821_s9 + $0x560] sm:$0xff]  ;;  %v2206_v10 = vld [vmem:[%s6821_s9 + $0x5f0] sm:$0xff] }
 0x653   : > { %4010 = vmatprep.subr.bf16.mxu1 %v4009_v50  ;;  %4202 = vmatprep.subr.bf16.mxu0 %v4201_v29  ;;  %v2101_v50 = vld [vmem:[%s6821_s9 + $0x4f0] sm:$0xff]  ;;  %v4029_v29 = vpack.c.bf16 %v2102_v34, %v2100_v21  ;;  %v4221_v30 = vpack.c.bf16 %v2732_v24, %v2730_v23  ;;  %v2193_v34 = vld [vmem:[%s6821_s9 + $0x588] sm:$0xff]  ;;  %v2195_v23 = vld [vmem:[%s6821_s9 + $0x598] sm:$0xff] }
 0x654   : > { %v2820_v21 = vld [vmem:[%s6821_s9 + $0xb70] sm:$0xff]  ;;  %v2823_v24 = vld [vmem:[%s6821_s9 + $0xb88] sm:$0xff]  ;;  %v2834_v5 = vld [vmem:[%s6821_s9 + $0xbe0] sm:$0xff] }
 0x656   : > { %4012 = vmatpush1.bf16.msra.mxu1 %v4011_v37  ;;  %4204 = vmatpush1.bf16.msra.mxu0 %v4203_v56  ;;  %v2809_v37 = vld [vmem:[%s6821_s9 + $0xb18] sm:$0xff]  ;;  %v4031_v56 = vpack.c.bf16 %v2101_v50, %v2099_v28  ;;  %v4239_v28 = vpack.c.bf16 %v2820_v21, %v2818_v20  ;;  %v2192_v50 = vld [vmem:[%s6821_s9 + $0x580] sm:$0xff] }
 0x657   : > { %4014 = vmatprep.subr.bf16.mxu1 %v4013_v42  ;;  %4206 = vmatprep.subr.bf16.mxu0 %v4205_v40  ;;  %v2178_v42 = vld [vmem:[%s6821_s9 + $0x510] sm:$0xff]  ;;  %v4033_v40 = vpack.c.bf16 %v2179_v35, %v2177_v33  ;;  %v4225_v41 = vpack.c.bf16 %v2809_v37, %v2807_v36  ;;  %v2197_v35 = vld [vmem:[%s6821_s9 + $0x5a8] sm:$0xff]  ;;  %v2199_v36 = vld [vmem:[%s6821_s9 + $0x5b8] sm:$0xff] }
 0x658   : > { %v2824_v33 = vld [vmem:[%s6821_s9 + $0xb90] sm:$0xff]  ;;  %v2827_v37 = vld [vmem:[%s6821_s9 + $0xba8] sm:$0xff] }
 0x65a   : > { %4016 = vmatpush1.bf16.msra.mxu1 %v4015_v48  ;;  %4208 = vmatpush1.bf16.msra.mxu0 %v4207_v9  ;;  %v2813_v48 = vld [vmem:[%s6821_s9 + $0xb38] sm:$0xff]  ;;  %v4035_v9 = vpack.c.bf16 %v2178_v42, %v2176_v39  ;;  %v4243_v39 = vpack.c.bf16 %v2824_v33, %v2822_v32  ;;  %v2196_v42 = vld [vmem:[%s6821_s9 + $0x5a0] sm:$0xff] }
 0x65b   : > { %4018 = vmatprep.subr.bf16.mxu1 %v4017_v52  ;;  %4210 = vmatprep.subr.bf16.mxu0 %v4209_v53  ;;  %v2182_v52 = vld [vmem:[%s6821_s9 + $0x530] sm:$0xff]  ;;  %v4037_v53 = vpack.c.bf16 %v2183_v46, %v2181_v45  ;;  %v4229_v54 = vpack.c.bf16 %v2813_v48, %v2811_v47  ;;  %v2201_v46 = vld [vmem:[%s6821_s9 + $0x5c8] sm:$0xff]  ;;  %v2203_v47 = vld [vmem:[%s6821_s9 + $0x5d8] sm:$0xff] }
 0x65c   : > { %v2828_v45 = vld [vmem:[%s6821_s9 + $0xbb0] sm:$0xff]  ;;  %v2831_v48 = vld [vmem:[%s6821_s9 + $0xbc8] sm:$0xff]  ;;  %v2923_v33 = vld [vmem:[%s6821_s9 + $0xc60] sm:$0xff] }
 0x65e   : > { %4020 = vmatpush1.bf16.msra.mxu1 %v4019_v63  ;;  %4212 = vmatpush1.bf16.msra.mxu0 %v4211_v0  ;;  %v2817_v63 = vld [vmem:[%s6821_s9 + $0xb58] sm:$0xff]  ;;  %v4039_v0 = vpack.c.bf16 %v2182_v52, %v2180_v51  ;;  %v4247_v51 = vpack.c.bf16 %v2828_v45, %v2826_v44  ;;  %v2200_v52 = vld [vmem:[%s6821_s9 + $0x5c0] sm:$0xff] }
 0x65f   : > { %4022 = vmatprep.subr.bf16.mxu1 %v4021_v3  ;;  %4214 = vmatprep.subr.bf16.mxu0 %v4213_v22  ;;  %v2186_v3 = vld [vmem:[%s6821_s9 + $0x550] sm:$0xff]  ;;  %v4041_v22 = vpack.c.bf16 %v2187_v61, %v2185_v57  ;;  %v4233_v4 = vpack.c.bf16 %v2817_v63, %v2815_v62  ;;  %v2205_v61 = vld [vmem:[%s6821_s9 + $0x5e8] sm:$0xff]  ;;  %v2207_v62 = vld [vmem:[%s6821_s9 + $0x5f8] sm:$0xff] }
 0x660   : > { %v2832_v57 = vld [vmem:[%s6821_s9 + $0xbd0] sm:$0xff]  ;;  %v2835_v63 = vld [vmem:[%s6821_s9 + $0xbe8] sm:$0xff]  ;;  %v2931_v45 = vld [vmem:[%s6821_s9 + $0xca0] sm:$0xff] }
 0x662   : > { %4024 = vmatpush1.bf16.msra.mxu1 %v4023_v13  ;;  %4216 = vmatpush1.bf16.msra.mxu0 %v4215_v27  ;;  %v2821_v13 = vld [vmem:[%s6821_s9 + $0xb78] sm:$0xff]  ;;  %v4043_v27 = vpack.c.bf16 %v2186_v3, %v2184_v2  ;;  %v4251_v2 = vpack.c.bf16 %v2832_v57, %v2830_v55  ;;  %v2204_v3 = vld [vmem:[%s6821_s9 + $0x5e0] sm:$0xff] }
 0x663   : > { %4026 = vmatprep.subr.bf16.mxu1 %v4025_v59  ;;  %4218 = vmatprep.subr.bf16.mxu0 %v4217_v17  ;;  %v2190_v59 = vld [vmem:[%s6821_s9 + $0x570] sm:$0xff]  ;;  %v4045_v17 = vpack.c.bf16 %v2191_v11, %v2189_v6  ;;  %v4237_v19 = vpack.c.bf16 %v2821_v13, %v2819_v12  ;;  %v2912_v11 = vld [vmem:[%s6821_s9 + $0xc08] sm:$0xff]  ;;  %v2914_v12 = vld [vmem:[%s6821_s9 + $0xc18] sm:$0xff]  ;;  %v4063_v13 = vpack.c.bf16 %v2206_v10, %v2204_v3 }
 0x664   : > { %v2836_v6 = vld [vmem:[%s6821_s9 + $0xbf0] sm:$0xff]  ;;  %v2939_v57 = vld [vmem:[%s6821_s9 + $0xce0] sm:$0xff] }
 0x665   : > { %v3018_v3 = vld [vmem:[%s6821_s9 + $0xd10] sm:$0xff] }
 0x666   : > { %4028 = vmatpush1.bf16.msra.mxu1 %v4027_v25  ;;  %4220 = vmatpush1.bf16.msra.mxu0 %v4219_v26  ;;  %v2825_v25 = vld [vmem:[%s6821_s9 + $0xb98] sm:$0xff]  ;;  %v4047_v26 = vpack.c.bf16 %v2190_v59, %v2188_v15  ;;  %v2911_v15 = vld [vmem:[%s6821_s9 + $0xc00] sm:$0xff]  ;;  %v2913_v59 = vld [vmem:[%s6821_s9 + $0xc10] sm:$0xff] }
 0x667   : > { %4030 = vmatprep.subr.bf16.mxu1 %v4029_v29  ;;  %4222 = vmatprep.subr.bf16.mxu0 %v4221_v30  ;;  %v2194_v29 = vld [vmem:[%s6821_s9 + $0x590] sm:$0xff]  ;;  %v4049_v30 = vpack.c.bf16 %v2195_v23, %v2193_v34  ;;  %v4241_v31 = vpack.c.bf16 %v2825_v25, %v2823_v24  ;;  %v4259_v20 = vpack.c.bf16 %v2913_v59, %v2911_v15  ;;  %v2915_v34 = vld [vmem:[%s6821_s9 + $0xc20] sm:$0xff]  ;;  %v2920_v24 = vld [vmem:[%s6821_s9 + $0xc48] sm:$0xff] }
 0x668   : > { %v2917_v23 = vld [vmem:[%s6821_s9 + $0xc30] sm:$0xff]  ;;  %v2922_v25 = vld [vmem:[%s6821_s9 + $0xc58] sm:$0xff]  ;;  %v3024_v15 = vld [vmem:[%s6821_s9 + $0xd40] sm:$0xff] }
 0x669   : > { %v3026_v59 = vld [vmem:[%s6821_s9 + $0xd50] sm:$0xff] }
 0x66a   : > { %4032 = vmatpush1.bf16.msra.mxu1 %v4031_v56  ;;  %4224 = vmatpush1.bf16.msra.mxu0 %v4223_v38  ;;  %v2829_v56 = vld [vmem:[%s6821_s9 + $0xbb8] sm:$0xff]  ;;  %v4051_v38 = vpack.c.bf16 %v2194_v29, %v2192_v50  ;;  %v2919_v50 = vld [vmem:[%s6821_s9 + $0xc40] sm:$0xff]  ;;  %v2921_v29 = vld [vmem:[%s6821_s9 + $0xc50] sm:$0xff] }
 0x66b   : > { %4034 = vmatprep.subr.bf16.mxu1 %v4033_v40  ;;  %4226 = vmatprep.subr.bf16.mxu0 %v4225_v41  ;;  %v2198_v40 = vld [vmem:[%s6821_s9 + $0x5b0] sm:$0xff]  ;;  %v4053_v41 = vpack.c.bf16 %v2199_v36, %v2197_v35  ;;  %v4245_v43 = vpack.c.bf16 %v2829_v56, %v2827_v37  ;;  %v2928_v36 = vld [vmem:[%s6821_s9 + $0xc88] sm:$0xff]  ;;  %v2930_v37 = vld [vmem:[%s6821_s9 + $0xc98] sm:$0xff] }
 0x66c   : > { %v2925_v35 = vld [vmem:[%s6821_s9 + $0xc70] sm:$0xff] }
 0x66d   : > { %2168 = vmatmul.mubr.f32.vlgmr.msra.gmra.mrb[12].mxu1 %v5304_v16  ;;  %2798 = vmatmul.mubr.f32.vlgmr.msra.gmra.mrb[2].mxu0 %v5701_v7  ;;  %v4271_v56 = vpack.c.bf16 %v2925_v35, %v2923_v33  ;;  %v3036_v33 = vld [vmem:[%s6821_s9 + $0xda0] sm:$0xff]  ;;  %v3038_v35 = vld [vmem:[%s6821_s9 + $0xdb0] sm:$0xff] }
 0x66e   : > { %4036 = vmatpush1.bf16.msra.mxu1 %v4035_v9  ;;  %4228 = vmatpush1.bf16.msra.mxu0 %v4227_v49  ;;  %v2833_v9 = vld [vmem:[%s6821_s9 + $0xbd8] sm:$0xff]  ;;  %v4055_v49 = vpack.c.bf16 %v2198_v40, %v2196_v42  ;;  %v2929_v42 = vld [vmem:[%s6821_s9 + $0xc90] sm:$0xff]  ;;  %v2932_v40 = vld [vmem:[%s6821_s9 + $0xca8] sm:$0xff] }
 0x66f   : > { %4038 = vmatprep.subr.bf16.mxu1 %v4037_v53  ;;  %4230 = vmatprep.subr.bf16.mxu0 %v4229_v54  ;;  %v2202_v53 = vld [vmem:[%s6821_s9 + $0x5d0] sm:$0xff]  ;;  %v4057_v54 = vpack.c.bf16 %v2203_v47, %v2201_v46  ;;  %v4249_v8 = vpack.c.bf16 %v2833_v9, %v2831_v48  ;;  %v2936_v47 = vld [vmem:[%s6821_s9 + $0xcc8] sm:$0xff]  ;;  %v2938_v48 = vld [vmem:[%s6821_s9 + $0xcd8] sm:$0xff] }
 0x670   : > { %2272 = vmatprep.mubr.f32.mxu1 %v4510_v58  ;;  %2902 = vmatprep.mubr.f32.mxu0 %v4510_v58  ;;  %v2933_v46 = vld [vmem:[%s6821_s9 + $0xcb0] sm:$0xff] }
 0x671   : > { %v4279_v9 = vpack.c.bf16 %v2933_v46, %v2931_v45  ;;  %v3044_v45 = vld [vmem:[%s6821_s9 + $0xde0] sm:$0xff]  ;;  %v3046_v46 = vld [vmem:[%s6821_s9 + $0xdf0] sm:$0xff] }
 0x672   : > { %4040 = vmatpush1.bf16.msra.mxu1 %v4039_v0  ;;  %4232 = vmatpush1.bf16.msra.mxu0 %v4231_v1  ;;  %v2837_v0 = vld [vmem:[%s6821_s9 + $0xbf8] sm:$0xff]  ;;  %v4059_v1 = vpack.c.bf16 %v2202_v53, %v2200_v52  ;;  %v2937_v52 = vld [vmem:[%s6821_s9 + $0xcd0] sm:$0xff]  ;;  %v2940_v53 = vld [vmem:[%s6821_s9 + $0xce8] sm:$0xff] }
 0x673   : > { %4042 = vmatprep.subr.bf16.mxu1 %v4041_v22  ;;  %4234 = vmatprep.subr.bf16.mxu0 %v4233_v4  ;;  %v4061_v22 = vpack.c.bf16 %v2207_v62, %v2205_v61  ;;  %v4253_v4 = vpack.c.bf16 %v2837_v0, %v2835_v63  ;;  %v2941_v61 = vld [vmem:[%s6821_s9 + $0xcf0] sm:$0xff]  ;;  %v3017_v62 = vld [vmem:[%s6821_s9 + $0xd08] sm:$0xff]  ;;  %v3019_v63 = vld [vmem:[%s6821_s9 + $0xd18] sm:$0xff] }
 0x674   : > { %v4287_v0 = vpack.c.bf16 %v2941_v61, %v2939_v57  ;;  %v3125_v57 = vld [vmem:[%s6821_s9 + $0xe20] sm:$0xff]  ;;  %v3127_v61 = vld [vmem:[%s6821_s9 + $0xe30] sm:$0xff] }
 0x676   : > { %4044 = vmatpush1.bf16.msra.mxu1 %v4043_v27  ;;  %4236 = vmatpush1.bf16.msra.mxu0 %v4235_v14  ;;  %v4255_v27 = vpack.c.bf16 %v2836_v6, %v2834_v5  ;;  %v4257_v14 = vpack.c.bf16 %v2914_v12, %v2912_v11  ;;  %v3020_v6 = vld [vmem:[%s6821_s9 + $0xd20] sm:$0xff]  ;;  %v3022_v11 = vld [vmem:[%s6821_s9 + $0xd30] sm:$0xff]  ;;  %v3025_v12 = vld [vmem:[%s6821_s9 + $0xd48] sm:$0xff] }
 0x677   : > { %4046 = vmatprep.subr.bf16.mxu1 %v4045_v17  ;;  %4238 = vmatprep.subr.bf16.mxu0 %v4237_v19  ;;  %v2916_v17 = vld [vmem:[%s6821_s9 + $0xc28] sm:$0xff]  ;;  %v2918_v19 = vld [vmem:[%s6821_s9 + $0xc38] sm:$0xff] }
 0x678   : > { %v4261_v21 = vpack.c.bf16 %v2918_v19, %v2916_v17  ;;  %v3029_v17 = vld [vmem:[%s6821_s9 + $0xd68] sm:$0xff]  ;;  %v3031_v19 = vld [vmem:[%s6821_s9 + $0xd78] sm:$0xff] }
 0x67a   : > { %4048 = vmatpush1.bf16.msra.mxu1 %v4047_v26  ;;  %4240 = vmatpush1.bf16.msra.mxu0 %v4239_v28  ;;  %v4263_v26 = vpack.c.bf16 %v2917_v23, %v2915_v34  ;;  %v4265_v28 = vpack.c.bf16 %v2922_v25, %v2920_v24  ;;  %v3028_v34 = vld [vmem:[%s6821_s9 + $0xd60] sm:$0xff]  ;;  %v3030_v23 = vld [vmem:[%s6821_s9 + $0xd70] sm:$0xff]  ;;  %v3033_v24 = vld [vmem:[%s6821_s9 + $0xd88] sm:$0xff] }
 0x67b   : > { %4050 = vmatprep.subr.bf16.mxu1 %v4049_v30  ;;  %4242 = vmatprep.subr.bf16.mxu0 %v4241_v31  ;;  %v2926_v30 = vld [vmem:[%s6821_s9 + $0xc78] sm:$0xff]  ;;  %v4267_v31 = vpack.c.bf16 %v2921_v29, %v2919_v50  ;;  %v3032_v50 = vld [vmem:[%s6821_s9 + $0xd80] sm:$0xff]  ;;  %v3034_v29 = vld [vmem:[%s6821_s9 + $0xd90] sm:$0xff] }
 0x67c   : > { %v3035_v25 = vld [vmem:[%s6821_s9 + $0xd98] sm:$0xff] }
 0x67e   : > { %4052 = vmatpush1.bf16.msra.mxu1 %v4051_v38  ;;  %4244 = vmatpush1.bf16.msra.mxu0 %v4243_v39  ;;  %v4273_v38 = vpack.c.bf16 %v2930_v37, %v2928_v36  ;;  %v2927_v39 = vld [vmem:[%s6821_s9 + $0xc80] sm:$0xff]  ;;  %v3041_v36 = vld [vmem:[%s6821_s9 + $0xdc8] sm:$0xff]  ;;  %v3043_v37 = vld [vmem:[%s6821_s9 + $0xdd8] sm:$0xff] }
 0x67f   : > { %4054 = vmatprep.subr.bf16.mxu1 %v4053_v41  ;;  %4246 = vmatprep.subr.bf16.mxu0 %v4245_v43  ;;  %v2934_v41 = vld [vmem:[%s6821_s9 + $0xcb8] sm:$0xff]  ;;  %v4275_v43 = vpack.c.bf16 %v2929_v42, %v2927_v39  ;;  %v3040_v39 = vld [vmem:[%s6821_s9 + $0xdc0] sm:$0xff]  ;;  %v3042_v42 = vld [vmem:[%s6821_s9 + $0xdd0] sm:$0xff] }
 0x680   : > { %v4277_v44 = vpack.c.bf16 %v2934_v41, %v2932_v40  ;;  %v3045_v40 = vld [vmem:[%s6821_s9 + $0xde8] sm:$0xff]  ;;  %v3047_v41 = vld [vmem:[%s6821_s9 + $0xdf8] sm:$0xff] }
 0x682   : > { %4056 = vmatpush1.bf16.msra.mxu1 %v4055_v49  ;;  %4248 = vmatpush1.bf16.msra.mxu0 %v4247_v51  ;;  %v4281_v49 = vpack.c.bf16 %v2938_v48, %v2936_v47  ;;  %v2935_v51 = vld [vmem:[%s6821_s9 + $0xcc0] sm:$0xff]  ;;  %v3122_v47 = vld [vmem:[%s6821_s9 + $0xe08] sm:$0xff]  ;;  %v3124_v48 = vld [vmem:[%s6821_s9 + $0xe18] sm:$0xff] }
 0x683   : > { %4058 = vmatprep.subr.bf16.mxu1 %v4057_v54  ;;  %4250 = vmatprep.subr.bf16.mxu0 %v4249_v8  ;;  %v2942_v54 = vld [vmem:[%s6821_s9 + $0xcf8] sm:$0xff]  ;;  %v4283_v8 = vpack.c.bf16 %v2937_v52, %v2935_v51  ;;  %v3121_v51 = vld [vmem:[%s6821_s9 + $0xe00] sm:$0xff]  ;;  %v3123_v52 = vld [vmem:[%s6821_s9 + $0xe10] sm:$0xff] }
 0x684   : > { %v4285_v55 = vpack.c.bf16 %v2942_v54, %v2940_v53  ;;  %v3126_v53 = vld [vmem:[%s6821_s9 + $0xe28] sm:$0xff]  ;;  %v3128_v54 = vld [vmem:[%s6821_s9 + $0xe38] sm:$0xff] }
 0x686   : > { %4060 = vmatpush1.bf16.msra.mxu1 %v4059_v1  ;;  %4252 = vmatpush1.bf16.msra.mxu0 %v4251_v2  ;;  %v4289_v1 = vpack.c.bf16 %v3019_v63, %v3017_v62  ;;  %v3016_v2 = vld [vmem:[%s6821_s9 + $0xd00] sm:$0xff]  ;;  %v3130_v62 = vld [vmem:[%s6821_s9 + $0xe48] sm:$0xff]  ;;  %v3132_v63 = vld [vmem:[%s6821_s9 + $0xe58] sm:$0xff] }
 0x687   : > { %4062 = vmatprep.subr.bf16.mxu1 %v4061_v22  ;;  %4254 = vmatprep.subr.bf16.mxu0 %v4253_v4  ;;  %v3021_v22 = vld [vmem:[%s6821_s9 + $0xd28] sm:$0xff]  ;;  %v3023_v4 = vld [vmem:[%s6821_s9 + $0xd38] sm:$0xff]  ;;  %v4291_v10 = vpack.c.bf16 %v3018_v3, %v3016_v2  ;;  %v3129_v2 = vld [vmem:[%s6821_s9 + $0xe40] sm:$0xff] }
 0x688   : > { %v4293_v5 = vpack.c.bf16 %v3023_v4, %v3021_v22  ;;  %v3131_v3 = vld [vmem:[%s6821_s9 + $0xe50] sm:$0xff]  ;;  %v3134_v22 = vld [vmem:[%s6821_s9 + $0xe68] sm:$0xff]  ;;  %v3136_v4 = vld [vmem:[%s6821_s9 + $0xe78] sm:$0xff] }
 0x68a   : > { %4064 = vmatpush1.bf16.msra.mxu1 %v4063_v13  ;;  %4256 = vmatpush1.bf16.msra.mxu0 %v4255_v27  ;;  %v3027_v13 = vld [vmem:[%s6821_s9 + $0xd58] sm:$0xff]  ;;  %v4295_v27 = vpack.c.bf16 %v3022_v11, %v3020_v6  ;;  %v3133_v6 = vld [vmem:[%s6821_s9 + $0xe60] sm:$0xff]  ;;  %v3135_v11 = vld [vmem:[%s6821_s9 + $0xe70] sm:$0xff] }
 0x68b   : > { %4258 = vmatprep.subr.bf16.mxu0 %v4257_v14  ;;  %v4297_v14 = vpack.c.bf16 %v3027_v13, %v3025_v12  ;;  %v3138_v12 = vld [vmem:[%s6821_s9 + $0xe88] sm:$0xff]  ;;  %v3140_v13 = vld [vmem:[%s6821_s9 + $0xe98] sm:$0xff] }
 0x68d   : > { %2273 = vmatmul.mubr.f32.vlgmr.msra.gmra.mrb[12].mxu1 %v5304_v16  ;;  %2903 = vmatmul.mubr.f32.vlgmr.msra.gmra.mrb[2].mxu0 %v5701_v7  ;;  %v2924_v16 = vld [vmem:[%s6821_s9 + $0xc68] sm:$0xff] }
 0x68e   : > { %4260 = vmatpush1.bf16.msra.mxu0 %v4259_v20  ;;  %3007 = vmatprep.mubr.f32.mxu0 %v4510_v58  ;;  %v4269_v32 = vpack.c.bf16 %v2926_v30, %v2924_v16  ;;  %v4299_v20 = vpack.c.bf16 %v3026_v59, %v3024_v15  ;;  %v3037_v16 = vld [vmem:[%s6821_s9 + $0xda8] sm:$0xff]  ;;  %v3039_v30 = vld [vmem:[%s6821_s9 + $0xdb8] sm:$0xff]  ;;  %v3137_v15 = vld [vmem:[%s6821_s9 + $0xe80] sm:$0xff] }
 0x68f   : > { %4262 = vmatprep.subr.bf16.mxu0 %v4261_v21  ;;  %v4301_v21 = vpack.c.bf16 %v3031_v19, %v3029_v17  ;;  %v3139_v59 = vld [vmem:[%s6821_s9 + $0xe90] sm:$0xff]  ;;  %v3142_v17 = vld [vmem:[%s6821_s9 + $0xea8] sm:$0xff]  ;;  %v3144_v19 = vld [vmem:[%s6821_s9 + $0xeb8] sm:$0xff] }
 0x692   : > { %4264 = vmatpush1.bf16.msra.mxu0 %v4263_v26  ;;  %v4303_v26 = vpack.c.bf16 %v3030_v23, %v3028_v34  ;;  %v3141_v34 = vld [vmem:[%s6821_s9 + $0xea0] sm:$0xff]  ;;  %v3143_v23 = vld [vmem:[%s6821_s9 + $0xeb0] sm:$0xff] }
 0x693   : > { %4266 = vmatprep.subr.bf16.mxu0 %v4265_v28  ;;  %v4305_v28 = vpack.c.bf16 %v3035_v25, %v3033_v24  ;;  %v3146_v24 = vld [vmem:[%s6821_s9 + $0xec8] sm:$0xff]  ;;  %v3148_v25 = vld [vmem:[%s6821_s9 + $0xed8] sm:$0xff] }
 0x696   : > { %4268 = vmatpush1.bf16.msra.mxu0 %v4267_v31  ;;  %v4307_v31 = vpack.c.bf16 %v3034_v29, %v3032_v50  ;;  %v3145_v50 = vld [vmem:[%s6821_s9 + $0xec0] sm:$0xff]  ;;  %v3147_v29 = vld [vmem:[%s6821_s9 + $0xed0] sm:$0xff] }
 0x697   : > { %4270 = vmatprep.subr.bf16.mxu0 %v4269_v32  ;;  %v4309_v32 = vpack.c.bf16 %v3039_v30, %v3037_v16  ;;  %v3150_v16 = vld [vmem:[%s6821_s9 + $0xee8] sm:$0xff]  ;;  %v3152_v30 = vld [vmem:[%s6821_s9 + $0xef8] sm:$0xff] }
 0x69a   : > { %4272 = vmatpush1.bf16.msra.mxu0 %v4271_v56  ;;  %v4311_v56 = vpack.c.bf16 %v3038_v35, %v3036_v33  ;;  %v3363_v33 = vld [vmem:[%s6823_s11 + $0x80] sm:$0xff]  ;;  %v3364_v35 = vld [vmem:[%s6823_s11 + $0x88] sm:$0xff] }
 0x69b   : > { %4274 = vmatprep.subr.bf16.mxu0 %v4273_v38  ;;  %v4313_v38 = vpack.c.bf16 %v3043_v37, %v3041_v36  ;;  %v3347_v36 = vld [vmem:[%s6823_s11] sm:$0xff]  ;;  %v4347_v37 = vpack.c.bf16 %v3147_v29, %v3145_v50 }
 0x69e   : > { %4276 = vmatpush1.bf16.msra.mxu0 %v4275_v43  ;;  %v4315_v43 = vpack.c.bf16 %v3042_v42, %v3040_v39  ;;  %v3365_v39 = vld [vmem:[%s6823_s11 + $0x90] sm:$0xff]  ;;  %v3366_v42 = vld [vmem:[%s6823_s11 + $0x98] sm:$0xff] }
 0x69f   : > { %4278 = vmatprep.subr.bf16.mxu0 %v4277_v44  ;;  %v4317_v44 = vpack.c.bf16 %v3047_v41, %v3045_v40  ;;  %v4349_v40 = vpack.c.bf16 %v3152_v30, %v3150_v16  ;;  %v3357_v16 = vld [vmem:[%s6823_s11 + $0x50] sm:$0xff]  ;;  %v3358_v30 = vld [vmem:[%s6823_s11 + $0x58] sm:$0xff] }
 0x6a2   : > { %4280 = vmatpush1.bf16.msra.mxu0 %v4279_v9  ;;  %v4319_v9 = vpack.c.bf16 %v3046_v46, %v3044_v45  ;;  %v3350_v45 = vld [vmem:[%s6823_s11 + $0x18] sm:$0xff]  ;;  %v3367_v46 = vld [vmem:[%s6823_s11 + $0xa0] sm:$0xff] }
 0x6a3   : > { %4282 = vmatprep.subr.bf16.mxu0 %v4281_v49  ;;  %v4321_v49 = vpack.c.bf16 %v3124_v48, %v3122_v47  ;;  %v3227_v47 = vld [vmem:[%s6821_s9 + $0xf08] sm:$0xff]  ;;  %v3229_v48 = vld [vmem:[%s6821_s9 + $0xf18] sm:$0xff] }
 0x6a6   : > { %4284 = vmatpush1.bf16.msra.mxu0 %v4283_v8  ;;  %v4323_v8 = vpack.c.bf16 %v3123_v52, %v3121_v51 }
 0x6a7   : > { %4286 = vmatprep.subr.bf16.mxu0 %v4285_v55  ;;  %v4325_v55 = vpack.c.bf16 %v3128_v54, %v3126_v53  ;;  %v3351_v53 = vld [vmem:[%s6823_s11 + $0x20] sm:$0xff]  ;;  %v3352_v54 = vld [vmem:[%s6823_s11 + $0x28] sm:$0xff] }
 0x6aa   : > { %4288 = vmatpush1.bf16.msra.mxu0 %v4287_v0  ;;  %v4327_v0 = vpack.c.bf16 %v3127_v61, %v3125_v57  ;;  %v3228_v57 = vld [vmem:[%s6821_s9 + $0xf10] sm:$0xff]  ;;  %v3231_v61 = vld [vmem:[%s6821_s9 + $0xf28] sm:$0xff] }
 0x6ab   : > { %4290 = vmatprep.subr.bf16.mxu0 %v4289_v1  ;;  %v4329_v1 = vpack.c.bf16 %v3132_v63, %v3130_v62  ;;  %v3233_v62 = vld [vmem:[%s6821_s9 + $0xf38] sm:$0xff]  ;;  %v3369_v63 = vld [vmem:[%s6823_s11 + $0xb0] sm:$0xff] }
 0x6ad   : > { %3008 = vmatmul.mubr.f32.vlgmr.msra.gmra.mrb[2].mxu0 %v5701_v7 }
 0x6ae   : > { %4292 = vmatpush1.bf16.msra.mxu0 %v4291_v10  ;;  %3112 = vmatprep.mubr.f32.mxu0 %v4510_v58  ;;  %v4331_v10 = vpack.c.bf16 %v3131_v3, %v3129_v2  ;;  %v3230_v3 = vld [vmem:[%s6821_s9 + $0xf20] sm:$0xff] }
 0x6af   : > { %4294 = vmatprep.subr.bf16.mxu0 %v4293_v5  ;;  %v4333_v5 = vpack.c.bf16 %v3136_v4, %v3134_v22  ;;  %v3353_v22 = vld [vmem:[%s6823_s11 + $0x30] sm:$0xff]  ;;  %v3354_v4 = vld [vmem:[%s6823_s11 + $0x38] sm:$0xff] }
 0x6b2   : > { %4296 = vmatpush1.bf16.msra.mxu0 %v4295_v27  ;;  %v4335_v27 = vpack.c.bf16 %v3135_v11, %v3133_v6  ;;  %v3371_v11 = vld [vmem:[%s6823_s11 + $0xc0] sm:$0xff] }
 0x6b3   : > { %4298 = vmatprep.subr.bf16.mxu0 %v4297_v14  ;;  %v4337_v14 = vpack.c.bf16 %v3140_v13, %v3138_v12  ;;  %v3372_v12 = vld [vmem:[%s6823_s11 + $0xc8] sm:$0xff] }
 0x6b4   : > { %v3235_v13 = vld [vmem:[%s6821_s9 + $0xf48] sm:$0xff] }
 0x6b6   : > { %4300 = vmatpush1.bf16.msra.mxu0 %v4299_v20  ;;  %v4339_v20 = vpack.c.bf16 %v3139_v59, %v3137_v15  ;;  %v3234_v59 = vld [vmem:[%s6821_s9 + $0xf40] sm:$0xff] }
 0x6b7   : > { %4302 = vmatprep.subr.bf16.mxu0 %v4301_v21  ;;  %v4341_v21 = vpack.c.bf16 %v3144_v19, %v3142_v17  ;;  %v4401_v17 = vpack.c.bf16 %v3372_v12, %v3371_v11  ;;  %v3355_v19 = vld [vmem:[%s6823_s11 + $0x40] sm:$0xff]  ;;  %v3361_v11 = vld [vmem:[%s6823_s11 + $0x70] sm:$0xff]  ;;  %v3362_v12 = vld [vmem:[%s6823_s11 + $0x78] sm:$0xff] }
 0x6ba   : > { %4304 = vmatpush1.bf16.msra.mxu0 %v4303_v26  ;;  %v4343_v26 = vpack.c.bf16 %v3143_v23, %v3141_v34  ;;  %v3236_v34 = vld [vmem:[%s6821_s9 + $0xf50] sm:$0xff] }
 0x6bb   : > { %4306 = vmatprep.subr.bf16.mxu0 %v4305_v28  ;;  %v4345_v28 = vpack.c.bf16 %v3148_v25, %v3146_v24  ;;  %v3373_v23 = vld [vmem:[%s6823_s11 + $0xd0] sm:$0xff]  ;;  %v3374_v24 = vld [vmem:[%s6823_s11 + $0xd8] sm:$0xff]  ;;  %v3239_v25 = vld [vmem:[%s6821_s9 + $0xf68] sm:$0xff]  ;;  %v4363_v50 = vpack.c.bf16 %v3236_v34, %v3234_v59 }
 0x6bc   : > { %v4405_v29 = vpack.c.bf16 %v3374_v24, %v3373_v23  ;;  %v3451_v24 = vld [vmem:[%s6825_s13] sm:$0xff] }
 0x6be   : > { %4308 = vmatpush1.bf16.msra.mxu0 %v4307_v31  ;;  %v3149_v31 = vld [vmem:[%s6821_s9 + $0xee0] sm:$0xff] }
 0x6bf   : > { %4310 = vmatprep.subr.bf16.mxu0 %v4309_v32  ;;  %v3151_v32 = vld [vmem:[%s6821_s9 + $0xef0] sm:$0xff] }
 0x6c0   : > { %v4351_v51 = vpack.c.bf16 %v3151_v32, %v3149_v31  ;;  %v3238_v32 = vld [vmem:[%s6821_s9 + $0xf60] sm:$0xff] }
 0x6c2   : > { %4312 = vmatpush1.bf16.msra.mxu0 %v4311_v56  ;;  %v4385_v56 = vpack.c.bf16 %v3364_v35, %v3363_v33  ;;  %v3240_v33 = vld [vmem:[%s6821_s9 + $0xf70] sm:$0xff]  ;;  %v3243_v35 = vld [vmem:[%s6821_s9 + $0xf88] sm:$0xff] }
 0x6c3   : > { %4314 = vmatprep.subr.bf16.mxu0 %v4313_v38  ;;  %v3348_v38 = vld [vmem:[%s6823_s11 + $0x8] sm:$0xff] }
 0x6c4   : > { %v4387_v41 = vpack.c.bf16 %v3348_v38, %v3347_v36  ;;  %4386 = vmatprep.subr.bf16.mxu1 %v4385_v56  ;;  %v3245_v36 = vld [vmem:[%s6821_s9 + $0xf98] sm:$0xff]  ;;  %v4367_v56 = vpack.c.bf16 %v3240_v33, %v3238_v32  ;;  %v3456_v32 = vld [vmem:[%s6825_s13 + $0x28] sm:$0xff] }
 0x6c5   : > { %v4369_v38 = vpack.c.bf16 %v3245_v36, %v3243_v35  ;;  %v3457_v35 = vld [vmem:[%s6825_s13 + $0x30] sm:$0xff] }
 0x6c6   : > { %4316 = vmatpush1.bf16.msra.mxu0 %v4315_v43  ;;  %v4389_v43 = vpack.c.bf16 %v3366_v42, %v3365_v39  ;;  %4388 = vmatpush3.bf16.msra.mxu1 %v4387_v41  ;;  %v3242_v39 = vld [vmem:[%s6821_s9 + $0xf80] sm:$0xff]  ;;  %v3244_v42 = vld [vmem:[%s6821_s9 + $0xf90] sm:$0xff]  ;;  %v3249_v41 = vld [vmem:[%s6821_s9 + $0xfb8] sm:$0xff] }
 0x6c7   : > { %4318 = vmatprep.subr.bf16.mxu0 %v4317_v44  ;;  %v3349_v44 = vld [vmem:[%s6823_s11 + $0x10] sm:$0xff] }
 0x6c8   : > { %4390 = vmatprep.subr.bf16.mxu1 %v4389_v43  ;;  %v4371_v43 = vpack.c.bf16 %v3244_v42, %v3242_v39  ;;  %v3461_v39 = vld [vmem:[%s6825_s13 + $0x50] sm:$0xff]  ;;  %v3462_v42 = vld [vmem:[%s6825_s13 + $0x58] sm:$0xff] }
 0x6ca   : > { %4320 = vmatpush1.bf16.msra.mxu0 %v4319_v9  ;;  %v3368_v9 = vld [vmem:[%s6823_s11 + $0xa8] sm:$0xff] }
 0x6cb   : > { %4322 = vmatprep.subr.bf16.mxu0 %v4321_v49  ;;  %v4391_v49 = vpack.c.bf16 %v3350_v45, %v3349_v44  ;;  %v4393_v52 = vpack.c.bf16 %v3368_v9, %v3367_v46  ;;  %v3246_v45 = vld [vmem:[%s6821_s9 + $0xfa0] sm:$0xff]  ;;  %v3248_v46 = vld [vmem:[%s6821_s9 + $0xfb0] sm:$0xff] }
 0x6cc   : > { %v4375_v9 = vpack.c.bf16 %v3248_v46, %v3246_v45  ;;  %v3465_v45 = vld [vmem:[%s6825_s13 + $0x70] sm:$0xff]  ;;  %v3466_v46 = vld [vmem:[%s6825_s13 + $0x78] sm:$0xff] }
 0x6cd   : > { %3113 = vmatmul.mubr.f32.vlgmr.msra.gmra.mrb[2].mxu0 %v5701_v7  ;;  %4392 = vmatpush3.bf16.msra.mxu1 %v4391_v49 }
 0x6ce   : > { %4324 = vmatpush1.bf16.msra.mxu0 %v4323_v8  ;;  %3217 = vmatprep.mubr.f32.mxu0 %v4510_v58  ;;  %v4353_v8 = vpack.c.bf16 %v3229_v48, %v3227_v47  ;;  %v3251_v47 = vld [vmem:[%s6821_s9 + $0xfc8] sm:$0xff]  ;;  %v3253_v48 = vld [vmem:[%s6821_s9 + $0xfd8] sm:$0xff] }
 0x6cf   : > { %4326 = vmatprep.subr.bf16.mxu0 %v4325_v55  ;;  %v3226_v55 = vld [vmem:[%s6821_s9 + $0xf00] sm:$0xff]  ;;  %4394 = vmatprep.subr.bf16.mxu1 %v4393_v52  ;;  %v4377_v49 = vpack.c.bf16 %v3253_v48, %v3251_v47  ;;  %v3252_v52 = vld [vmem:[%s6821_s9 + $0xfd0] sm:$0xff]  ;;  %v4439_v47 = vpack.c.bf16 %v3466_v46, %v3465_v45 }
 0x6d0   : > { %v4355_v2 = vpack.c.bf16 %v3228_v57, %v3226_v55  ;;  %v3254_v57 = vld [vmem:[%s6821_s9 + $0xfe0] sm:$0xff] }
 0x6d2   : > { %4328 = vmatpush1.bf16.msra.mxu0 %v4327_v0  ;;  %v3370_v0 = vld [vmem:[%s6823_s11 + $0xb8] sm:$0xff] }
 0x6d3   : > { %4330 = vmatprep.subr.bf16.mxu0 %v4329_v1  ;;  %v4395_v1 = vpack.c.bf16 %v3352_v54, %v3351_v53  ;;  %v4397_v6 = vpack.c.bf16 %v3370_v0, %v3369_v63  ;;  %v3255_v53 = vld [vmem:[%s6821_s9 + $0xfe8] sm:$0xff]  ;;  %v3257_v54 = vld [vmem:[%s6821_s9 + $0xff8] sm:$0xff]  ;;  %v3375_v63 = vld [vmem:[%s6823_s11 + $0xe0] sm:$0xff] }
 0x6d4   : > { %v4381_v55 = vpack.c.bf16 %v3257_v54, %v3255_v53  ;;  %v3376_v0 = vld [vmem:[%s6823_s11 + $0xe8] sm:$0xff] }
 0x6d5   : > { %4396 = vmatpush3.bf16.msra.mxu1 %v4395_v1  ;;  %v4409_v1 = vpack.c.bf16 %v3376_v0, %v3375_v63 }
 0x6d6   : > { %4332 = vmatpush1.bf16.msra.mxu0 %v4331_v10  ;;  %v4357_v10 = vpack.c.bf16 %v3233_v62, %v3231_v61  ;;  %4398 = vmatprep.subr.bf16.mxu1 %v4397_v6  ;;  %v3256_v61 = vld [vmem:[%s6821_s9 + $0xff0] sm:$0xff] }
 0x6d7   : > { %4334 = vmatprep.subr.bf16.mxu0 %v4333_v5  ;;  %v3232_v5 = vld [vmem:[%s6821_s9 + $0xf30] sm:$0xff]  ;;  %v4383_v62 = vpack.c.bf16 %v3256_v61, %v3254_v57 }
 0x6d8   : > { %v4359_v15 = vpack.c.bf16 %v3232_v5, %v3230_v3  ;;  %v3360_v3 = vld [vmem:[%s6823_s11 + $0x68] sm:$0xff]  ;;  %v3378_v5 = vld [vmem:[%s6823_s11 + $0xf8] sm:$0xff] }
 0x6da   : > { %4336 = vmatpush1.bf16.msra.mxu0 %v4335_v27  ;;  %v3237_v27 = vld [vmem:[%s6821_s9 + $0xf58] sm:$0xff] }
 0x6db   : > { %4338 = vmatprep.subr.bf16.mxu0 %v4337_v14  ;;  %v4399_v14 = vpack.c.bf16 %v3354_v4, %v3353_v22 }
 0x6dd   : > { %4400 = vmatpush3.bf16.msra.mxu1 %v4399_v14  ;;  %v3331_v14 = vld [vmem:[%s6822_s10] sm:$0x3] }
 0x6de   : > { %4340 = vmatpush1.bf16.msra.mxu0 %v4339_v20  ;;  %v3356_v20 = vld [vmem:[%s6823_s11 + $0x48] sm:$0xff]  ;;  %4402 = vmatprep.subr.bf16.mxu1 %v4401_v17 }
 0x6df   : > { %4342 = vmatprep.subr.bf16.mxu0 %v4341_v21  ;;  %v4361_v21 = vpack.c.bf16 %v3237_v27, %v3235_v13  ;;  %v4415_v13 = vpack.c.bf16 %v3362_v12, %v3361_v11  ;;  %v3335_v27 = vsub.s32 0, %v4928_v18 }
 0x6e1   : > { %v3336_v59 = vrot.slane %v3331_v14, %v3335_v27 }
 0x6e2   : > { %4344 = vmatpush1.bf16.msra.mxu0 %v4343_v26  ;;  %v3241_v26 = vld [vmem:[%s6821_s9 + $0xf78] sm:$0xff] }
 0x6e3   : > { %4346 = vmatprep.subr.bf16.mxu0 %v4345_v28  ;;  %v4403_v28 = vpack.c.bf16 %v3356_v20, %v3355_v19  ;;  %v4365_v31 = vpack.c.bf16 %v3241_v26, %v3239_v25  ;;  %v3452_v25 = vld [vmem:[%s6825_s13 + $0x8] sm:$0xff] }
 0x6e5   : > { %4404 = vmatpush3.bf16.msra.mxu1 %v4403_v28 }
 0x6e6   : > { %4348 = vmatpush1.bf16.msra.mxu0 %v4347_v37  ;;  %v4407_v37 = vpack.c.bf16 %v3358_v30, %v3357_v16  ;;  %4406 = vmatprep.subr.bf16.mxu1 %v4405_v29  ;;  %v3454_v16 = vld [vmem:[%s6825_s13 + $0x18] sm:$0xff] }
 0x6e7   : > { %4350 = vmatprep.subr.bf16.mxu0 %v4349_v40  ;;  %v3247_v40 = vld [vmem:[%s6821_s9 + $0xfa8] sm:$0xff] }
 0x6e8   : > { %v4373_v44 = vpack.c.bf16 %v3249_v41, %v3247_v40  ;;  %v4433_v40 = vpack.c.bf16 %v3462_v42, %v3461_v39  ;;  %v3463_v41 = vld [vmem:[%s6825_s13 + $0x60] sm:$0xff] }
 0x6e9   : > { %4408 = vmatpush3.bf16.msra.mxu1 %v4407_v37  ;;  %v3459_v37 = vld [vmem:[%s6825_s13 + $0x40] sm:$0xff] }
 0x6ea   : > { %4352 = vmatpush1.bf16.msra.mxu0 %v4351_v51  ;;  %v3250_v51 = vld [vmem:[%s6821_s9 + $0xfc0] sm:$0xff]  ;;  %4410 = vmatprep.subr.bf16.mxu1 %v4409_v1 }
 0x6eb   : > { %4354 = vmatprep.subr.bf16.mxu0 %v4353_v8  ;;  %v4379_v8 = vpack.c.bf16 %v3252_v52, %v3250_v51 }
 0x6ed   : > { %3218 = vmatmul.mubr.f32.vlgmr.msra.gmra.mrb[2].mxu0 %v5701_v7 }
 0x6ee   : > { %4356 = vmatpush1.bf16.msra.mxu0 %v4355_v2  ;;  %3322 = vmatprep.mubr.f32.mxu0 %v4510_v58  ;;  %v3359_v2 = vld [vmem:[%s6823_s11 + $0x60] sm:$0xff] }
 0x6ef   : > { %4358 = vmatprep.subr.bf16.mxu0 %v4357_v10  ;;  %v4411_v4 = vpack.c.bf16 %v3360_v3, %v3359_v2  ;;  %v3377_v10 = vld [vmem:[%s6823_s11 + $0xf0] sm:$0xff] }
 0x6f0   : > { %v4413_v6 = vpack.c.bf16 %v3378_v5, %v3377_v10 }
 0x6f1   : > { %4412 = vmatpush3.bf16.msra.mxu1 %v4411_v4 }
 0x6f2   : > { %4360 = vmatpush1.bf16.msra.mxu0 %v4359_v15  ;;  %4414 = vmatprep.subr.bf16.mxu1 %v4413_v6  ;;  %v3339_v15 = vsub.s32 1, %v4928_v18  ;;  %v3453_v18 = vld [vmem:[%s6825_s13 + $0x10] sm:$0xff] }
 0x6f3   : > { %4362 = vmatprep.subr.bf16.mxu0 %v4361_v21  ;;  %v4421_v30 = vpack.c.bf16 %v3454_v16, %v3453_v18 }
 0x6f4   : > { %v3340_v19 = vrot.slane %v3331_v14, %v3339_v15 }
 0x6f5   : > { %4416 = vmatpush3.bf16.msra.mxu1 %v4415_v13 }
 0x6f6   : > { %4364 = vmatpush1.bf16.msra.mxu0 %v4363_v50  ;;  %4417 = vmatprep.subr.bf16.mxu1 %v4507_v60  ;;  %v4418_v50 = vpack.c.bf16 %v3452_v25, %v3451_v24 }
 0x6f7   : > { %4366 = vmatprep.subr.bf16.mxu0 %v4365_v31  ;;  %v3455_v31 = vld [vmem:[%s6825_s13 + $0x20] sm:$0xff] }
 0x6f8   : > { %v4424_v33 = vpack.c.bf16 %v3456_v32, %v3455_v31 }
 0x6fa   : > { %4368 = vmatpush1.bf16.msra.mxu0 %v4367_v56  ;;  %v3460_v56 = vld [vmem:[%s6825_s13 + $0x48] sm:$0xff] }
 0x6fb   : > { %4370 = vmatprep.subr.bf16.mxu0 %v4369_v38  ;;  %v4430_v38 = vpack.c.bf16 %v3460_v56, %v3459_v37 }
 0x6fe   : > { %4372 = vmatpush1.bf16.msra.mxu0 %v4371_v43  ;;  %v3464_v43 = vld [vmem:[%s6825_s13 + $0x68] sm:$0xff] }
 0x6ff   : > { %4374 = vmatprep.subr.bf16.mxu0 %v4373_v44  ;;  %v4436_v44 = vpack.c.bf16 %v3464_v43, %v3463_v41 }
 0x702   : > { %4376 = vmatpush1.bf16.msra.mxu0 %v4375_v9  ;;  %v3379_v9 = vld [vmem:[%s6824_s12] sm:$0x1] }
 0x703   : > { %4378 = vmatprep.subr.bf16.mxu0 %v4377_v49 }
 0x706   : > { %4380 = vmatpush1.bf16.msra.mxu0 %v4379_v8 }
 0x707   : > { %4382 = vmatprep.subr.bf16.mxu0 %v4381_v55 }
 0x70a   : > { %4384 = vmatpush1.bf16.msra.mxu0 %v4383_v62 }
 0x70d   : > { %3323 = vmatmul.mubr.f32.vlgmr.msra.gmra.mrb[2].mxu0 %v5701_v7 }
 0x760   : > { %v2274_v22 = vpop.f32.mrb[12].mxu1 }
 0x761   : > { %v2276_v7 = vpop.f32.mrb[13].mxu1 }
 0x7e0   : > { %v3324_v17 = vpop.f32.mrb[2].mxu0 }
 0x7e1   : > { %v4441_v20 = vadd.f32 %v3324_v17, %v2274_v22  ;;  %v3326_v21 = vpop.f32.mrb[3].mxu0 }
 0x7e2   : > { %v4442_v34 = vadd.f32 %v3326_v21, %v2276_v7 }
 0x7e3   : > { %v3343_v23 = vadd.f32 %v4441_v20, %v3336_v59 }
 0x7e4   : > { %v3344_v26 = vadd.f32 %v4442_v34, %v3340_v19 }
 0x7e5   : > { %v3345_v29 = vmax.f32 %v3343_v23, 0.0 }
 0x7e6   : > { %v3346_v28 = vmax.f32 %v3344_v26, 0.0 }
 0x7e8   : > { %3444 = vmatprep.mubr.f32.mxu1 %v3346_v28 }
 0x7e9   : > { %3445 = vmatmul.mubr.f32.vlgmr.msra.gmra.mrb[14].mxu1 %v3345_v29 }
 0x7ea   : > { %4419 = vmatpush3.bf16.msra.mxu1 %v4418_v50  ;;  %3796 = vmatprep.mubr.msk.f32.mxu1 %vm4509_vm7, %v4510_v58  ;;  %v3458_v58 = vld [vmem:[%s6825_s13 + $0x38] sm:$0xff] }
 0x7eb   : > { %4420 = vmatprep.subr.bf16.mxu1 %v4507_v60  ;;  %v4427_v36 = vpack.c.bf16 %v3458_v58, %v3457_v35 }
 0x7ee   : > { %4422 = vmatpush3.bf16.msra.mxu1 %v4421_v30 }
 0x7ef   : > { %4423 = vmatprep.subr.bf16.mxu1 %v4507_v60 }
 0x7f2   : > { %4425 = vmatpush3.bf16.msra.mxu1 %v4424_v33 }
 0x7f3   : > { %4426 = vmatprep.subr.bf16.mxu1 %v4507_v60 }
 0x7f6   : > { %4428 = vmatpush3.bf16.msra.mxu1 %v4427_v36 }
 0x7f7   : > { %4429 = vmatprep.subr.bf16.mxu1 %v4507_v60 }
 0x7fa   : > { %4431 = vmatpush3.bf16.msra.mxu1 %v4430_v38 }
 0x7fb   : > { %4432 = vmatprep.subr.bf16.mxu1 %v4507_v60 }
 0x7fe   : > { %4434 = vmatpush3.bf16.msra.mxu1 %v4433_v40 }
 0x7ff   : > { %4435 = vmatprep.subr.bf16.mxu1 %v4507_v60 }
 0x802   : > { %4437 = vmatpush3.bf16.msra.mxu1 %v4436_v44 }
 0x803   : > { %4438 = vmatprep.subr.bf16.mxu1 %v4507_v60  ;;  %v3467_v60 = vld [vmem:[#allocation2] sm:$0x1] }
 0x806   : > { %4440 = vmatpush3.bf16.msra.mxu1 %v4439_v47 }
 0x8bc   : > { %v3680_v48 = vpop.f32.mrb[14].mxu1 }
 0x8bd   : > { %v3681_v49 = vpop.f32.mrb[15].mxu1 }
 0x8be   : > { %v3682_v51 = vadd.f32 %v3681_v49, %v3680_v48 }
 0x8c0   : > { %v3447_v52 = vadd.f32 %v3682_v51, %v3379_v9 }
 0x8c2   : > { %v3450_v53 = vmax.f32 %v3447_v52, 0.0 }
 0x8c4   : > { %3797 = vmatmul.mubr.f32.vlgmr.msra.gmra.mrb[16].mxu1 %v3450_v53 }
 0x997   : > { %v3534_v54 = vpop.f32.mrb[16].mxu1 }
 0x998   : > { %v3535_v8 = vadd.f32 %v3534_v54, %v3467_v60  ;;  %v3798_v55 = vpop.f32.mrb[17].mxu1 }
 0x99a   : > { %3539 = vst.msk [vmem:[%s492_s24] sm:$0x1] %vm3538_vm0, %v3535_v8 }
 0x99b PF: > { %s27_s20 = sadd.s32 1, %s4497_s20  }
 0x99c   : > { %p24_p4 = scmp.ge.s32.totalorder %s27_s20, 4  }
 0x99e   :  { %26 = sbr.rel (!%p24_p4) target bundleno = 3 (0x3), region = 110 }

</bundles_post_ra>
